<compile_context>
chip_gen: v5e
topology: v5e:2x2
jax: 0.10.0
libtpu: 0.0.40
codegen_flags: <defaults>
</compile_context>

<pallas_src>
import jax
import jax.numpy as jnp
from jax.experimental import pallas as pl
from jax.experimental.pallas import tpu as pltpu

_CONV1_TILE_N = 4096          # lane tile for conv1+pool (K=75):  ~5 MB double-buffered
_CONV2_TILE_N = 1024          # lane tile for conv2+pool (K=500): ~8.4 MB double-buffered
_FC_TILE_B = 512              # batch tile for the fused FC tail
_VMEM_LIMIT = 32 * 1024 * 1024
_GRID_SEMANTICS = ("parallel",)


# ---------------- Pallas kernels ----------------

def _conv_pool_relu_kernel(w_ref, a00_ref, a01_ref, a10_ref, a11_ref, b_ref, o_ref):
    """Fused conv-as-matmul + bias + ReLU + 2x2 max-pool epilogue.

    w: (Cout, K) bf16; a_xy: (K, TN) bf16, one im2col slab per pooling corner,
    columns indexed by pooled output position; b: (Cout, 1) f32.
    o = relu(max_xy(w @ a_xy) + b)  -> (Cout, TN), lane-dense.
    """
    m = jnp.dot(w_ref[...], a00_ref[...], preferred_element_type=jnp.float32)
    m = jnp.maximum(m, jnp.dot(w_ref[...], a01_ref[...],
                               preferred_element_type=jnp.float32))
    m = jnp.maximum(m, jnp.dot(w_ref[...], a10_ref[...],
                               preferred_element_type=jnp.float32))
    m = jnp.maximum(m, jnp.dot(w_ref[...], a11_ref[...],
                               preferred_element_type=jnp.float32))
    o_ref[...] = jnp.maximum(m + b_ref[...], 0.0).astype(o_ref.dtype)


def _fc_tail_kernel(x_ref, pose_ref, w1_ref, b1_ref, w2i_ref, w2p_ref, b2_ref,
                    w3_ref, b3_ref, o_ref):
    # fc1 + ReLU
    h1 = jnp.dot(x_ref[...], w1_ref[...], preferred_element_type=jnp.float32)
    h1 = jnp.maximum(h1 + b1_ref[...], 0.0)
    # fc2 on [h1 | pose] without materializing the concat: split weight.
    h2 = (jnp.dot(h1, w2i_ref[...], preferred_element_type=jnp.float32)
          + jnp.dot(pose_ref[...], w2p_ref[...], preferred_element_type=jnp.float32))
    h2 = jnp.maximum(h2 + b2_ref[...], 0.0)
    # fc3 (no activation)
    o_ref[...] = (jnp.dot(h2, w3_ref[...], preferred_element_type=jnp.float32)
                  + b3_ref[...])


# ---------------- Pallas wrappers ----------------

def conv_pool_relu(w, corners, b, *, out_dtype, tile_n):
    """relu(maxpool2x2(w @ im2col + b)) computed from 4 pooling-corner slabs.

    w: (Cout, K) bf16; corners: 4 arrays (K, M) bf16 with M = B*Hp*Wp;
    b: (Cout, 1) f32.  Returns (Cout, M) in out_dtype.
    """
    Cout, K = w.shape
    M = corners[0].shape[1]
    out_shape = jax.ShapeDtypeStruct((Cout, M), out_dtype)

    if M <= tile_n:
        # Small problem: single full-array block (block == array dims allowed).
        return pl.pallas_call(
            _conv_pool_relu_kernel,
            out_shape=out_shape,
            in_specs=[pl.BlockSpec(memory_space=pltpu.MemorySpace.VMEM)] * 6,
            out_specs=pl.BlockSpec(memory_space=pltpu.MemorySpace.VMEM),
            compiler_params=pltpu.CompilerParams(vmem_limit_bytes=_VMEM_LIMIT),
        )(w, *corners, b)

    a_spec = pl.BlockSpec((K, tile_n), lambda i: (0, i))      # slabs tiled on lanes
    return pl.pallas_call(
        _conv_pool_relu_kernel,
        out_shape=out_shape,
        grid=(pl.cdiv(M, tile_n),),
        in_specs=[
            pl.BlockSpec((Cout, K), lambda i: (0, 0)),        # weight: resident
            a_spec, a_spec, a_spec, a_spec,
            pl.BlockSpec((Cout, 1), lambda i: (0, 0)),        # bias: resident
        ],
        out_specs=pl.BlockSpec((Cout, tile_n), lambda i: (0, i)),
        compiler_params=pltpu.CompilerParams(
            dimension_semantics=_GRID_SEMANTICS, vmem_limit_bytes=_VMEM_LIMIT),
    )(w, *corners, b)


def fc_tail(x_flat, pose, p, *, tile_b=_FC_TILE_B):
    """Fused fc1(+ReLU) -> [·|pose] -> fc2(+ReLU) -> fc3, gridded over batch."""
    B, d_img = x_flat.shape
    d_pose = pose.shape[1]
    num_action = p["fc3_w"].shape[1]
    out_shape = jax.ShapeDtypeStruct((B, num_action), jnp.float32)
    args = (x_flat, pose, p["fc1_w"], p["fc1_b"], p["fc2_w_img"], p["fc2_w_pose"],
            p["fc2_b"], p["fc3_w"], p["fc3_b"])

    if B <= tile_b:
        return pl.pallas_call(
            _fc_tail_kernel,
            out_shape=out_shape,
            in_specs=[pl.BlockSpec(memory_space=pltpu.MemorySpace.VMEM)] * 9,
            out_specs=pl.BlockSpec(memory_space=pltpu.MemorySpace.VMEM),
            compiler_params=pltpu.CompilerParams(vmem_limit_bytes=_VMEM_LIMIT),
        )(*args)

    def resident(shape):
        return pl.BlockSpec(shape, lambda i: (0, 0))

    return pl.pallas_call(
        _fc_tail_kernel,
        out_shape=out_shape,
        grid=(pl.cdiv(B, tile_b),),
        in_specs=[
            pl.BlockSpec((tile_b, d_img), lambda i: (i, 0)),
            pl.BlockSpec((tile_b, d_pose), lambda i: (i, 0)),
            resident(p["fc1_w"].shape), resident(p["fc1_b"].shape),
            resident(p["fc2_w_img"].shape), resident(p["fc2_w_pose"].shape),
            resident(p["fc2_b"].shape), resident(p["fc3_w"].shape),
            resident(p["fc3_b"].shape),
        ],
        out_specs=pl.BlockSpec((tile_b, num_action), lambda i: (i, 0)),
        compiler_params=pltpu.CompilerParams(
            dimension_semantics=_GRID_SEMANTICS, vmem_limit_bytes=_VMEM_LIMIT),
    )(*args)


# ---------------- glue: pooling-corner im2col (XLA gather-copies) ----------------

def _pooled_dims(H, W, kh, kw, stride, pool):
    Ho = (H - kh) // stride + 1
    Wo = (W - kw) // stride + 1
    return Ho // pool, Wo // pool


def pool_corners_nchw(x, kh, kw, stride, pool):
    """x: (B, C, H, W) -> 4 slabs (C*kh*kw, B*Hp*Wp) bf16, K ordered (Cin, KH, KW).

    Slab (di,dj) holds the im2col patches of the conv output positions that form
    pooling-window corner (di,dj); matches weights stored torch_w.reshape(Cout,-1).
    """
    B, C, H, W = x.shape
    Hp, Wp = _pooled_dims(H, W, kh, kw, stride, pool)
    step = stride * pool
    slabs = []
    for di in range(pool):
        for dj in range(pool):
            cols = []
            for ki in range(kh):
                for kj in range(kw):
                    h0 = stride * di + ki
                    w0 = stride * dj + kj
                    cols.append(x[:, :, h0:h0 + step * (Hp - 1) + 1:step,
                                        w0:w0 + step * (Wp - 1) + 1:step])
            p = jnp.stack(cols, axis=0)                       # (kh*kw, B, C, Hp, Wp)
            p = jnp.transpose(p, (2, 0, 1, 3, 4))             # (C, kh*kw, B, Hp, Wp)
            slabs.append(p.reshape(C * kh * kw, B * Hp * Wp).astype(jnp.bfloat16))
    return slabs, Hp, Wp


def pool_corners_cnhw(x, kh, kw, stride, pool):
    """x: (C, B, H, W) -> 4 slabs (kh*kw*C, B*Hp*Wp) bf16, K ordered (KH, KW, Cin).

    Matches weights stored torch_w.transpose(0,2,3,1).reshape(Cout,-1).
    """
    C, B, H, W = x.shape
    Hp, Wp = _pooled_dims(H, W, kh, kw, stride, pool)
    step = stride * pool
    slabs = []
    for di in range(pool):
        for dj in range(pool):
            cols = []
            for ki in range(kh):
                for kj in range(kw):
                    h0 = stride * di + ki
                    w0 = stride * dj + kj
                    cols.append(x[:, :, h0:h0 + step * (Hp - 1) + 1:step,
                                        w0:w0 + step * (Wp - 1) + 1:step])
            p = jnp.stack(cols, axis=0)                       # (kh*kw, C, B, Hp, Wp)
            slabs.append(p.reshape(kh * kw * C, B * Hp * Wp).astype(jnp.bfloat16))
    return slabs, Hp, Wp


# ---------------- deterministic parameter init (kernel layouts) ----------------

def init_params(key, num_action=3):
    """Params stored exactly in the layout the kernels consume.

    Mapping from a real PyTorch DQN checkpoint:
      conv1_w : torch (20,3,5,5)  -> w.reshape(20, 75).astype(bf16)              # K=(Cin,KH,KW)
      conv2_w : torch (40,20,5,5) -> w.transpose(0,2,3,1).reshape(40,500).bf16   # K=(KH,KW,Cin)
      conv*_b : torch (Cout,)     -> reshape(Cout, 1), f32
      fc1_w   : torch (200,1000)  -> .T  (stored (1000, 200))
      fc2_w   : torch (50,204)    -> .T, rows split: first 200 = conv feats, last 4 = pose
      fc3_w   : torch (A,50)      -> .T
      fc*_b   : reshape(1, out), f32
    """
    ks = jax.random.split(key, 11)

    def u(k, shape, fan_in, dtype=jnp.float32):
        bound = 1.0 / jnp.sqrt(jnp.float32(fan_in))
        return jax.random.uniform(k, shape, jnp.float32, -bound, bound).astype(dtype)

    return {
        "conv1_w": u(ks[0], (20, 5 * 5 * 3), 3 * 25, jnp.bfloat16),
        "conv1_b": u(ks[1], (20, 1), 3 * 25),
        "conv2_w": u(ks[2], (40, 5 * 5 * 20), 20 * 25, jnp.bfloat16),
        "conv2_b": u(ks[3], (40, 1), 20 * 25),
        "fc1_w": u(ks[4], (40 * 5 * 5, 200), 40 * 5 * 5),
        "fc1_b": u(ks[5], (1, 200), 40 * 5 * 5),
        "fc2_w_img": u(ks[6], (200, 50), 204),
        "fc2_w_pose": u(ks[7], (4, 50), 204),
        "fc2_b": u(ks[8], (1, 50), 204),
        "fc3_w": u(ks[9], (50, num_action), 50),
        "fc3_b": u(ks[10], (1, num_action), 50),
    }


# ---------------- forward pass ----------------

def dqn_forward(params, image_nchw, pose):
    """image_nchw: (B, 3, 96, 96) float32 (PyTorch NCHW), pose: (B, 4)."""
    B = image_nchw.shape[0]

    # conv1 + ReLU + 2x2 max-pool, fused into one Pallas kernel.
    a1, hp1, wp1 = pool_corners_nchw(image_nchw, 5, 5, 2, 2)           # 4 x (75, B*23*23) bf16
    y1 = conv_pool_relu(params["conv1_w"], a1, params["conv1_b"],
                        out_dtype=jnp.bfloat16, tile_n=_CONV1_TILE_N)  # (20, B*529) bf16
    y1 = y1.reshape(20, B, hp1, wp1)                                   # CNHW

    # conv2 + ReLU + 2x2 max-pool, fused.
    a2, hp2, wp2 = pool_corners_cnhw(y1, 5, 5, 2, 2)                   # 4 x (500, B*25) bf16
    y2 = conv_pool_relu(params["conv2_w"], a2, params["conv2_b"],
                        out_dtype=jnp.float32, tile_n=_CONV2_TILE_N)   # (40, B*25) f32
    p2 = y2.reshape(40, B, hp2, wp2)

    # flatten to (B, C*H*W) in torch .view() order (tiny 8 KB-per-image copy)
    x_flat = jnp.transpose(p2, (1, 0, 2, 3)).reshape(B, -1)            # (B, 1000)

    # fused fc1 -> (+pose) -> fc2 -> fc3, gridded over batch when large
    return fc_tail(x_flat, pose, params)                               # (B, num_action)


if __name__ == "__main__":
    key = jax.random.PRNGKey(0)
    kp, ki, kq = jax.random.split(key, 3)
    params = init_params(kp, num_action=3)
    # fc1 requires 40*5*5 flattened features -> image spatial size is 96x96.
    image = jax.random.uniform(ki, (2, 3, 96, 96), jnp.float32)
    pose = jax.random.uniform(kq, (2, 4), jnp.float32)

    out = jax.jit(dqn_forward)(params, image, pose)
    jax.block_until_ready(out)
    assert out.shape == (2, 3) and out.dtype == jnp.float32
    assert bool(jnp.all(jnp.isfinite(out)))
    print("KERNEL_OK")
</pallas_src>

<mosaic_0001>
module attributes {stable_mosaic.version = 11 : i64} {
  func.func @_conv_pool_relu_kernel(%arg0: memref<20x75xbf16, #tpu.memory_space<vmem>>, %arg1: memref<75x1058xbf16, #tpu.memory_space<vmem>>, %arg2: memref<75x1058xbf16, #tpu.memory_space<vmem>>, %arg3: memref<75x1058xbf16, #tpu.memory_space<vmem>>, %arg4: memref<75x1058xbf16, #tpu.memory_space<vmem>>, %arg5: memref<20x1xf32, #tpu.memory_space<vmem>>, %arg6: memref<20x1058xbf16, #tpu.memory_space<vmem>>) attributes {dimension_semantics = [], scalar_prefetch = 0 : i64, scratch_operands = 0 : i64, tpu.core_type = #tpu.core_type<tc>} {
    %c0 = arith.constant 0 : index
    %c0_0 = arith.constant 0 : index
    %0 = vector.load %arg0[%c0, %c0_0] : memref<20x75xbf16, #tpu.memory_space<vmem>>, vector<20x75xbf16>
    %c0_1 = arith.constant 0 : index
    %c0_2 = arith.constant 0 : index
    %1 = vector.load %arg1[%c0_1, %c0_2] : memref<75x1058xbf16, #tpu.memory_space<vmem>>, vector<75x1058xbf16>
    %cst = arith.constant dense<0.000000e+00> : vector<20x1058xf32>
    %2 = tpu.matmul %0, %1, %cst {dimension_numbers = #tpu.dot_dimension_numbers<[1], [0], [0], [1], [0, 0, 1, 1], [], []>} : vector<20x75xbf16>, vector<75x1058xbf16>, vector<20x1058xf32> -> vector<20x1058xf32>
    %c0_3 = arith.constant 0 : index
    %c0_4 = arith.constant 0 : index
    %3 = vector.load %arg0[%c0_3, %c0_4] : memref<20x75xbf16, #tpu.memory_space<vmem>>, vector<20x75xbf16>
    %c0_5 = arith.constant 0 : index
    %c0_6 = arith.constant 0 : index
    %4 = vector.load %arg2[%c0_5, %c0_6] : memref<75x1058xbf16, #tpu.memory_space<vmem>>, vector<75x1058xbf16>
    %cst_7 = arith.constant dense<0.000000e+00> : vector<20x1058xf32>
    %5 = tpu.matmul %3, %4, %cst_7 {dimension_numbers = #tpu.dot_dimension_numbers<[1], [0], [0], [1], [0, 0, 1, 1], [], []>} : vector<20x75xbf16>, vector<75x1058xbf16>, vector<20x1058xf32> -> vector<20x1058xf32>
    %6 = arith.maximumf %2, %5 : vector<20x1058xf32>
    %c0_8 = arith.constant 0 : index
    %c0_9 = arith.constant 0 : index
    %7 = vector.load %arg0[%c0_8, %c0_9] : memref<20x75xbf16, #tpu.memory_space<vmem>>, vector<20x75xbf16>
    %c0_10 = arith.constant 0 : index
    %c0_11 = arith.constant 0 : index
    %8 = vector.load %arg3[%c0_10, %c0_11] : memref<75x1058xbf16, #tpu.memory_space<vmem>>, vector<75x1058xbf16>
    %cst_12 = arith.constant dense<0.000000e+00> : vector<20x1058xf32>
    %9 = tpu.matmul %7, %8, %cst_12 {dimension_numbers = #tpu.dot_dimension_numbers<[1], [0], [0], [1], [0, 0, 1, 1], [], []>} : vector<20x75xbf16>, vector<75x1058xbf16>, vector<20x1058xf32> -> vector<20x1058xf32>
    %10 = arith.maximumf %6, %9 : vector<20x1058xf32>
    %c0_13 = arith.constant 0 : index
    %c0_14 = arith.constant 0 : index
    %11 = vector.load %arg0[%c0_13, %c0_14] : memref<20x75xbf16, #tpu.memory_space<vmem>>, vector<20x75xbf16>
    %c0_15 = arith.constant 0 : index
    %c0_16 = arith.constant 0 : index
    %12 = vector.load %arg4[%c0_15, %c0_16] : memref<75x1058xbf16, #tpu.memory_space<vmem>>, vector<75x1058xbf16>
    %cst_17 = arith.constant dense<0.000000e+00> : vector<20x1058xf32>
    %13 = tpu.matmul %11, %12, %cst_17 {dimension_numbers = #tpu.dot_dimension_numbers<[1], [0], [0], [1], [0, 0, 1, 1], [], []>} : vector<20x75xbf16>, vector<75x1058xbf16>, vector<20x1058xf32> -> vector<20x1058xf32>
    %14 = arith.maximumf %10, %13 : vector<20x1058xf32>
    %c0_18 = arith.constant 0 : index
    %c0_19 = arith.constant 0 : index
    %15 = vector.load %arg5[%c0_18, %c0_19] : memref<20x1xf32, #tpu.memory_space<vmem>>, vector<20x1xf32>
    %16 = vector.broadcast %15 : vector<20x1xf32> to vector<20x1058xf32>
    %17 = arith.addf %14, %16 : vector<20x1058xf32>
    %cst_20 = arith.constant 0.000000e+00 : f32
    %18 = vector.broadcast %cst_20 : f32 to vector<20x1058xf32>
    %19 = arith.maximumf %17, %18 : vector<20x1058xf32>
    %20 = arith.truncf %19 : vector<20x1058xf32> to vector<20x1058xbf16>
    %c0_21 = arith.constant 0 : index
    %c0_22 = arith.constant 0 : index
    %21 = vector.load %arg6[%c0_21, %c0_22] : memref<20x1058xbf16, #tpu.memory_space<vmem>>, vector<20x1058xbf16>
    tpu.vector_store %arg6[%c0_21, %c0_22], %20 {strides = array<i32>} : memref<20x1058xbf16, #tpu.memory_space<vmem>>, vector<20x1058xbf16>,
    return
  }
}

module attributes {stable_mosaic.version = 11 : i64} {
  func.func @_conv_pool_relu_kernel(%arg0: memref<40x500xbf16, #tpu.memory_space<vmem>>, %arg1: memref<500x50xbf16, #tpu.memory_space<vmem>>, %arg2: memref<500x50xbf16, #tpu.memory_space<vmem>>, %arg3: memref<500x50xbf16, #tpu.memory_space<vmem>>, %arg4: memref<500x50xbf16, #tpu.memory_space<vmem>>, %arg5: memref<40x1xf32, #tpu.memory_space<vmem>>, %arg6: memref<40x50xf32, #tpu.memory_space<vmem>>) attributes {dimension_semantics = [], scalar_prefetch = 0 : i64, scratch_operands = 0 : i64, tpu.core_type = #tpu.core_type<tc>} {
    %c0 = arith.constant 0 : index
    %c0_0 = arith.constant 0 : index
    %0 = vector.load %arg0[%c0, %c0_0] : memref<40x500xbf16, #tpu.memory_space<vmem>>, vector<40x500xbf16>
    %c0_1 = arith.constant 0 : index
    %c0_2 = arith.constant 0 : index
    %1 = vector.load %arg1[%c0_1, %c0_2] : memref<500x50xbf16, #tpu.memory_space<vmem>>, vector<500x50xbf16>
    %cst = arith.constant dense<0.000000e+00> : vector<40x50xf32>
    %2 = tpu.matmul %0, %1, %cst {dimension_numbers = #tpu.dot_dimension_numbers<[1], [0], [0], [1], [0, 0, 1, 1], [], []>} : vector<40x500xbf16>, vector<500x50xbf16>, vector<40x50xf32> -> vector<40x50xf32>
    %c0_3 = arith.constant 0 : index
    %c0_4 = arith.constant 0 : index
    %3 = vector.load %arg0[%c0_3, %c0_4] : memref<40x500xbf16, #tpu.memory_space<vmem>>, vector<40x500xbf16>
    %c0_5 = arith.constant 0 : index
    %c0_6 = arith.constant 0 : index
    %4 = vector.load %arg2[%c0_5, %c0_6] : memref<500x50xbf16, #tpu.memory_space<vmem>>, vector<500x50xbf16>
    %cst_7 = arith.constant dense<0.000000e+00> : vector<40x50xf32>
    %5 = tpu.matmul %3, %4, %cst_7 {dimension_numbers = #tpu.dot_dimension_numbers<[1], [0], [0], [1], [0, 0, 1, 1], [], []>} : vector<40x500xbf16>, vector<500x50xbf16>, vector<40x50xf32> -> vector<40x50xf32>
    %6 = arith.maximumf %2, %5 : vector<40x50xf32>
    %c0_8 = arith.constant 0 : index
    %c0_9 = arith.constant 0 : index
    %7 = vector.load %arg0[%c0_8, %c0_9] : memref<40x500xbf16, #tpu.memory_space<vmem>>, vector<40x500xbf16>
    %c0_10 = arith.constant 0 : index
    %c0_11 = arith.constant 0 : index
    %8 = vector.load %arg3[%c0_10, %c0_11] : memref<500x50xbf16, #tpu.memory_space<vmem>>, vector<500x50xbf16>
    %cst_12 = arith.constant dense<0.000000e+00> : vector<40x50xf32>
    %9 = tpu.matmul %7, %8, %cst_12 {dimension_numbers = #tpu.dot_dimension_numbers<[1], [0], [0], [1], [0, 0, 1, 1], [], []>} : vector<40x500xbf16>, vector<500x50xbf16>, vector<40x50xf32> -> vector<40x50xf32>
    %10 = arith.maximumf %6, %9 : vector<40x50xf32>
    %c0_13 = arith.constant 0 : index
    %c0_14 = arith.constant 0 : index
    %11 = vector.load %arg0[%c0_13, %c0_14] : memref<40x500xbf16, #tpu.memory_space<vmem>>, vector<40x500xbf16>
    %c0_15 = arith.constant 0 : index
    %c0_16 = arith.constant 0 : index
    %12 = vector.load %arg4[%c0_15, %c0_16] : memref<500x50xbf16, #tpu.memory_space<vmem>>, vector<500x50xbf16>
    %cst_17 = arith.constant dense<0.000000e+00> : vector<40x50xf32>
    %13 = tpu.matmul %11, %12, %cst_17 {dimension_numbers = #tpu.dot_dimension_numbers<[1], [0], [0], [1], [0, 0, 1, 1], [], []>} : vector<40x500xbf16>, vector<500x50xbf16>, vector<40x50xf32> -> vector<40x50xf32>
    %14 = arith.maximumf %10, %13 : vector<40x50xf32>
    %c0_18 = arith.constant 0 : index
    %c0_19 = arith.constant 0 : index
    %15 = vector.load %arg5[%c0_18, %c0_19] : memref<40x1xf32, #tpu.memory_space<vmem>>, vector<40x1xf32>
    %16 = vector.broadcast %15 : vector<40x1xf32> to vector<40x50xf32>
    %17 = arith.addf %14, %16 : vector<40x50xf32>
    %cst_20 = arith.constant 0.000000e+00 : f32
    %18 = vector.broadcast %cst_20 : f32 to vector<40x50xf32>
    %19 = arith.maximumf %17, %18 : vector<40x50xf32>
    %c0_21 = arith.constant 0 : index
    %c0_22 = arith.constant 0 : index
    %20 = vector.load %arg6[%c0_21, %c0_22] : memref<40x50xf32, #tpu.memory_space<vmem>>, vector<40x50xf32>
    tpu.vector_store %arg6[%c0_21, %c0_22], %19 {strides = array<i32>} : memref<40x50xf32, #tpu.memory_space<vmem>>, vector<40x50xf32>,
    return
  }
}

module attributes {stable_mosaic.version = 11 : i64} {
  func.func @_fc_tail_kernel(%arg0: memref<2x1000xf32, #tpu.memory_space<vmem>>, %arg1: memref<2x4xf32, #tpu.memory_space<vmem>>, %arg2: memref<1000x200xf32, #tpu.memory_space<vmem>>, %arg3: memref<1x200xf32, #tpu.memory_space<vmem>>, %arg4: memref<200x50xf32, #tpu.memory_space<vmem>>, %arg5: memref<4x50xf32, #tpu.memory_space<vmem>>, %arg6: memref<1x50xf32, #tpu.memory_space<vmem>>, %arg7: memref<50x3xf32, #tpu.memory_space<vmem>>, %arg8: memref<1x3xf32, #tpu.memory_space<vmem>>, %arg9: memref<2x3xf32, #tpu.memory_space<vmem>>) attributes {dimension_semantics = [], scalar_prefetch = 0 : i64, scratch_operands = 0 : i64, tpu.core_type = #tpu.core_type<tc>} {
    %c0 = arith.constant 0 : index
    %c0_0 = arith.constant 0 : index
    %0 = vector.load %arg0[%c0, %c0_0] : memref<2x1000xf32, #tpu.memory_space<vmem>>, vector<2x1000xf32>
    %c0_1 = arith.constant 0 : index
    %c0_2 = arith.constant 0 : index
    %1 = vector.load %arg2[%c0_1, %c0_2] : memref<1000x200xf32, #tpu.memory_space<vmem>>, vector<1000x200xf32>
    %cst = arith.constant dense<0.000000e+00> : vector<2x200xf32>
    %2 = tpu.matmul %0, %1, %cst {dimension_numbers = #tpu.dot_dimension_numbers<[1], [0], [0], [1], [0, 0, 1, 1], [], []>} : vector<2x1000xf32>, vector<1000x200xf32>, vector<2x200xf32> -> vector<2x200xf32>
    %c0_3 = arith.constant 0 : index
    %c0_4 = arith.constant 0 : index
    %3 = vector.load %arg3[%c0_3, %c0_4] : memref<1x200xf32, #tpu.memory_space<vmem>>, vector<1x200xf32>
    %4 = vector.broadcast %3 : vector<1x200xf32> to vector<2x200xf32>
    %5 = arith.addf %2, %4 : vector<2x200xf32>
    %cst_5 = arith.constant 0.000000e+00 : f32
    %6 = vector.broadcast %cst_5 : f32 to vector<2x200xf32>
    %7 = arith.maximumf %5, %6 : vector<2x200xf32>
    %c0_6 = arith.constant 0 : index
    %c0_7 = arith.constant 0 : index
    %8 = vector.load %arg4[%c0_6, %c0_7] : memref<200x50xf32, #tpu.memory_space<vmem>>, vector<200x50xf32>
    %cst_8 = arith.constant dense<0.000000e+00> : vector<2x50xf32>
    %9 = tpu.matmul %7, %8, %cst_8 {dimension_numbers = #tpu.dot_dimension_numbers<[1], [0], [0], [1], [0, 0, 1, 1], [], []>} : vector<2x200xf32>, vector<200x50xf32>, vector<2x50xf32> -> vector<2x50xf32>
    %c0_9 = arith.constant 0 : index
    %c0_10 = arith.constant 0 : index
    %10 = vector.load %arg1[%c0_9, %c0_10] : memref<2x4xf32, #tpu.memory_space<vmem>>, vector<2x4xf32>
    %c0_11 = arith.constant 0 : index
    %c0_12 = arith.constant 0 : index
    %11 = vector.load %arg5[%c0_11, %c0_12] : memref<4x50xf32, #tpu.memory_space<vmem>>, vector<4x50xf32>
    %cst_13 = arith.constant dense<0.000000e+00> : vector<2x50xf32>
    %12 = tpu.matmul %10, %11, %cst_13 {dimension_numbers = #tpu.dot_dimension_numbers<[1], [0], [0], [1], [0, 0, 1, 1], [], []>} : vector<2x4xf32>, vector<4x50xf32>, vector<2x50xf32> -> vector<2x50xf32>
    %13 = arith.addf %9, %12 : vector<2x50xf32>
    %c0_14 = arith.constant 0 : index
    %c0_15 = arith.constant 0 : index
    %14 = vector.load %arg6[%c0_14, %c0_15] : memref<1x50xf32, #tpu.memory_space<vmem>>, vector<1x50xf32>
    %15 = vector.broadcast %14 : vector<1x50xf32> to vector<2x50xf32>
    %16 = arith.addf %13, %15 : vector<2x50xf32>
    %cst_16 = arith.constant 0.000000e+00 : f32
    %17 = vector.broadcast %cst_16 : f32 to vector<2x50xf32>
    %18 = arith.maximumf %16, %17 : vector<2x50xf32>
    %c0_17 = arith.constant 0 : index
    %c0_18 = arith.constant 0 : index
    %19 = vector.load %arg7[%c0_17, %c0_18] : memref<50x3xf32, #tpu.memory_space<vmem>>, vector<50x3xf32>
    %cst_19 = arith.constant dense<0.000000e+00> : vector<2x3xf32>
    %20 = tpu.matmul %18, %19, %cst_19 {dimension_numbers = #tpu.dot_dimension_numbers<[1], [0], [0], [1], [0, 0, 1, 1], [], []>} : vector<2x50xf32>, vector<50x3xf32>, vector<2x3xf32> -> vector<2x3xf32>
    %c0_20 = arith.constant 0 : index
    %c0_21 = arith.constant 0 : index
    %21 = vector.load %arg8[%c0_20, %c0_21] : memref<1x3xf32, #tpu.memory_space<vmem>>, vector<1x3xf32>
    %22 = vector.broadcast %21 : vector<1x3xf32> to vector<2x3xf32>
    %23 = arith.addf %20, %22 : vector<2x3xf32>
    %c0_22 = arith.constant 0 : index
    %c0_23 = arith.constant 0 : index
    %24 = vector.load %arg9[%c0_22, %c0_23] : memref<2x3xf32, #tpu.memory_space<vmem>>, vector<2x3xf32>
    tpu.vector_store %arg9[%c0_22, %c0_23], %23 {strides = array<i32>} : memref<2x3xf32, #tpu.memory_space<vmem>>, vector<2x3xf32>,
    return
  }
}

</mosaic_0001>

<bundles_post_ra>
// kernel: dqn_forward.3
= control target key start
LH: loop header
LB: loop body
LE: loop exit
PB: predicated region body
PF: predicated region fallthrough
CT: control target
= control target key end

     0   :  { %vm313_vm0 = vcmask 1044480   ;;  %vm314_vm1 = vcmask 1045504   ;;  %v3057_v2 = vmov 65535   ;;  %vm306_vm2 = vcmask 613376   ;;  %s4766_s1 = inlined_call_operand.vmem [shape: bf16[75,1058], index: 1, kind: input, shape index: {}]   ;;  %s4767_s0 = inlined_call_operand.vmem [shape: bf16[20,75], index: 0, kind: input, shape index: {}]   ;;  %s4768_s2 = inlined_call_operand.vmem [shape: bf16[75,1058], index: 2, kind: input, shape index: {}]   ;;  %s4769_s3 = inlined_call_operand.vmem [shape: bf16[75,1058], index: 3, kind: input, shape index: {}]   ;;  %s4770_s4 = inlined_call_operand.vmem [shape: bf16[75,1058], index: 4, kind: input, shape index: {}]   ;;  %s4771_s5 = inlined_call_operand.vmem [shape: f32[20,1], index: 5, kind: input, shape index: {}]   ;;  %s4772_s6 = inlined_call_operand.vmem [shape: bf16[20,1058], index: 6, kind: output, shape index: {}]  }
   0x1   :  { %v2225_v0 = vld [vmem:[%s4766_s1 + $0x120] sm:$0xf]  ;;  %v2912_v1 = vld [vmem:[%s4766_s1 + $0x140] sm:$0x30]  ;;  %v315_v3 = vsel %vm313_vm0, 4294967295, %v3057_v2  ;;  %vm2058_vm3 = vcmask 273408  }
   0x2   :  { %v2226_v4 = vor.u32 %v2912_v1, %v2225_v0  ;;  %v3100_v5 = vsel %vm314_vm1, %v315_v3, 0  ;;  %v2908_v6 = vld [vmem:[%s4766_s1 + $0x124] sm:$0xf]  ;;  %v2227_v7 = vld [vmem:[%s4766_s1 + $0x144] sm:$0x30]  ;;  %vm2069_vm4 = vcmask 271360  }
   0x3   :  { %v2230_v8 = vor.u32 %v2908_v6, %v2227_v7  ;;  %v2233_v9 = vld [vmem:[%s4766_s1 + $0x128] sm:$0xf]  ;;  %v2913_v10 = vld [vmem:[%s4766_s1 + $0x148] sm:$0x30]  ;;  %v2235_v14 = vld [vmem:[%s4766_s1 + $0x14c] sm:$0x30] }
   0x4   :  { %v2909_v11 = vld [vmem:[%s4766_s1 + $0x12c] sm:$0xf]  ;;  %v318_v12 = vand.u32 %v2226_v4, %v3100_v5  ;;  %v2234_v13 = vor.u32 %v2913_v10, %v2233_v9  ;;  %v2189_v15 = vld [vmem:[%s4766_s1 + $0xd8] sm:$0xf]  ;;  %v2903_v16 = vld [vmem:[%s4766_s1 + $0xf8] sm:$0xf0] }
   0x5   :  { %v321_v17 = vand.u32 %v2230_v8, %v3100_v5  ;;  %v2238_v18 = vor.u32 %v2909_v11, %v2235_v14  ;;  %v2899_v19 = vld [vmem:[%s4766_s1 + $0xdc] sm:$0xf]  ;;  %v2191_v20 = vld [vmem:[%s4766_s1 + $0xfc] sm:$0xf0]  ;;  %v2190_v23 = vor.u32 %v2903_v16, %v2189_v15  ;;  %v2904_v24 = vld [vmem:[%s4766_s1 + $0x100] sm:$0xf0] }
   0x6   :  { %v2197_v21 = vld [vmem:[%s4766_s1 + $0xe0] sm:$0xf]  ;;  %347 = vmatpush.bf16.msra.mxu0 %v318_v12  ;;  %v324_v22 = vand.u32 %v2234_v13, %v3100_v5  ;;  %v2900_v25 = vld [vmem:[%s4766_s1 + $0xe4] sm:$0xf]  ;;  %v2199_v26 = vld [vmem:[%s4766_s1 + $0x104] sm:$0xf0]  ;;  %v2194_v28 = vor.u32 %v2899_v19, %v2191_v20 }
   0x7   :  { %365 = vmatpush.bf16.msra.mxu1 %v321_v17  ;;  %v327_v27 = vand.u32 %v2238_v18, %v3100_v5  ;;  %v2153_v29 = vld [vmem:[%s4766_s1 + $0x90] sm:$0xf]  ;;  %v2894_v30 = vld [vmem:[%s4766_s1 + $0xb0] sm:$0xf0]  ;;  %v2198_v31 = vor.u32 %v2904_v24, %v2197_v21  ;;  %v2155_v33 = vld [vmem:[%s4766_s1 + $0xb4] sm:$0xf0]  ;;  %v2202_v34 = vor.u32 %v2900_v25, %v2199_v26 }
   0x8   :  { %383 = vmatpush.bf16.msra.mxu2 %v324_v22  ;;  %v2890_v32 = vld [vmem:[%s4766_s1 + $0x94] sm:$0xf]  ;;  %v2161_v35 = vld [vmem:[%s4766_s1 + $0x98] sm:$0xf]  ;;  %v2895_v36 = vld [vmem:[%s4766_s1 + $0xb8] sm:$0xf0]  ;;  %v2154_v37 = vor.u32 %v2894_v30, %v2153_v29 }
   0x9   :  { %401 = vmatpush.bf16.msra.mxu3 %v327_v27  ;;  %v2891_v38 = vld [vmem:[%s4766_s1 + $0x9c] sm:$0xf]  ;;  %v2163_v39 = vld [vmem:[%s4766_s1 + $0xbc] sm:$0xf0]  ;;  %v2158_v40 = vor.u32 %v2890_v32, %v2155_v33  ;;  %v2117_v41 = vld [vmem:[%s4766_s1 + $0x48] sm:$0xf]  ;;  %v2162_v44 = vor.u32 %v2895_v36, %v2161_v35 }
   0xa   :  { %348 = vmatpush.bf16.msra.mxu0 %v2190_v23  ;;  %v2885_v42 = vld [vmem:[%s4766_s1 + $0x68] sm:$0xf0]  ;;  %v2119_v45 = vld [vmem:[%s4766_s1 + $0x6c] sm:$0xf0]  ;;  %v2886_v47 = vld [vmem:[%s4766_s1 + $0x70] sm:$0xf0]  ;;  %v2166_v48 = vor.u32 %v2891_v38, %v2163_v39 }
   0xb   :  { %366 = vmatpush.bf16.msra.mxu1 %v2194_v28  ;;  %v2881_v43 = vld [vmem:[%s4766_s1 + $0x4c] sm:$0xf]  ;;  %v2125_v46 = vld [vmem:[%s4766_s1 + $0x50] sm:$0xf]  ;;  %v2882_v49 = vld [vmem:[%s4766_s1 + $0x54] sm:$0xf]  ;;  %v2118_v52 = vor.u32 %v2885_v42, %v2117_v41 }
   0xc   :  { %384 = vmatpush.bf16.msra.mxu2 %v2198_v31  ;;  %v2127_v50 = vld [vmem:[%s4766_s1 + $0x74] sm:$0xf0]  ;;  %v2081_v51 = vld [vmem:[%s4766_s1] sm:$0xf]  ;;  %v2876_v53 = vld [vmem:[%s4766_s1 + $0x20] sm:$0xf0]  ;;  %v2122_v56 = vor.u32 %v2881_v43, %v2119_v45  ;;  %v2126_v61 = vor.u32 %v2886_v47, %v2125_v46 }
   0xd   :  { %402 = vmatpush.bf16.msra.mxu3 %v2202_v34  ;;  %v2872_v54 = vld [vmem:[%s4766_s1 + $0x4] sm:$0xf]  ;;  %v2083_v55 = vld [vmem:[%s4766_s1 + $0x24] sm:$0xf0]  ;;  %v2249_v58 = vld [vmem:[%s4766_s1 + $0x138] sm:$0xf]  ;;  %v2130_v1 = vor.u32 %v2882_v49, %v2127_v50  ;;  %v2082_v7 = vor.u32 %v2876_v53, %v2081_v51 }
   0xe   :  { %349 = vmatpush.bf16.msra.mxu0 %v2154_v37  ;;  %v2089_v57 = vld [vmem:[%s4766_s1 + $0x8] sm:$0xf]  ;;  %v2915_v59 = vld [vmem:[%s4766_s1 + $0x158] sm:$0x30]  ;;  %v2251_v62 = vld [vmem:[%s4766_s1 + $0x15c] sm:$0x30]  ;;  %v2086_v12 = vor.u32 %v2872_v54, %v2083_v55 }
   0xf   :  { %367 = vmatpush.bf16.msra.mxu1 %v2158_v40  ;;  %v2911_v60 = vld [vmem:[%s4766_s1 + $0x13c] sm:$0xf]  ;;  %v2241_v63 = vld [vmem:[%s4766_s1 + $0x130] sm:$0xf]  ;;  %v2914_v0 = vld [vmem:[%s4766_s1 + $0x150] sm:$0x30]  ;;  %v2250_v10 = vor.u32 %v2915_v59, %v2249_v58 }
  0x10   :  { %385 = vmatpush.bf16.msra.mxu2 %v2162_v44  ;;  %v2877_v2 = vld [vmem:[%s4766_s1 + $0x28] sm:$0xf0]  ;;  %v2242_v3 = vor.u32 %v2914_v0, %v2241_v63  ;;  %v2910_v4 = vld [vmem:[%s4766_s1 + $0x134] sm:$0xf]  ;;  %v2243_v6 = vld [vmem:[%s4766_s1 + $0x154] sm:$0x30]  ;;  %v2254_v13 = vor.u32 %v2911_v60, %v2251_v62 }
  0x11   :  { %403 = vmatpush.bf16.msra.mxu3 %v2166_v48  ;;  %v2873_v8 = vld [vmem:[%s4766_s1 + $0xc] sm:$0xf]  ;;  %v2091_v9 = vld [vmem:[%s4766_s1 + $0x2c] sm:$0xf0]  ;;  %v2246_v11 = vor.u32 %v2910_v4, %v2243_v6  ;;  %v2090_v15 = vor.u32 %v2877_v2, %v2089_v57  ;;  %v3249_v18 = vld [vmem:[%s4767_s0] sm:$0xff]  ;;  %v336_v21 = vand.u32 %v2250_v10, %v3100_v5 }
  0x12   :  { %350 = vmatpush.bf16.msra.mxu0 %v2118_v52  ;;  %v330_v14 = vand.u32 %v2242_v3, %v3100_v5  ;;  %v2094_v17 = vor.u32 %v2873_v8, %v2091_v9  ;;  %v2205_v19 = vld [vmem:[%s4766_s1 + $0xe8] sm:$0xf]  ;;  %v2905_v20 = vld [vmem:[%s4766_s1 + $0x108] sm:$0xf0]  ;;  %v2207_v23 = vld [vmem:[%s4766_s1 + $0x10c] sm:$0xf0]  ;;  %v339_v24 = vand.u32 %v2254_v13, %v3100_v5 }
  0x13   :  { %368 = vmatpush.bf16.msra.mxu1 %v2122_v56  ;;  %v333_v16 = vand.u32 %v2246_v11, %v3100_v5  ;;  %v2901_v22 = vld [vmem:[%s4766_s1 + $0xec] sm:$0xf]  ;;  %v2213_v25 = vld [vmem:[%s4766_s1 + $0xf0] sm:$0xf]  ;;  %v2906_v26 = vld [vmem:[%s4766_s1 + $0x110] sm:$0xf0]  ;;  %v2206_v29 = vor.u32 %v2905_v20, %v2205_v19 }
  0x14   :  { %386 = vmatpush.bf16.msra.mxu2 %v2126_v61  ;;  %v2902_v27 = vld [vmem:[%s4766_s1 + $0xf4] sm:$0xf]  ;;  %v2215_v28 = vld [vmem:[%s4766_s1 + $0x114] sm:$0xf0]  ;;  %v2210_v30 = vor.u32 %v2901_v22, %v2207_v23  ;;  %v2169_v31 = vld [vmem:[%s4766_s1 + $0xa0] sm:$0xf]  ;;  %v2214_v33 = vor.u32 %v2906_v26, %v2213_v25 }
  0x15   :  { %404 = vmatpush.bf16.msra.mxu3 %v2130_v1  ;;  %v2896_v32 = vld [vmem:[%s4766_s1 + $0xc0] sm:$0xf0]  ;;  %v2171_v35 = vld [vmem:[%s4766_s1 + $0xc4] sm:$0xf0]  ;;  %v2218_v36 = vor.u32 %v2902_v27, %v2215_v28  ;;  %v2897_v38 = vld [vmem:[%s4766_s1 + $0xc8] sm:$0xf0] }
  0x16   :  { %351 = vmatpush.bf16.msra.mxu0 %v2082_v7  ;;  %v2892_v34 = vld [vmem:[%s4766_s1 + $0xa4] sm:$0xf]  ;;  %v2177_v37 = vld [vmem:[%s4766_s1 + $0xa8] sm:$0xf]  ;;  %v2893_v39 = vld [vmem:[%s4766_s1 + $0xac] sm:$0xf]  ;;  %v2170_v42 = vor.u32 %v2896_v32, %v2169_v31 }
  0x17   :  { %369 = vmatpush.bf16.msra.mxu1 %v2086_v12  ;;  %v2179_v40 = vld [vmem:[%s4766_s1 + $0xcc] sm:$0xf0]  ;;  %v26_v41 = vld [vmem:[%s4767_s0 + $0x8] sm:$0x3]  ;;  %v2174_v43 = vor.u32 %v2892_v34, %v2171_v35  ;;  %v2141_v44 = vld [vmem:[%s4766_s1 + $0x60] sm:$0xf]  ;;  %v2178_v47 = vor.u32 %v2897_v38, %v2177_v37 }
  0x18   :  { %387 = vmatpush.bf16.msra.mxu2 %v2090_v15  ;;  %v2133_v45 = vld [vmem:[%s4766_s1 + $0x58] sm:$0xf]  ;;  %v2887_v46 = vld [vmem:[%s4766_s1 + $0x78] sm:$0xf0]  ;;  %v2888_v48 = vld [vmem:[%s4766_s1 + $0x80] sm:$0xf0]  ;;  %v2182_v51 = vor.u32 %v2893_v39, %v2179_v40  ;;  %v82_v59 = vunpack.c.l.b16 %v26_v41 }
  0x19   :  { %405 = vmatpush.bf16.msra.mxu3 %v2094_v17  ;;  %2259 = vmatmul.msk.bf16.vlgmr.msra.gmra.mxu0 %vm306_vm2, %v3249_v18  ;;  %v2883_v49 = vld [vmem:[%s4766_s1 + $0x5c] sm:$0xf]  ;;  %v2135_v50 = vld [vmem:[%s4766_s1 + $0x7c] sm:$0xf0]  ;;  %v2884_v52 = vld [vmem:[%s4766_s1 + $0x64] sm:$0xf]  ;;  %v2134_v55 = vor.u32 %v2887_v46, %v2133_v45  ;;  %v2142_v1 = vor.u32 %v2888_v48, %v2141_v44 }
  0x1a   :  { %419 = vmatpush.bf16.msrb.mxu0 %v330_v14  ;;  %2261 = vmatmul.msk.bf16.vlgmr.msra.gmra.mxu1 %vm306_vm2, %v3249_v18  ;;  %v2143_v53 = vld [vmem:[%s4766_s1 + $0x84] sm:$0xf0]  ;;  %v2097_v54 = vld [vmem:[%s4766_s1 + $0x10] sm:$0xf]  ;;  %v2878_v56 = vld [vmem:[%s4766_s1 + $0x30] sm:$0xf0]  ;;  %v2138_v60 = vor.u32 %v2883_v49, %v2135_v50  ;;  %v3384_v14 = vpack.c.b16 %v82_v59, %v82_v59 }
  0x1b   :  { %437 = vmatpush.bf16.msrb.mxu1 %v333_v16  ;;  %2263 = vmatmul.msk.bf16.vlgmr.msra.gmra.mxu2 %vm306_vm2, %v3249_v18  ;;  %v2874_v57 = vld [vmem:[%s4766_s1 + $0x14] sm:$0xf]  ;;  %v2099_v58 = vld [vmem:[%s4766_s1 + $0x34] sm:$0xf0]  ;;  %v2953_v62 = vld [vmem:[%s4768_s2 + $0x124] sm:$0xf]  ;;  %v2146_v6 = vor.u32 %v2884_v52, %v2143_v53  ;;  %v2098_v12 = vor.u32 %v2878_v56, %v2097_v54 }
  0x1c   :  { %455 = vmatpush.bf16.msrb.mxu2 %v336_v21  ;;  %2265 = vmatmul.msk.bf16.vlgmr.msra.gmra.mxu3 %vm306_vm2, %v3249_v18  ;;  %v2105_v61 = vld [vmem:[%s4766_s1 + $0x18] sm:$0xf]  ;;  %v2425_v63 = vld [vmem:[%s4768_s2 + $0x144] sm:$0x30]  ;;  %v2958_v2 = vld [vmem:[%s4768_s2 + $0x148] sm:$0x30]  ;;  %v2102_v15 = vor.u32 %v2874_v57, %v2099_v58 }
  0x1d   :  { %473 = vmatpush.bf16.msrb.mxu3 %v339_v24  ;;  %v2431_v0 = vld [vmem:[%s4768_s2 + $0x128] sm:$0xf]  ;;  %v2257_v3 = vld [vmem:[%s4766_s1 + $0x140] sm:$0xf]  ;;  %v2916_v4 = vld [vmem:[%s4766_s1 + $0x160] sm:$0x30]  ;;  %v2428_v13 = vor.u32 %v2953_v62, %v2425_v63 }
  0x1e   :  { %420 = vmatpush.bf16.msrb.mxu0 %v2206_v29  ;;  %v2879_v7 = vld [vmem:[%s4766_s1 + $0x38] sm:$0xf0]  ;;  %v2423_v8 = vld [vmem:[%s4768_s2 + $0x120] sm:$0xf]  ;;  %v2957_v9 = vld [vmem:[%s4768_s2 + $0x140] sm:$0x30]  ;;  %v2432_v16 = vor.u32 %v2958_v2, %v2431_v0  ;;  %v2258_v17 = vor.u32 %v2916_v4, %v2257_v3 }
  0x1f   :  { %438 = vmatpush.bf16.msrb.mxu1 %v2210_v30  ;;  %v2875_v10 = vld [vmem:[%s4766_s1 + $0x1c] sm:$0xf]  ;;  %v2107_v11 = vld [vmem:[%s4766_s1 + $0x3c] sm:$0xf0]  ;;  %v2106_v19 = vor.u32 %v2879_v7, %v2105_v61  ;;  %v2424_v20 = vor.u32 %v2957_v9, %v2423_v8  ;;  %v781_v22 = vand.u32 %v2428_v13, %v3100_v5  ;;  %v2949_v29 = vld [vmem:[%s4768_s2 + $0x100] sm:$0xf0] }
  0x20   :  { %456 = vmatpush.bf16.msrb.mxu2 %v2214_v33  ;;  %v2110_v21 = vor.u32 %v2875_v10, %v2107_v11  ;;  %v784_v23 = vand.u32 %v2432_v16, %v3100_v5  ;;  %v342_v24 = vand.u32 %v2258_v17, %v3100_v5  ;;  %v2944_v25 = vld [vmem:[%s4768_s2 + $0xdc] sm:$0xf]  ;;  %v2389_v26 = vld [vmem:[%s4768_s2 + $0xfc] sm:$0xf0]  ;;  %v2221_v30 = vld [vmem:[%s4766_s1 + $0xf8] sm:$0xf] }
  0x21   :  { %474 = vmatpush.bf16.msrb.mxu3 %v2218_v36  ;;  %v2395_v27 = vld [vmem:[%s4768_s2 + $0xe0] sm:$0xf]  ;;  %v778_v28 = vand.u32 %v2424_v20, %v3100_v5  ;;  %v2907_v31 = vld [vmem:[%s4766_s1 + $0x118] sm:$0xf0]  ;;  %v2387_v32 = vld [vmem:[%s4768_s2 + $0xd8] sm:$0xf]  ;;  %v2392_v34 = vor.u32 %v2944_v25, %v2389_v26 }
  0x22   :  { %421 = vmatpush.bf16.msrb.mxu0 %v2170_v42  ;;  %v2948_v33 = vld [vmem:[%s4768_s2 + $0xf8] sm:$0xf0]  ;;  %v2396_v35 = vor.u32 %v2949_v29, %v2395_v27  ;;  %v2222_v36 = vor.u32 %v2907_v31, %v2221_v30  ;;  %v2935_v37 = vld [vmem:[%s4768_s2 + $0x94] sm:$0xf]  ;;  %v2353_v38 = vld [vmem:[%s4768_s2 + $0xb4] sm:$0xf0] }
  0x23   :  { %439 = vmatpush.bf16.msrb.mxu1 %v2174_v43  ;;  %v2359_v39 = vld [vmem:[%s4768_s2 + $0x98] sm:$0xf]  ;;  %v2388_v40 = vor.u32 %v2948_v33, %v2387_v32  ;;  %v2940_v41 = vld [vmem:[%s4768_s2 + $0xb8] sm:$0xf0]  ;;  %v2185_v42 = vld [vmem:[%s4766_s1 + $0xb0] sm:$0xf]  ;;  %v2356_v46 = vor.u32 %v2935_v37, %v2353_v38 }
  0x24   :  { %457 = vmatpush.bf16.msrb.mxu2 %v2178_v47  ;;  %v2898_v43 = vld [vmem:[%s4766_s1 + $0xd0] sm:$0xf0]  ;;  %v2351_v44 = vld [vmem:[%s4768_s2 + $0x90] sm:$0xf]  ;;  %v2360_v47 = vor.u32 %v2940_v41, %v2359_v39  ;;  %v2926_v49 = vld [vmem:[%s4768_s2 + $0x4c] sm:$0xf] }
  0x25   :  { %475 = vmatpush.bf16.msrb.mxu3 %v2182_v51  ;;  %v2939_v45 = vld [vmem:[%s4768_s2 + $0xb0] sm:$0xf0]  ;;  %v2186_v48 = vor.u32 %v2898_v43, %v2185_v42  ;;  %v2317_v50 = vld [vmem:[%s4768_s2 + $0x6c] sm:$0xf0]  ;;  %v2149_v54 = vld [vmem:[%s4766_s1 + $0x68] sm:$0xf] }
  0x26   :  { %422 = vmatpush.bf16.msrb.mxu0 %v2134_v55  ;;  %v2352_v51 = vor.u32 %v2939_v45, %v2351_v44  ;;  %v2323_v52 = vld [vmem:[%s4768_s2 + $0x50] sm:$0xf]  ;;  %v2931_v53 = vld [vmem:[%s4768_s2 + $0x70] sm:$0xf0]  ;;  %v2889_v55 = vld [vmem:[%s4766_s1 + $0x88] sm:$0xf0]  ;;  %v2320_v56 = vor.u32 %v2926_v49, %v2317_v50 }
  0x27   :  { %440 = vmatpush.bf16.msrb.mxu1 %v2138_v60  ;;  %v2315_v57 = vld [vmem:[%s4768_s2 + $0x48] sm:$0xf]  ;;  %v2930_v58 = vld [vmem:[%s4768_s2 + $0x68] sm:$0xf0]  ;;  %v2324_v59 = vor.u32 %v2931_v53, %v2323_v52  ;;  %v2917_v60 = vld [vmem:[%s4768_s2 + $0x4] sm:$0xf]  ;;  %v2150_v62 = vor.u32 %v2889_v55, %v2149_v54 }
  0x28   :  { %458 = vmatpush.bf16.msrb.mxu2 %v2142_v1  ;;  %v2281_v61 = vld [vmem:[%s4768_s2 + $0x24] sm:$0xf0]  ;;  %v2922_v0 = vld [vmem:[%s4768_s2 + $0x28] sm:$0xf0]  ;;  %v2316_v1 = vor.u32 %v2930_v58, %v2315_v57  ;;  %v2113_v2 = vld [vmem:[%s4766_s1 + $0x20] sm:$0xf] }
  0x29   :  { %476 = vmatpush.bf16.msrb.mxu3 %v2146_v6  ;;  %2260 = vmatmul.msk.bf16.gmra.mxu0 %vm306_vm2, %v3384_v14  ;;  %v2287_v63 = vld [vmem:[%s4768_s2 + $0x8] sm:$0xf]  ;;  %v2880_v3 = vld [vmem:[%s4766_s1 + $0x40] sm:$0xf0]  ;;  %v2284_v4 = vor.u32 %v2917_v60, %v2281_v61  ;;  %v2279_v6 = vld [vmem:[%s4768_s2] sm:$0xf] }
  0x2a   :  { %423 = vmatpush.bf16.msrb.mxu0 %v2098_v12  ;;  %2262 = vmatmul.msk.bf16.gmra.mxu1 %vm306_vm2, %v3384_v14  ;;  %v2921_v7 = vld [vmem:[%s4768_s2 + $0x20] sm:$0xf0]  ;;  %v2288_v8 = vor.u32 %v2922_v0, %v2287_v63  ;;  %v2114_v9 = vor.u32 %v2880_v3, %v2113_v2  ;;  %v2955_v11 = vld [vmem:[%s4768_s2 + $0x134] sm:$0xf]  ;;  %v2441_v12 = vld [vmem:[%s4768_s2 + $0x154] sm:$0x30] }
  0x2b   :  { %441 = vmatpush.bf16.msrb.mxu1 %v2102_v15  ;;  %2264 = vmatmul.msk.bf16.gmra.mxu2 %vm306_vm2, %v3384_v14  ;;  %v2280_v10 = vor.u32 %v2921_v7, %v2279_v6  ;;  %v2447_v13 = vld [vmem:[%s4768_s2 + $0x138] sm:$0xf]  ;;  %v2444_v15 = vor.u32 %v2955_v11, %v2441_v12  ;;  %v2960_v16 = vld [vmem:[%s4768_s2 + $0x158] sm:$0x30]  ;;  %v2954_v17 = vld [vmem:[%s4768_s2 + $0x12c] sm:$0xf] }
  0x2c   :  { %459 = vmatpush.bf16.msrb.mxu2 %v2106_v19  ;;  %2266 = vmatmul.msk.bf16.gmra.mxu3 %vm306_vm2, %v3384_v14  ;;  %v2433_v19 = vld [vmem:[%s4768_s2 + $0x14c] sm:$0x30]  ;;  %v2448_v20 = vor.u32 %v2960_v16, %v2447_v13  ;;  %v2951_v29 = vld [vmem:[%s4768_s2 + $0x110] sm:$0xf0]  ;;  %v2945_v32 = vld [vmem:[%s4768_s2 + $0xe4] sm:$0xf] }
  0x2d   :  { %477 = vmatpush.bf16.msrb.mxu3 %v2110_v21  ;;  %v2436_v21 = vor.u32 %v2954_v17, %v2433_v19  ;;  %v793_v25 = vand.u32 %v2444_v15, %v3100_v5  ;;  %v2405_v27 = vld [vmem:[%s4768_s2 + $0x10c] sm:$0xf0]  ;;  %v2397_v33 = vld [vmem:[%s4768_s2 + $0x104] sm:$0xf0]  ;;  %v2950_v37 = vld [vmem:[%s4768_s2 + $0x108] sm:$0xf0] }
  0x2e   :  { %491 = vmatpush.bf16.msra.mxu0 %v342_v24  ;;  %v2946_v24 = vld [vmem:[%s4768_s2 + $0xec] sm:$0xf]  ;;  %v796_v30 = vand.u32 %v2448_v20, %v3100_v5  ;;  %v2400_v39 = vor.u32 %v2945_v32, %v2397_v33  ;;  %v2369_v41 = vld [vmem:[%s4768_s2 + $0xc4] sm:$0xf0]  ;;  %v2367_v49 = vld [vmem:[%s4768_s2 + $0xa0] sm:$0xf] }
  0x2f   :  { %807 = vmatpush.bf16.msra.mxu1 %v778_v28  ;;  %v2411_v28 = vld [vmem:[%s4768_s2 + $0xf0] sm:$0xf]  ;;  %v787_v31 = vand.u32 %v2436_v21, %v3100_v5  ;;  %v2375_v43 = vld [vmem:[%s4768_s2 + $0xa8] sm:$0xf]  ;;  %v2942_v44 = vld [vmem:[%s4768_s2 + $0xc8] sm:$0xf0] }
  0x30   :  { %825 = vmatpush.bf16.msra.mxu2 %v781_v22  ;;  %v2439_v22 = vld [vmem:[%s4768_s2 + $0x130] sm:$0xf]  ;;  %v2412_v38 = vor.u32 %v2951_v29, %v2411_v28  ;;  %v2928_v52 = vld [vmem:[%s4768_s2 + $0x5c] sm:$0xf]  ;;  %v2333_v53 = vld [vmem:[%s4768_s2 + $0x7c] sm:$0xf0] }
  0x31   :  { %843 = vmatpush.bf16.msra.mxu3 %v784_v23  ;;  %v2959_v23 = vld [vmem:[%s4768_s2 + $0x150] sm:$0x30]  ;;  %v2336_v55 = vor.u32 %v2928_v52, %v2333_v53  ;;  %v2933_v57 = vld [vmem:[%s4768_s2 + $0x80] sm:$0xf0]  ;;  %v2325_v60 = vld [vmem:[%s4768_s2 + $0x74] sm:$0xf0] }
  0x32   :  { %492 = vmatpush.bf16.msra.mxu0 %v2222_v36  ;;  %v2440_v26 = vor.u32 %v2959_v23, %v2439_v22  ;;  %v2408_v36 = vor.u32 %v2946_v24, %v2405_v27  ;;  %v2927_v58 = vld [vmem:[%s4768_s2 + $0x54] sm:$0xf]  ;;  %v2331_v61 = vld [vmem:[%s4768_s2 + $0x58] sm:$0xf]  ;;  %v2924_v6 = vld [vmem:[%s4768_s2 + $0x38] sm:$0xf0] }
  0x33   :  { %808 = vmatpush.bf16.msra.mxu1 %v2388_v40  ;;  %v2937_v40 = vld [vmem:[%s4768_s2 + $0xa4] sm:$0xf]  ;;  %v2328_v63 = vor.u32 %v2927_v58, %v2325_v60  ;;  %v2297_v2 = vld [vmem:[%s4768_s2 + $0x34] sm:$0xf0]  ;;  %v2918_v7 = vld [vmem:[%s4768_s2 + $0xc] sm:$0xf] }
  0x34   :  { %826 = vmatpush.bf16.msra.mxu2 %v2392_v34  ;;  %v2403_v34 = vld [vmem:[%s4768_s2 + $0xe8] sm:$0xf]  ;;  %v2372_v45 = vor.u32 %v2937_v40, %v2369_v41  ;;  %v2303_v3 = vld [vmem:[%s4768_s2 + $0x18] sm:$0xf]  ;;  %v2923_v11 = vld [vmem:[%s4768_s2 + $0x30] sm:$0xf0] }
  0x35   :  { %844 = vmatpush.bf16.msra.mxu3 %v2396_v35  ;;  %v790_v35 = vand.u32 %v2440_v26, %v3100_v5  ;;  %v2404_v42 = vor.u32 %v2950_v37, %v2403_v34  ;;  %v2621_v15 = vld [vmem:[%s4769_s3 + $0x120] sm:$0xf]  ;;  %v3002_v16 = vld [vmem:[%s4769_s3 + $0x140] sm:$0x30]  ;;  %v2623_v20 = vld [vmem:[%s4769_s3 + $0x144] sm:$0x30] }
  0x36   :  { %493 = vmatpush.bf16.msra.mxu0 %v2186_v48  ;;  %v2361_v48 = vld [vmem:[%s4768_s2 + $0xbc] sm:$0xf0]  ;;  %v2998_v17 = vld [vmem:[%s4769_s3 + $0x124] sm:$0xf]  ;;  %v2622_v19 = vor.u32 %v3002_v16, %v2621_v15  ;;  %v2956_v21 = vld [vmem:[%s4768_s2 + $0x13c] sm:$0xf] }
  0x37   :  { %809 = vmatpush.bf16.msra.mxu1 %v2352_v51  ;;  %v2941_v51 = vld [vmem:[%s4768_s2 + $0xc0] sm:$0xf0]  ;;  %v2449_v22 = vld [vmem:[%s4768_s2 + $0x15c] sm:$0x30]  ;;  %v2626_v23 = vor.u32 %v2998_v17, %v2623_v20  ;;  %v2585_v27 = vld [vmem:[%s4769_s3 + $0xd8] sm:$0xf] }
  0x38   :  { %827 = vmatpush.bf16.msra.mxu2 %v2356_v46  ;;  %v2376_v46 = vor.u32 %v2942_v44, %v2375_v43  ;;  %v2368_v54 = vor.u32 %v2941_v51, %v2367_v49  ;;  %v2452_v24 = vor.u32 %v2956_v21, %v2449_v22  ;;  %v2961_v26 = vld [vmem:[%s4768_s2 + $0x160] sm:$0x30]  ;;  %v1265_v28 = vand.u32 %v2622_v19, %v3100_v5  ;;  %v2587_v32 = vld [vmem:[%s4769_s3 + $0xfc] sm:$0xf0]  ;;  %v2419_v37 = vld [vmem:[%s4768_s2 + $0xf8] sm:$0xf] }
  0x39   :  { %845 = vmatpush.bf16.msra.mxu3 %v2360_v47  ;;  %2267 = vmatmul.msk.bf16.vlgmr.msrb.gmra.mxu0 %vm306_vm2, %v3249_v18  ;;  %v2936_v47 = vld [vmem:[%s4768_s2 + $0x9c] sm:$0xf]  ;;  %v1268_v33 = vand.u32 %v2626_v23, %v3100_v5  ;;  %v2549_v43 = vld [vmem:[%s4769_s3 + $0x90] sm:$0xf]  ;;  %v2984_v44 = vld [vmem:[%s4769_s3 + $0xb0] sm:$0xf0] }
  0x3a   :  { %2269 = vmatmul.msk.bf16.vlgmr.msrb.gmra.mxu1 %vm306_vm2, %v3249_v18  ;;  %494 = vmatpush.bf16.msra.mxu0 %v2150_v62  ;;  %v2364_v50 = vor.u32 %v2936_v47, %v2361_v48  ;;  %v2932_v62 = vld [vmem:[%s4768_s2 + $0x78] sm:$0xf0]  ;;  %v799_v34 = vand.u32 %v2452_v24, %v3100_v5  ;;  %v2551_v47 = vld [vmem:[%s4769_s3 + $0xb4] sm:$0xf0]  ;;  %v2550_v48 = vor.u32 %v2984_v44, %v2549_v43  ;;  %v2377_v51 = vld [vmem:[%s4768_s2 + $0xcc] sm:$0xf0] }
  0x3b   :  { %2271 = vmatmul.msk.bf16.vlgmr.msrb.gmra.mxu2 %vm306_vm2, %v3249_v18  ;;  %810 = vmatpush.bf16.msra.mxu1 %v2316_v1  ;;  %v2332_v0 = vor.u32 %v2932_v62, %v2331_v61  ;;  %v2919_v1 = vld [vmem:[%s4768_s2 + $0x14] sm:$0xf]  ;;  %v2952_v40 = vld [vmem:[%s4768_s2 + $0x118] sm:$0xf0]  ;;  %v2383_v52 = vld [vmem:[%s4768_s2 + $0xb0] sm:$0xf] }
  0x3c   :  { %828 = vmatpush.bf16.msra.mxu2 %v2320_v56  ;;  %2273 = vmatmul.msk.bf16.vlgmr.msrb.gmra.mxu3 %vm306_vm2, %v3249_v18  ;;  %v2339_v56 = vld [vmem:[%s4768_s2 + $0x60] sm:$0xf]  ;;  %v2515_v60 = vld [vmem:[%s4769_s3 + $0x6c] sm:$0xf0]  ;;  %v2929_v61 = vld [vmem:[%s4768_s2 + $0x64] sm:$0xf] }
  0x3d   :  { %846 = vmatpush.bf16.msra.mxu3 %v2324_v59  ;;  %v2340_v59 = vor.u32 %v2933_v57, %v2339_v56  ;;  %v2975_v56 = vld [vmem:[%s4769_s3 + $0x68] sm:$0xf0]  ;;  %v2925_v16 = vld [vmem:[%s4768_s2 + $0x40] sm:$0xf0]  ;;  %v2637_v19 = vld [vmem:[%s4769_s3 + $0x130] sm:$0xf] }
  0x3e   :  { %495 = vmatpush.bf16.msra.mxu0 %v2114_v9  ;;  %v2304_v9 = vor.u32 %v2924_v6, %v2303_v3  ;;  %v2966_v6 = vld [vmem:[%s4769_s3 + $0x20] sm:$0xf0]  ;;  %v3004_v20 = vld [vmem:[%s4769_s3 + $0x150] sm:$0x30]  ;;  %v2639_v23 = vld [vmem:[%s4769_s3 + $0x154] sm:$0x30] }
  0x3f   :  { %811 = vmatpush.bf16.msra.mxu1 %v2280_v10  ;;  %v2295_v10 = vld [vmem:[%s4768_s2 + $0x10] sm:$0xf]  ;;  %v3000_v21 = vld [vmem:[%s4769_s3 + $0x134] sm:$0xf]  ;;  %v2638_v22 = vor.u32 %v3004_v20, %v2637_v19  ;;  %v2990_v43 = vld [vmem:[%s4769_s3 + $0xe4] sm:$0xf] }
  0x40   :  { %829 = vmatpush.bf16.msra.mxu2 %v2284_v4  ;;  %v2300_v4 = vor.u32 %v2919_v1, %v2297_v2  ;;  %v2296_v13 = vor.u32 %v2923_v11, %v2295_v10  ;;  %v2934_v1 = vld [vmem:[%s4768_s2 + $0x88] sm:$0xf0]  ;;  %v2920_v11 = vld [vmem:[%s4768_s2 + $0x1c] sm:$0xf]  ;;  %v2642_v24 = vor.u32 %v3000_v21, %v2639_v23 }
  0x41   :  { %847 = vmatpush.bf16.msra.mxu3 %v2288_v8  ;;  %v2289_v8 = vld [vmem:[%s4768_s2 + $0x2c] sm:$0xf0]  ;;  %v2963_v19 = vld [vmem:[%s4769_s3 + $0xc] sm:$0xf] }
  0x42   :  { %861 = vmatpush.bf16.msrb.mxu0 %v787_v31  ;;  %v2292_v12 = vor.u32 %v2918_v7, %v2289_v8  ;;  %v2989_v31 = vld [vmem:[%s4769_s3 + $0xdc] sm:$0xf]  ;;  %v2962_v7 = vld [vmem:[%s4769_s3 + $0x4] sm:$0xf] }
  0x43   :  { %879 = vmatpush.bf16.msrb.mxu1 %v790_v35  ;;  %v2947_v35 = vld [vmem:[%s4768_s2 + $0xf4] sm:$0xf]  ;;  %v2590_v41 = vor.u32 %v2989_v31, %v2587_v32  ;;  %v2631_v31 = vld [vmem:[%s4769_s3 + $0x14c] sm:$0x30]  ;;  %v2601_v32 = vld [vmem:[%s4769_s3 + $0xe8] sm:$0xf] }
  0x44   :  { %897 = vmatpush.bf16.msrb.mxu2 %v793_v25  ;;  %v2455_v25 = vld [vmem:[%s4768_s2 + $0x140] sm:$0xf] }
  0x45   :  { %915 = vmatpush.bf16.msrb.mxu3 %v796_v30  ;;  %v2456_v29 = vor.u32 %v2961_v26, %v2455_v25  ;;  %v2993_v30 = vld [vmem:[%s4769_s3 + $0xf8] sm:$0xf0]  ;;  %v1277_v25 = vand.u32 %v2638_v22, %v3100_v5  ;;  %v2629_v26 = vld [vmem:[%s4769_s3 + $0x128] sm:$0xf]  ;;  %v2487_v22 = vld [vmem:[%s4769_s3 + $0x2c] sm:$0xf0] }
  0x46   :  { %862 = vmatpush.bf16.msrb.mxu0 %v2400_v39  ;;  %v2586_v39 = vor.u32 %v2993_v30, %v2585_v27  ;;  %v3003_v27 = vld [vmem:[%s4769_s3 + $0x148] sm:$0x30]  ;;  %v2490_v23 = vor.u32 %v2963_v19, %v2487_v22 }
  0x47   :  { %880 = vmatpush.bf16.msrb.mxu1 %v2404_v42  ;;  %v2630_v30 = vor.u32 %v3003_v27, %v2629_v26  ;;  %v2819_v26 = vld [vmem:[%s4770_s4 + $0x120] sm:$0xf]  ;;  %v3020_v19 = vld [vmem:[%s4770_s4 + $0x68] sm:$0xf0] }
  0x48   :  { %898 = vmatpush.bf16.msrb.mxu2 %v2408_v36  ;;  %v2413_v36 = vld [vmem:[%s4768_s2 + $0x114] sm:$0xf0] }
  0x49   :  { %916 = vmatpush.bf16.msrb.mxu3 %v2412_v38  ;;  %2268 = vmatmul.msk.bf16.gmra.mxu0 %vm306_vm2, %v3384_v14  ;;  %v802_v38 = vand.u32 %v2456_v29, %v3100_v5  ;;  %v2416_v42 = vor.u32 %v2947_v35, %v2413_v36  ;;  %v1280_v29 = vand.u32 %v2642_v24, %v3100_v5  ;;  %v2991_v36 = vld [vmem:[%s4769_s3 + $0xec] sm:$0xf]  ;;  %v2653_v24 = vld [vmem:[%s4769_s3 + $0x140] sm:$0xf] }
  0x4a   :  { %2270 = vmatmul.msk.bf16.gmra.mxu1 %vm306_vm2, %v3384_v14  ;;  %863 = vmatpush.bf16.msrb.mxu0 %v2364_v50  ;;  %v2938_v50 = vld [vmem:[%s4768_s2 + $0xac] sm:$0xf] }
  0x4b   :  { %2272 = vmatmul.msk.bf16.gmra.mxu2 %vm306_vm2, %v3384_v14  ;;  %881 = vmatpush.bf16.msrb.mxu1 %v2368_v54  ;;  %v2380_v53 = vor.u32 %v2938_v50, %v2377_v51  ;;  %v2943_v54 = vld [vmem:[%s4768_s2 + $0xd0] sm:$0xf0]  ;;  %v2982_v50 = vld [vmem:[%s4769_s3 + $0xa4] sm:$0xf]  ;;  %v2567_v51 = vld [vmem:[%s4769_s3 + $0xc4] sm:$0xf0] }
  0x4c   :  { %899 = vmatpush.bf16.msrb.mxu2 %v2372_v45  ;;  %2274 = vmatmul.msk.bf16.gmra.mxu3 %vm306_vm2, %v3384_v14  ;;  %v2420_v45 = vor.u32 %v2952_v40, %v2419_v37  ;;  %v2384_v57 = vor.u32 %v2943_v54, %v2383_v52  ;;  %v2603_v37 = vld [vmem:[%s4769_s3 + $0x10c] sm:$0xf0]  ;;  %v2570_v52 = vor.u32 %v2982_v50, %v2567_v51  ;;  %v2985_v54 = vld [vmem:[%s4769_s3 + $0xb8] sm:$0xf0] }
  0x4d   :  { %917 = vmatpush.bf16.msrb.mxu3 %v2376_v46  ;;  %v2980_v46 = vld [vmem:[%s4769_s3 + $0x94] sm:$0xf] }
  0x4e   :  { %864 = vmatpush.bf16.msrb.mxu0 %v2328_v63  ;;  %v2554_v49 = vor.u32 %v2980_v46, %v2551_v47  ;;  %v2341_v63 = vld [vmem:[%s4768_s2 + $0x84] sm:$0xf0]  ;;  %v2565_v46 = vld [vmem:[%s4769_s3 + $0xa0] sm:$0xf]  ;;  %v2986_v47 = vld [vmem:[%s4769_s3 + $0xc0] sm:$0xf0] }
  0x4f   :  { %882 = vmatpush.bf16.msrb.mxu1 %v2332_v0  ;;  %v2347_v0 = vld [vmem:[%s4768_s2 + $0x68] sm:$0xf]  ;;  %v2344_v2 = vor.u32 %v2929_v61, %v2341_v63  ;;  %v2531_v63 = vld [vmem:[%s4769_s3 + $0x7c] sm:$0xf0] }
  0x50   :  { %900 = vmatpush.bf16.msrb.mxu2 %v2336_v55  ;;  %v2513_v55 = vld [vmem:[%s4769_s3 + $0x48] sm:$0xf]  ;;  %v2348_v3 = vor.u32 %v2934_v1, %v2347_v0  ;;  %v2521_v0 = vld [vmem:[%s4769_s3 + $0x50] sm:$0xf] }
  0x51   :  { %918 = vmatpush.bf16.msrb.mxu3 %v2340_v59  ;;  %v2514_v58 = vor.u32 %v2975_v56, %v2513_v55  ;;  %v2971_v59 = vld [vmem:[%s4769_s3 + $0x4c] sm:$0xf]  ;;  %v2981_v55 = vld [vmem:[%s4769_s3 + $0x9c] sm:$0xf] }
  0x52   :  { %865 = vmatpush.bf16.msrb.mxu0 %v2292_v12  ;;  %v2518_v62 = vor.u32 %v2971_v59, %v2515_v60  ;;  %v2305_v12 = vld [vmem:[%s4768_s2 + $0x3c] sm:$0xf0]  ;;  %v2977_v59 = vld [vmem:[%s4769_s3 + $0x78] sm:$0xf0] }
  0x53   :  { %883 = vmatpush.bf16.msrb.mxu1 %v2296_v13  ;;  %v2311_v13 = vld [vmem:[%s4768_s2 + $0x20] sm:$0xf]  ;;  %v2308_v15 = vor.u32 %v2920_v11, %v2305_v12  ;;  %v2495_v12 = vld [vmem:[%s4769_s3 + $0x34] sm:$0xf0] }
  0x54   :  { %901 = vmatpush.bf16.msrb.mxu2 %v2300_v4  ;;  %v2477_v4 = vld [vmem:[%s4769_s3] sm:$0xf]  ;;  %v2312_v17 = vor.u32 %v2925_v16, %v2311_v13  ;;  %v2485_v16 = vld [vmem:[%s4769_s3 + $0x8] sm:$0xf] }
  0x55   :  { %919 = vmatpush.bf16.msrb.mxu3 %v2304_v9  ;;  %v2478_v8 = vor.u32 %v2966_v6, %v2477_v4  ;;  %v2479_v9 = vld [vmem:[%s4769_s3 + $0x24] sm:$0xf0]  ;;  %v2523_v4 = vld [vmem:[%s4769_s3 + $0x74] sm:$0xf0] }
  0x56   :  { %v2482_v10 = vor.u32 %v2962_v7, %v2479_v9  ;;  %v2968_v9 = vld [vmem:[%s4769_s3 + $0x30] sm:$0xf0] }
  0x59   :  { %2275 = vmatmul.msk.bf16.vlgmr.msra.gmra.mxu0 %vm306_vm2, %v3249_v18 }
  0x5a   :  { %2457 = vmatmul.msk.bf16.vlgmr.msra.gmra.mxu1 %vm306_vm2, %v3249_v18  ;;  %933 = vmatpush.bf16.msra.mxu0 %v799_v34 }
  0x5b   :  { %2459 = vmatmul.msk.bf16.vlgmr.msra.gmra.mxu2 %vm306_vm2, %v3249_v18  ;;  %951 = vmatpush.bf16.msra.mxu1 %v802_v38  ;;  %v1271_v38 = vand.u32 %v2630_v30, %v3100_v5 }
  0x5c   :  { %2461 = vmatmul.msk.bf16.vlgmr.msra.gmra.mxu3 %vm306_vm2, %v3249_v18  ;;  %1294 = vmatpush.bf16.msra.mxu2 %v1265_v28  ;;  %v2999_v28 = vld [vmem:[%s4769_s3 + $0x12c] sm:$0xf] }
  0x5d   :  { %1312 = vmatpush.bf16.msra.mxu3 %v1268_v33  ;;  %v2995_v33 = vld [vmem:[%s4769_s3 + $0x108] sm:$0xf0]  ;;  %v2634_v34 = vor.u32 %v2999_v28, %v2631_v31  ;;  %v3047_v28 = vld [vmem:[%s4770_s4 + $0x140] sm:$0x30] }
  0x5e   :  { %934 = vmatpush.bf16.msra.mxu0 %v2416_v42  ;;  %v2602_v35 = vor.u32 %v2995_v33, %v2601_v32  ;;  %v2994_v42 = vld [vmem:[%s4769_s3 + $0x100] sm:$0xf0]  ;;  %v2820_v30 = vor.u32 %v3047_v28, %v2819_v26  ;;  %v2509_v28 = vld [vmem:[%s4769_s3 + $0x20] sm:$0xf] }
  0x5f   :  { %952 = vmatpush.bf16.msra.mxu1 %v2420_v45  ;;  %v1274_v40 = vand.u32 %v2634_v34, %v3100_v5  ;;  %v2595_v45 = vld [vmem:[%s4769_s3 + $0x104] sm:$0xf0]  ;;  %v2645_v34 = vld [vmem:[%s4769_s3 + $0x138] sm:$0xf] }
  0x60   :  { %1295 = vmatpush.bf16.msra.mxu2 %v2586_v39  ;;  %v2606_v39 = vor.u32 %v2991_v36, %v2603_v37  ;;  %v3001_v36 = vld [vmem:[%s4769_s3 + $0x13c] sm:$0xf]  ;;  %v1752_v37 = vand.u32 %v2820_v30, %v3100_v5  ;;  %v2970_v30 = vld [vmem:[%s4769_s3 + $0x40] sm:$0xf0] }
  0x61   :  { %1313 = vmatpush.bf16.msra.mxu3 %v2590_v41  ;;  %v2593_v41 = vld [vmem:[%s4769_s3 + $0xe0] sm:$0xf] }
  0x62   :  { %935 = vmatpush.bf16.msra.mxu0 %v2380_v53  ;;  %v2594_v44 = vor.u32 %v2994_v42, %v2593_v41  ;;  %v2557_v53 = vld [vmem:[%s4769_s3 + $0x98] sm:$0xf]  ;;  %v2997_v41 = vld [vmem:[%s4769_s3 + $0x118] sm:$0xf0] }
  0x63   :  { %953 = vmatpush.bf16.msra.mxu1 %v2384_v57  ;;  %v2558_v56 = vor.u32 %v2985_v54, %v2557_v53  ;;  %v2559_v57 = vld [vmem:[%s4769_s3 + $0xbc] sm:$0xf0]  ;;  %v2609_v53 = vld [vmem:[%s4769_s3 + $0xf0] sm:$0xf]  ;;  %v2996_v54 = vld [vmem:[%s4769_s3 + $0x110] sm:$0xf0] }
  0x64   :  { %1296 = vmatpush.bf16.msra.mxu2 %v2550_v48  ;;  %v2598_v48 = vor.u32 %v2990_v43, %v2595_v45  ;;  %v2562_v60 = vor.u32 %v2981_v55, %v2559_v57  ;;  %v3038_v45 = vld [vmem:[%s4770_s4 + $0xf8] sm:$0xf0]  ;;  %v2992_v55 = vld [vmem:[%s4769_s3 + $0xf4] sm:$0xf]  ;;  %v2611_v57 = vld [vmem:[%s4769_s3 + $0x114] sm:$0xf0] }
  0x65   :  { %1314 = vmatpush.bf16.msra.mxu3 %v2554_v49  ;;  %v2566_v49 = vor.u32 %v2986_v47, %v2565_v46 }
  0x66   :  { %936 = vmatpush.bf16.msra.mxu0 %v2344_v2  ;;  %v2976_v2 = vld [vmem:[%s4769_s3 + $0x70] sm:$0xf0] }
  0x67   :  { %954 = vmatpush.bf16.msra.mxu1 %v2348_v3  ;;  %v2972_v3 = vld [vmem:[%s4769_s3 + $0x54] sm:$0xf]  ;;  %v2522_v6 = vor.u32 %v2976_v2, %v2521_v0 }
  0x68   :  { %1297 = vmatpush.bf16.msra.mxu2 %v2514_v58  ;;  %v2529_v58 = vld [vmem:[%s4769_s3 + $0x58] sm:$0xf]  ;;  %v2526_v7 = vor.u32 %v2972_v3, %v2523_v4  ;;  %v2573_v3 = vld [vmem:[%s4769_s3 + $0xa8] sm:$0xf]  ;;  %v2987_v4 = vld [vmem:[%s4769_s3 + $0xc8] sm:$0xf0] }
  0x69   :  { %2276 = vmatmul.msk.bf16.gmra.mxu0 %vm306_vm2, %v3384_v14  ;;  %1315 = vmatpush.bf16.msra.mxu3 %v2518_v62  ;;  %v2530_v61 = vor.u32 %v2977_v59, %v2529_v58  ;;  %v2973_v62 = vld [vmem:[%s4769_s3 + $0x5c] sm:$0xf]  ;;  %v2581_v58 = vld [vmem:[%s4769_s3 + $0xb0] sm:$0xf]  ;;  %v2988_v59 = vld [vmem:[%s4769_s3 + $0xd0] sm:$0xf0] }
  0x6a   :  { %2458 = vmatmul.msk.bf16.gmra.mxu1 %vm306_vm2, %v3384_v14  ;;  %937 = vmatpush.bf16.msra.mxu0 %v2308_v15  ;;  %v2534_v1 = vor.u32 %v2973_v62, %v2531_v63  ;;  %v2747_v62 = vld [vmem:[%s4770_s4 + $0x90] sm:$0xf]  ;;  %v3029_v63 = vld [vmem:[%s4770_s4 + $0xb0] sm:$0xf0] }
  0x6b   :  { %2460 = vmatmul.msk.bf16.gmra.mxu2 %vm306_vm2, %v3384_v14  ;;  %955 = vmatpush.bf16.msra.mxu1 %v2312_v17  ;;  %v2967_v17 = vld [vmem:[%s4769_s3 + $0x28] sm:$0xf0]  ;;  %v2748_v0 = vor.u32 %v3029_v63, %v2747_v62 }
  0x6c   :  { %2462 = vmatmul.msk.bf16.gmra.mxu3 %vm306_vm2, %v3384_v14  ;;  %1298 = vmatpush.bf16.msra.mxu2 %v2478_v8  ;;  %v2493_v8 = vld [vmem:[%s4769_s3 + $0x10] sm:$0xf]  ;;  %v2486_v21 = vor.u32 %v2967_v17, %v2485_v16  ;;  %v2711_v17 = vld [vmem:[%s4770_s4 + $0x48] sm:$0xf] }
  0x6d   :  { %1316 = vmatpush.bf16.msra.mxu3 %v2482_v10  ;;  %v2964_v10 = vld [vmem:[%s4769_s3 + $0x14] sm:$0xf]  ;;  %v2494_v11 = vor.u32 %v2968_v9, %v2493_v8  ;;  %v2574_v9 = vor.u32 %v2987_v4, %v2573_v3  ;;  %v2712_v22 = vor.u32 %v3020_v19, %v2711_v17  ;;  %v2827_v3 = vld [vmem:[%s4770_s4 + $0x128] sm:$0xf] }
  0x6e   :  { %v2498_v13 = vor.u32 %v2964_v10, %v2495_v12  ;;  %v2575_v10 = vld [vmem:[%s4769_s3 + $0xcc] sm:$0xf0]  ;;  %v2979_v12 = vld [vmem:[%s4769_s3 + $0x88] sm:$0xf0] }
  0x79   :  { %2463 = vmatmul.msk.bf16.vlgmr.msrb.gmra.mxu0 %vm306_vm2, %v3249_v18 }
  0x7a   :  { %2465 = vmatmul.msk.bf16.vlgmr.msrb.gmra.mxu1 %vm306_vm2, %v3249_v18  ;;  %1330 = vmatpush.bf16.msrb.mxu0 %v1271_v38 }
  0x7b   :  { %2467 = vmatmul.msk.bf16.vlgmr.msrb.gmra.mxu2 %vm306_vm2, %v3249_v18  ;;  %1348 = vmatpush.bf16.msrb.mxu1 %v1274_v40  ;;  %v2617_v40 = vld [vmem:[%s4769_s3 + $0xf8] sm:$0xf] }
  0x7c   :  { %2469 = vmatmul.msk.bf16.vlgmr.msrb.gmra.mxu3 %vm306_vm2, %v3249_v18  ;;  %1366 = vmatpush.bf16.msrb.mxu2 %v1277_v25  ;;  %v3006_v25 = vld [vmem:[%s4769_s3 + $0x160] sm:$0x30]  ;;  %v2618_v43 = vor.u32 %v2997_v41, %v2617_v40  ;;  %v2969_v40 = vld [vmem:[%s4769_s3 + $0x38] sm:$0xf0] }
  0x7d   :  { %1384 = vmatpush.bf16.msrb.mxu3 %v1280_v29  ;;  %v2654_v27 = vor.u32 %v3006_v25, %v2653_v24  ;;  %v2974_v24 = vld [vmem:[%s4769_s3 + $0x64] sm:$0xf]  ;;  %v2539_v25 = vld [vmem:[%s4769_s3 + $0x84] sm:$0xf0]  ;;  %v2965_v41 = vld [vmem:[%s4769_s3 + $0x1c] sm:$0xf] }
  0x7e   :  { %1331 = vmatpush.bf16.msrb.mxu0 %v2594_v44  ;;  %v2783_v44 = vld [vmem:[%s4770_s4 + $0xd8] sm:$0xf] }
  0x7f   :  { %1349 = vmatpush.bf16.msrb.mxu1 %v2598_v48  ;;  %v1289_v33 = vand.u32 %v2654_v27, %v3100_v5  ;;  %v2784_v47 = vor.u32 %v3038_v45, %v2783_v44  ;;  %v2542_v27 = vor.u32 %v2974_v24, %v2539_v25  ;;  %v2503_v45 = vld [vmem:[%s4769_s3 + $0x3c] sm:$0xf0]  ;;  %v3034_v25 = vld [vmem:[%s4770_s4 + $0xdc] sm:$0xf] }
  0x80   :  { %1367 = vmatpush.bf16.msrb.mxu2 %v2602_v35  ;;  %v3005_v35 = vld [vmem:[%s4769_s3 + $0x158] sm:$0x30] }
  0x81   :  { %1385 = vmatpush.bf16.msrb.mxu3 %v2606_v39  ;;  %v2646_v38 = vor.u32 %v3005_v35, %v2645_v34  ;;  %v2647_v39 = vld [vmem:[%s4769_s3 + $0x15c] sm:$0x30]  ;;  %v2510_v34 = vor.u32 %v2970_v30, %v2509_v28  ;;  %v3011_v35 = vld [vmem:[%s4770_s4 + $0x20] sm:$0xf0] }
  0x82   :  { %1332 = vmatpush.bf16.msrb.mxu0 %v2558_v56  ;;  %v2650_v42 = vor.u32 %v3001_v36, %v2647_v39  ;;  %v2610_v56 = vor.u32 %v2996_v54, %v2609_v53  ;;  %v2501_v39 = vld [vmem:[%s4769_s3 + $0x18] sm:$0xf]  ;;  %v2829_v53 = vld [vmem:[%s4770_s4 + $0x14c] sm:$0x30]  ;;  %v3039_v30 = vld [vmem:[%s4770_s4 + $0x100] sm:$0xf0] }
  0x83   :  { %1350 = vmatpush.bf16.msrb.mxu1 %v2562_v60  ;;  %v1283_v46 = vand.u32 %v2646_v38, %v3100_v5  ;;  %v2614_v60 = vor.u32 %v2992_v55, %v2611_v57  ;;  %v2502_v44 = vor.u32 %v2969_v40, %v2501_v39  ;;  %v2835_v54 = vld [vmem:[%s4770_s4 + $0x130] sm:$0xf]  ;;  %v3031_v39 = vld [vmem:[%s4770_s4 + $0xc0] sm:$0xf0] }
  0x84   :  { %1368 = vmatpush.bf16.msrb.mxu2 %v2566_v49  ;;  %v1286_v48 = vand.u32 %v2650_v42, %v3100_v5 }
  0x85   :  { %1386 = vmatpush.bf16.msrb.mxu3 %v2570_v52 }
  0x86   :  { %1333 = vmatpush.bf16.msrb.mxu0 %v2522_v6  ;;  %v2983_v6 = vld [vmem:[%s4769_s3 + $0xac] sm:$0xf] }
  0x87   :  { %1351 = vmatpush.bf16.msrb.mxu1 %v2526_v7 }
  0x88   :  { %1369 = vmatpush.bf16.msrb.mxu2 %v2530_v61  ;;  %v2582_v61 = vor.u32 %v2988_v59, %v2581_v58 }
  0x89   :  { %2464 = vmatmul.msk.bf16.gmra.mxu0 %vm306_vm2, %v3384_v14  ;;  %1387 = vmatpush.bf16.msrb.mxu3 %v2534_v1 }
  0x8a   :  { %2466 = vmatmul.msk.bf16.gmra.mxu1 %vm306_vm2, %v3384_v14  ;;  %1334 = vmatpush.bf16.msrb.mxu0 %v2486_v21  ;;  %v2537_v21 = vld [vmem:[%s4769_s3 + $0x60] sm:$0xf] }
  0x8b   :  { %2468 = vmatmul.msk.bf16.gmra.mxu2 %vm306_vm2, %v3384_v14  ;;  %1352 = vmatpush.bf16.msrb.mxu1 %v2490_v23  ;;  %v2978_v23 = vld [vmem:[%s4769_s3 + $0x80] sm:$0xf0] }
  0x8c   :  { %2470 = vmatmul.msk.bf16.gmra.mxu3 %vm306_vm2, %v3384_v14  ;;  %1370 = vmatpush.bf16.msrb.mxu2 %v2494_v11  ;;  %v2545_v11 = vld [vmem:[%s4769_s3 + $0x68] sm:$0xf]  ;;  %v2538_v26 = vor.u32 %v2978_v23, %v2537_v21 }
  0x8d   :  { %1388 = vmatpush.bf16.msrb.mxu3 %v2498_v13  ;;  %v2578_v13 = vor.u32 %v2983_v6, %v2575_v10  ;;  %v2546_v16 = vor.u32 %v2979_v12, %v2545_v11  ;;  %v3048_v6 = vld [vmem:[%s4770_s4 + $0x148] sm:$0x30]  ;;  %v2799_v12 = vld [vmem:[%s4770_s4 + $0xe8] sm:$0xf] }
  0x8e   :  { %v2828_v10 = vor.u32 %v3048_v6, %v2827_v3  ;;  %v3016_v6 = vld [vmem:[%s4770_s4 + $0x4c] sm:$0xf] }
  0x90   :  { %v1758_v19 = vand.u32 %v2828_v10, %v3100_v5 }
  0x96   :  { %v3902_v15 = vpop.f32.mrf.mxu0 }
  0x97   :  { %v3913_v20 = vpop.f32.mrf.mxu1 }
  0x99   :  { %2471 = vmatmul.msk.bf16.vlgmr.msra.gmra.mxu0 %vm306_vm2, %v3249_v18 }
  0x9a   :  { %2473 = vmatmul.msk.bf16.vlgmr.msra.gmra.mxu1 %vm306_vm2, %v3249_v18  ;;  %1402 = vmatpush.bf16.msra.mxu0 %v1283_v46  ;;  %v2506_v46 = vor.u32 %v2965_v41, %v2503_v45  ;;  %v1967_v41 = vld [vmem:[%s4771_s5] sm:$0xff]  ;;  %v3058_v45 = vmov 0  }
  0x9b   :  { %2655 = vmatmul.msk.bf16.vlgmr.msra.gmra.mxu2 %vm306_vm2, %v3249_v18  ;;  %1420 = vmatpush.bf16.msra.mxu1 %v1286_v48  ;;  %v3044_v48 = vld [vmem:[%s4770_s4 + $0x12c] sm:$0xf] }
  0x9c   :  { %2657 = vmatmul.msk.bf16.vlgmr.msra.gmra.mxu3 %vm306_vm2, %v3249_v18  ;;  %1438 = vmatpush.bf16.msra.mxu2 %v1289_v33  ;;  %v2675_v33 = vld [vmem:[%s4770_s4] sm:$0xf]  ;;  %v2832_v55 = vor.u32 %v3044_v48, %v2829_v53  ;;  %v2749_v48 = vld [vmem:[%s4770_s4 + $0xb4] sm:$0xf0] }
  0x9d   :  { %1781 = vmatpush.bf16.msra.mxu3 %v1752_v37  ;;  %v2676_v36 = vor.u32 %v3011_v35, %v2675_v33  ;;  %v3026_v33 = vld [vmem:[%s4770_s4 + $0x9c] sm:$0xf]  ;;  %3054 = vset.pattern.permute.xlu0 %v3058_v45  ;;  %v2755_v53 = vld [vmem:[%s4770_s4 + $0x98] sm:$0xf] }
  0x9e   :  { %v3938_v29 = vpop.f32.mrf.mxu2  ;;  %v3940_v18 = vpop.f32.mrf.mxu0  ;;  %1403 = vmatpush.bf16.msra.mxu0 %v2610_v56  ;;  %v3049_v56 = vld [vmem:[%s4770_s4 + $0x150] sm:$0x30]  ;;  %v1761_v62 = vand.u32 %v2832_v55, %v3100_v5  ;;  %3055 = vset.pattern.permute.xlu1 %v3058_v45 }
  0x9f   :  { %v3942_v31 = vpop.f32.mrf.mxu3  ;;  %v3944_v32 = vpop.f32.mrf.mxu1  ;;  %1421 = vmatpush.bf16.msra.mxu1 %v2614_v60  ;;  %v2836_v59 = vor.u32 %v3049_v56, %v2835_v54  ;;  %1972 = vperm.xlu0 %3054, %v1967_v41   ;;  %v3012_v41 = vld [vmem:[%s4770_s4 + $0x28] sm:$0xf0] }
  0xa0   :  { %1439 = vmatpush.bf16.msra.mxu2 %v2618_v43 }
  0xa1   :  { %1782 = vmatpush.bf16.msra.mxu3 %v2784_v47  ;;  %v4085_v47 = vld [vmem:[%s4767_s0] sm:$0xff]  ;;  %v1764_v63 = vand.u32 %v2836_v59, %v3100_v5  ;;  %v3030_v59 = vld [vmem:[%s4770_s4 + $0xb8] sm:$0xf0] }
  0xa2   :  { %1404 = vmatpush.bf16.msra.mxu0 %v2574_v9  ;;  %v2793_v9 = vld [vmem:[%s4770_s4 + $0x104] sm:$0xf0] }
  0xa3   :  { %1422 = vmatpush.bf16.msra.mxu1 %v2578_v13  ;;  %v3040_v13 = vld [vmem:[%s4770_s4 + $0x108] sm:$0xf0] }
  0xa4   :  { %1440 = vmatpush.bf16.msra.mxu2 %v2582_v61  ;;  %v2800_v17 = vor.u32 %v3040_v13, %v2799_v12  ;;  %v3021_v12 = vld [vmem:[%s4770_s4 + $0x70] sm:$0xf0]  ;;  %v3008_v13 = vld [vmem:[%s4770_s4 + $0xc] sm:$0xf] }
  0xa5   :  { %1783 = vmatpush.bf16.msra.mxu3 %v2748_v0  ;;  %v3043_v0 = vld [vmem:[%s4770_s4 + $0x124] sm:$0xf] }
  0xa6   :  { %v3974_v49 = vpop.f32.mrf.mxu2  ;;  %v3976_v50 = vpop.f32.mrf.mxu0  ;;  %1405 = vmatpush.bf16.msra.mxu0 %v2538_v26  ;;  %v2785_v26 = vld [vmem:[%s4770_s4 + $0xfc] sm:$0xf0] }
  0xa7   :  { %v3978_v51 = vpop.f32.mrf.mxu3  ;;  %v3980_v52 = vpop.f32.mrf.mxu1  ;;  %1423 = vmatpush.bf16.msra.mxu1 %v2542_v27  ;;  %v2791_v27 = vld [vmem:[%s4770_s4 + $0xe0] sm:$0xf]  ;;  %v2788_v28 = vor.u32 %v3034_v25, %v2785_v26  ;;  %v3013_v25 = vld [vmem:[%s4770_s4 + $0x30] sm:$0xf0] }
  0xa8   :  { %1441 = vmatpush.bf16.msra.mxu2 %v2546_v16  ;;  %v2792_v35 = vor.u32 %v3039_v30, %v2791_v27 }
  0xa9   :  { %2472 = vmatmul.msk.bf16.gmra.mxu0 %vm306_vm2, %v3384_v14  ;;  %1784 = vmatpush.bf16.msra.mxu3 %v2712_v22 }
  0xaa   :  { %2474 = vmatmul.msk.bf16.gmra.mxu1 %vm306_vm2, %v3384_v14  ;;  %1406 = vmatpush.bf16.msra.mxu0 %v2502_v44 }
  0xab   :  { %2656 = vmatmul.msk.bf16.gmra.mxu2 %vm306_vm2, %v3384_v14  ;;  %1424 = vmatpush.bf16.msra.mxu1 %v2506_v46  ;;  %v3025_v46 = vld [vmem:[%s4770_s4 + $0x94] sm:$0xf] }
  0xac   :  { %2658 = vmatmul.msk.bf16.gmra.mxu3 %vm306_vm2, %v3384_v14  ;;  %1442 = vmatpush.bf16.msra.mxu2 %v2510_v34  ;;  %v2757_v34 = vld [vmem:[%s4770_s4 + $0xbc] sm:$0xf0]  ;;  %v2752_v56 = vor.u32 %v3025_v46, %v2749_v48  ;;  %v3046_v46 = vld [vmem:[%s4770_s4 + $0x13c] sm:$0xf] }
  0xad   :  { %1785 = vmatpush.bf16.msra.mxu3 %v2676_v36  ;;  %v2760_v36 = vor.u32 %v3026_v33, %v2757_v34  ;;  %v3007_v34 = vld [vmem:[%s4770_s4 + $0x4] sm:$0xf]  ;;  %v2845_v48 = vld [vmem:[%s4770_s4 + $0x15c] sm:$0x30] }
  0xae   :  { %v4014_v1 = vpop.f32.mrf.mxu2  ;;  %v360_v2 = vpop.f32.mrf.mxu0 }
  0xaf   :  { %v4025_v7 = vpop.f32.mrf.mxu3  ;;  %v378_v8 = vpop.f32.mrf.mxu1  ;;  %v2821_v2 = vld [vmem:[%s4770_s4 + $0x144] sm:$0x30] }
  0xb0   :  { %v2824_v4 = vor.u32 %v3043_v0, %v2821_v2  ;;  %v3035_v8 = vld [vmem:[%s4770_s4 + $0xe4] sm:$0xf]  ;;  %v2721_v0 = vld [vmem:[%s4770_s4 + $0x74] sm:$0xf0] }
  0xb1   :  { %v2796_v11 = vor.u32 %v3035_v8, %v2793_v9  ;;  %v2727_v2 = vld [vmem:[%s4770_s4 + $0x58] sm:$0xf]  ;;  %v2713_v8 = vld [vmem:[%s4770_s4 + $0x6c] sm:$0xf0] }
  0xb2   :  { %v1755_v16 = vand.u32 %v2824_v4, %v3100_v5  ;;  %v3022_v4 = vld [vmem:[%s4770_s4 + $0x78] sm:$0xf0]  ;;  %v2716_v10 = vor.u32 %v3016_v6, %v2713_v8 }
  0xb3   :  { %v2728_v9 = vor.u32 %v3022_v4, %v2727_v2 }
  0xb6   :  { %v396_v37 = vpop.f32.mrf.mxu2  ;;  %v4066_v38 = vpop.f32.mrf.mxu0 }
  0xb7   :  { %v414_v42 = vpop.f32.mrf.mxu3  ;;  %v4077_v43 = vpop.f32.mrf.mxu1  ;;  %v2763_v37 = vld [vmem:[%s4770_s4 + $0xa0] sm:$0xf] }
  0xb8   :  { %v2764_v40 = vor.u32 %v3031_v39, %v2763_v37 }
  0xb9   :  { %2659 = vmatmul.msk.bf16.vlgmr.msrb.gmra.mxu0 %vm306_vm2, %v4085_v47 }
  0xba   :  { %2661 = vmatmul.msk.bf16.vlgmr.msrb.gmra.mxu1 %vm306_vm2, %v4085_v47  ;;  %1799 = vmatpush.bf16.msrb.mxu0 %v1755_v16 }
  0xbb   :  { %2663 = vmatmul.msk.bf16.vlgmr.msrb.gmra.mxu2 %vm306_vm2, %v4085_v47  ;;  %1817 = vmatpush.bf16.msrb.mxu1 %v1758_v19  ;;  %v2691_v19 = vld [vmem:[%s4770_s4 + $0x10] sm:$0xf] }
  0xbc   :  { %2665 = vmatmul.msk.bf16.vlgmr.msrb.gmra.mxu3 %vm306_vm2, %v4085_v47  ;;  %1835 = vmatpush.bf16.msrb.mxu2 %v1761_v62  ;;  %v2756_v62 = vor.u32 %v3030_v59, %v2755_v53  ;;  %v2692_v27 = vor.u32 %v3013_v25, %v2691_v19  ;;  %v2851_v53 = vld [vmem:[%s4770_s4 + $0x140] sm:$0xf]  ;;  %v1969_v59 = vld [vmem:[%s4771_s5 + $0x10] sm:$0xf]  ;;  %v3037_v19 = vld [vmem:[%s4770_s4 + $0xf4] sm:$0xf] }
  0xbd   :  { %1853 = vmatpush.bf16.msrb.mxu3 %v1764_v63  ;;  %v3017_v63 = vld [vmem:[%s4770_s4 + $0x54] sm:$0xf]  ;;  %1982 = vperm.xlu1 %3055, %v1969_v59   ;;  %v2809_v25 = vld [vmem:[%s4770_s4 + $0x114] sm:$0xf0] }
  0xbe   :  { %v4107_v57 = vpop.f32.mrf.mxu2  ;;  %v4109_v58 = vpop.f32.mrf.mxu0  ;;  %1800 = vmatpush.bf16.msrb.mxu0 %v2788_v28  ;;  %v2724_v3 = vor.u32 %v3017_v63, %v2721_v0  ;;  %v1968_v28 = vld [vmem:[%s4771_s5 + $0x8] sm:$0xff] }
  0xbf   :  { %v4111_v60 = vpop.f32.mrf.mxu3  ;;  %v4113_v61 = vpop.f32.mrf.mxu1  ;;  %1818 = vmatpush.bf16.msrb.mxu1 %v2792_v35  ;;  %v2677_v35 = vld [vmem:[%s4770_s4 + $0x24] sm:$0xf0]  ;;  %1977 = vperm.xlu0 %3054, %v1968_v28   ;;  %v2815_v28 = vld [vmem:[%s4770_s4 + $0xf8] sm:$0xf] }
  0xc0   :  { %1836 = vmatpush.bf16.msrb.mxu2 %v2796_v11  ;;  %v2719_v11 = vld [vmem:[%s4770_s4 + $0x50] sm:$0xf] }
  0xc1   :  { %1854 = vmatpush.bf16.msrb.mxu3 %v2800_v17  ;;  %v2720_v16 = vor.u32 %v3021_v12, %v2719_v11  ;;  %v2685_v17 = vld [vmem:[%s4770_s4 + $0x2c] sm:$0xf0]  ;;  %v3045_v11 = vld [vmem:[%s4770_s4 + $0x134] sm:$0xf]  ;;  %v2837_v12 = vld [vmem:[%s4770_s4 + $0x154] sm:$0x30] }
  0xc2   :  { %1801 = vmatpush.bf16.msrb.mxu0 %v2752_v56  ;;  %v2688_v26 = vor.u32 %v3008_v13, %v2685_v17  ;;  %v3051_v56 = vld [vmem:[%s4770_s4 + $0x160] sm:$0x30]  ;;  %v2843_v13 = vld [vmem:[%s4770_s4 + $0x138] sm:$0xf]  ;;  %v3050_v17 = vld [vmem:[%s4770_s4 + $0x158] sm:$0x30] }
  0xc3   :  { %1819 = vmatpush.bf16.msrb.mxu1 %v2756_v62  ;;  %v2852_v0 = vor.u32 %v3051_v56, %v2851_v53  ;;  %v3036_v53 = vld [vmem:[%s4770_s4 + $0xec] sm:$0xf]  ;;  %v2807_v56 = vld [vmem:[%s4770_s4 + $0xf0] sm:$0xf] }
  0xc4   :  { %1837 = vmatpush.bf16.msrb.mxu2 %v2760_v36  ;;  %v2683_v36 = vld [vmem:[%s4770_s4 + $0x8] sm:$0xf] }
  0xc5   :  { %1855 = vmatpush.bf16.msrb.mxu3 %v2764_v40  ;;  %v2680_v40 = vor.u32 %v3007_v34, %v2677_v35  ;;  %v2684_v45 = vor.u32 %v3012_v41, %v2683_v36 }
  0xc6   :  { %v4143_v21 = vpop.f32.mrf.mxu2  ;;  %v4145_v22 = vpop.f32.mrf.mxu0  ;;  %1802 = vmatpush.bf16.msrb.mxu0 %v2716_v10  ;;  %v1776_v10 = vand.u32 %v2852_v0, %v3100_v5  ;;  %v3041_v0 = vld [vmem:[%s4770_s4 + $0x110] sm:$0xf0] }
  0xc7   :  { %v4147_v23 = vpop.f32.mrf.mxu3  ;;  %v4149_v24 = vpop.f32.mrf.mxu1  ;;  %1820 = vmatpush.bf16.msrb.mxu1 %v2720_v16  ;;  %v2840_v16 = vor.u32 %v3045_v11, %v2837_v12  ;;  %v2808_v11 = vor.u32 %v3041_v0, %v2807_v56  ;;  %v2737_v0 = vld [vmem:[%s4770_s4 + $0x84] sm:$0xf0] }
  0xc8   :  { %1838 = vmatpush.bf16.msrb.mxu2 %v2724_v3 }
  0xc9   :  { %2660 = vmatmul.msk.bf16.gmra.mxu0 %vm306_vm2, %v3384_v14  ;;  %1856 = vmatpush.bf16.msrb.mxu3 %v2728_v9  ;;  %v1767_v34 = vand.u32 %v2840_v16, %v3100_v5  ;;  %v3033_v16 = vld [vmem:[%s4770_s4 + $0xd0] sm:$0xf0] }
  0xca   :  { %2662 = vmatmul.msk.bf16.gmra.mxu1 %vm306_vm2, %v3384_v14  ;;  %1803 = vmatpush.bf16.msrb.mxu0 %v2680_v40 }
  0xcb   :  { %2664 = vmatmul.msk.bf16.gmra.mxu2 %vm306_vm2, %v3384_v14  ;;  %1821 = vmatpush.bf16.msrb.mxu1 %v2684_v45 }
  0xcc   :  { %2666 = vmatmul.msk.bf16.gmra.mxu3 %vm306_vm2, %v3384_v14  ;;  %1839 = vmatpush.bf16.msrb.mxu2 %v2688_v26  ;;  %v2844_v26 = vor.u32 %v3050_v17, %v2843_v13  ;;  %v2779_v13 = vld [vmem:[%s4770_s4 + $0xb0] sm:$0xf] }
  0xcd   :  { %1857 = vmatpush.bf16.msrb.mxu3 %v2692_v27  ;;  %v2812_v27 = vor.u32 %v3037_v19, %v2809_v25  ;;  %v2780_v17 = vor.u32 %v3033_v16, %v2779_v13  ;;  %v2729_v13 = vld [vmem:[%s4770_s4 + $0x7c] sm:$0xf0] }
  0xce   :  { %v4186_v42 = vpop.f32.mrf.mxu2  ;;  %v432_v44 = vpop.f32.mrf.mxu0  ;;  %v1770_v36 = vand.u32 %v2844_v26, %v3100_v5  ;;  %v3027_v26 = vld [vmem:[%s4770_s4 + $0xa4] sm:$0xf] }
  0xcf   :  { %v4197_v54 = vpop.f32.mrf.mxu3  ;;  %v450_v55 = vpop.f32.mrf.mxu1 }
  0xd0   :  { %v2848_v55 = vor.u32 %v3046_v46, %v2845_v48 }
  0xd2   :  { %v1773_v6 = vand.u32 %v2848_v55, %v3100_v5  ;;  %v2801_v55 = vld [vmem:[%s4770_s4 + $0x10c] sm:$0xf0] }
  0xd3   :  { %v2804_v59 = vor.u32 %v3036_v53, %v2801_v55  ;;  %v3032_v53 = vld [vmem:[%s4770_s4 + $0xc8] sm:$0xf0] }
  0xd6   :  { %v468_v30 = vpop.f32.mrf.mxu2  ;;  %v4241_v33 = vpop.f32.mrf.mxu0 }
  0xd7   :  { %v486_v37 = vpop.f32.mrf.mxu3  ;;  %v4252_v39 = vpop.f32.mrf.mxu1  ;;  %v3042_v30 = vld [vmem:[%s4770_s4 + $0x118] sm:$0xf0] }
  0xd8   :  { %v966_v44 = vmax.f32 %v3902_v15, %v4252_v39  ;;  %v2816_v35 = vor.u32 %v3042_v30, %v2815_v28  ;;  %v2771_v28 = vld [vmem:[%s4770_s4 + $0xa8] sm:$0xf] }
  0xd9   :  { %2667 = vmatmul.msk.bf16.vlgmr.msra.gmra.mxu0 %vm306_vm2, %v4085_v47  ;;  %v2772_v56 = vor.u32 %v3032_v53, %v2771_v28  ;;  %v3015_v53 = vld [vmem:[%s4770_s4 + $0x40] sm:$0xf0] }
  0xda   :  { %2669 = vmatmul.msk.bf16.vlgmr.msra.gmra.mxu1 %vm306_vm2, %v4085_v47  ;;  %1871 = vmatpush.bf16.msra.mxu0 %v1767_v34 }
  0xdb   :  { %2671 = vmatmul.msk.bf16.vlgmr.msra.gmra.mxu2 %vm306_vm2, %v4085_v47  ;;  %1889 = vmatpush.bf16.msra.mxu1 %v1770_v36 }
  0xdc   :  { %2853 = vmatmul.msk.bf16.vlgmr.msra.gmra.mxu3 %vm306_vm2, %v4085_v47  ;;  %1907 = vmatpush.bf16.msra.mxu2 %v1773_v6  ;;  %v3028_v6 = vld [vmem:[%s4770_s4 + $0xac] sm:$0xf] }
  0xdd   :  { %1925 = vmatpush.bf16.msra.mxu3 %v1776_v10  ;;  %v2773_v10 = vld [vmem:[%s4770_s4 + $0xcc] sm:$0xf0] }
  0xde   :  { %v4282_v62 = vpop.f32.mrf.mxu2  ;;  %v4284_v63 = vpop.f32.mrf.mxu0  ;;  %v2776_v12 = vor.u32 %v3028_v6, %v2773_v10  ;;  %1872 = vmatpush.bf16.msra.mxu0 %v2804_v59  ;;  %v3019_v59 = vld [vmem:[%s4770_s4 + $0x64] sm:$0xf]  ;;  %v2743_v6 = vld [vmem:[%s4770_s4 + $0x68] sm:$0xf] }
  0xdf   :  { %v967_v2 = vmax.f32 %v3913_v20, %v4282_v62  ;;  %v4288_v3 = vpop.f32.mrf.mxu3  ;;  %v4290_v4 = vpop.f32.mrf.mxu1  ;;  %1890 = vmatpush.bf16.msra.mxu1 %v2808_v11  ;;  %v2740_v10 = vor.u32 %v3019_v59, %v2737_v0  ;;  %v3024_v11 = vld [vmem:[%s4770_s4 + $0x88] sm:$0xf0] }
  0xe0   :  { %v975_v9 = vmax.f32 %v3940_v18, %v4290_v4  ;;  %1908 = vmatpush.bf16.msra.mxu2 %v2812_v27  ;;  %v2765_v27 = vld [vmem:[%s4770_s4 + $0xc4] sm:$0xf0]  ;;  %v2744_v16 = vor.u32 %v3024_v11, %v2743_v6  ;;  %v2693_v11 = vld [vmem:[%s4770_s4 + $0x34] sm:$0xf0] }
  0xe1   :  { %1926 = vmatpush.bf16.msra.mxu3 %v2816_v35  ;;  %v2768_v36 = vor.u32 %v3027_v26, %v2765_v27  ;;  %v3023_v26 = vld [vmem:[%s4770_s4 + $0x80] sm:$0xf0]  ;;  %v3010_v27 = vld [vmem:[%s4770_s4 + $0x1c] sm:$0xf] }
  0xe3   :  { %1873 = vmatpush.bf16.msra.mxu0 %v2768_v36  ;;  %1891 = vmatpush.bf16.msra.mxu1 %v2772_v56  ;;  %v2707_v36 = vld [vmem:[%s4770_s4 + $0x20] sm:$0xf] }
  0xe4   :  { %1909 = vmatpush.bf16.msra.mxu2 %v2776_v12  ;;  %v3018_v12 = vld [vmem:[%s4770_s4 + $0x5c] sm:$0xf]  ;;  %v2708_v59 = vor.u32 %v3015_v53, %v2707_v36 }
  0xe5   :  { %1927 = vmatpush.bf16.msra.mxu3 %v2780_v17  ;;  %v2732_v17 = vor.u32 %v3018_v12, %v2729_v13  ;;  %v2699_v12 = vld [vmem:[%s4770_s4 + $0x18] sm:$0xf] }
  0xe6   :  { %v4324_v37 = vpop.f32.mrf.mxu2  ;;  %v4326_v40 = vpop.f32.mrf.mxu0 }
  0xe7   :  { %v976_v41 = vmax.f32 %v3944_v32, %v4324_v37  ;;  %v4330_v45 = vpop.f32.mrf.mxu3  ;;  %v4332_v46 = vpop.f32.mrf.mxu1  ;;  %1874 = vmatpush.bf16.msra.mxu0 %v2732_v17 }
  0xe8   :  { %1910 = vmatpush.bf16.msra.mxu2 %v2740_v10  ;;  %v3009_v10 = vld [vmem:[%s4770_s4 + $0x14] sm:$0xf]  ;;  %v4773_v32 = vmax.f32 %v3976_v50, %v4332_v46 }
  0xe9   :  { %2668 = vmatmul.msk.bf16.gmra.mxu0 %vm306_vm2, %v3384_v14  ;;  %1928 = vmatpush.bf16.msra.mxu3 %v2744_v16  ;;  %v2696_v17 = vor.u32 %v3009_v10, %v2693_v11 }
  0xea   :  { %2670 = vmatmul.msk.bf16.gmra.mxu1 %vm306_vm2, %v3384_v14 }
  0xeb   :  { %2672 = vmatmul.msk.bf16.gmra.mxu2 %vm306_vm2, %v3384_v14  ;;  %1875 = vmatpush.bf16.msra.mxu0 %v2696_v17 }
  0xec   :  { %2854 = vmatmul.msk.bf16.gmra.mxu3 %vm306_vm2, %v3384_v14 }
  0xed   :  { %1929 = vmatpush.bf16.msra.mxu3 %v2708_v59 }
  0xee   :  { %v4370_v19 = vpop.f32.mrf.mxu2  ;;  %v504_v25 = vpop.f32.mrf.mxu0 }
  0xef   :  { %v4383_v34 = vpop.f32.mrf.mxu3  ;;  %v820_v35 = vpop.f32.mrf.mxu1  ;;  %v2735_v25 = vld [vmem:[%s4770_s4 + $0x60] sm:$0xf] }
  0xf0   :  { %v2736_v28 = vor.u32 %v3023_v26, %v2735_v25  ;;  %v2701_v35 = vld [vmem:[%s4770_s4 + $0x3c] sm:$0xf0]  ;;  %v3014_v25 = vld [vmem:[%s4770_s4 + $0x38] sm:$0xf0] }
  0xf1   :  { %v2704_v56 = vor.u32 %v3010_v27, %v2701_v35  ;;  %v2700_v27 = vor.u32 %v3014_v25, %v2699_v12 }
  0xf2   :  { %1892 = vmatpush.bf16.msra.mxu1 %v2736_v28 }
  0xf3   :  { %1911 = vmatpush.bf16.msra.mxu2 %v2704_v56 }
  0xf6   :  { %v838_v0 = vpop.f32.mrf.mxu2  ;;  %v4426_v6 = vpop.f32.mrf.mxu0  ;;  %1893 = vmatpush.bf16.msra.mxu1 %v2700_v27 }
  0xf7   :  { %v856_v13 = vpop.f32.mrf.mxu3  ;;  %v4437_v16 = vpop.f32.mrf.mxu1 }
  0xf9   :  { %2855 = vmatmul.msk.bf16.vlgmr.msrb.gmra.mxu0 %vm306_vm2, %v4085_v47 }
  0xfa   :  { %2857 = vmatmul.msk.bf16.vlgmr.msrb.gmra.mxu1 %vm306_vm2, %v4085_v47 }
  0xfb   :  { %2859 = vmatmul.msk.bf16.vlgmr.msrb.gmra.mxu2 %vm306_vm2, %v4085_v47 }
  0xfc   :  { %2861 = vmatmul.msk.bf16.vlgmr.msrb.gmra.mxu3 %vm306_vm2, %v4085_v47 }
  0xfe   :  { %v4452_v28 = vpop.f32.mrf.mxu2  ;;  %v4454_v35 = vpop.f32.mrf.mxu0 }
  0xff   :  { %v4458_v53 = vpop.f32.mrf.mxu3  ;;  %v4460_v56 = vpop.f32.mrf.mxu1 }
 0x106   :  { %v4466_v10 = vpop.f32.mrf.mxu2  ;;  %v4468_v11 = vpop.f32.mrf.mxu0 }
 0x107   :  { %v4472_v13 = vpop.f32.mrf.mxu3  ;;  %v4474_v17 = vpop.f32.mrf.mxu1 }
 0x109   :  { %2856 = vmatmul.msk.bf16.gmra.mxu0 %vm306_vm2, %v3384_v14 }
 0x10a   :  { %2858 = vmatmul.msk.bf16.gmra.mxu1 %vm306_vm2, %v3384_v14 }
 0x10b   :  { %2860 = vmatmul.msk.bf16.gmra.mxu2 %vm306_vm2, %v3384_v14 }
 0x10c   :  { %2862 = vmatmul.msk.bf16.gmra.mxu3 %vm306_vm2, %v3384_v14 }
 0x10e   :  { %v4488_v59 = vpop.f32.mrf.mxu2  ;;  %v874_v12 = vpop.f32.mrf.mxu0 }
 0x10f   :  { %v4492_v55 = vpop.f32.mrf.mxu3  ;;  %v892_v27 = vpop.f32.mrf.mxu1 }
 0x116   :  { %v910_v36 = vpop.f32.mrf.mxu2  ;;  %v4496_v48 = vpop.f32.mrf.mxu0 }
 0x117   :  { %v928_v26 = vpop.f32.mrf.mxu3  ;;  %v4498_v8 = vpop.f32.mrf.mxu1 }
 0x119   :  { %2863 = vmatmul.msk.bf16.vlgmr.msra.gmra.mxu0 %vm306_vm2, %v4085_v47 }
 0x11a   :  { %2865 = vmatmul.msk.bf16.vlgmr.msra.gmra.mxu1 %vm306_vm2, %v4085_v47 }
 0x11b   :  { %2867 = vmatmul.msk.bf16.vlgmr.msra.gmra.mxu2 %vm306_vm2, %v4085_v47 }
 0x11c   :  { %2869 = vmatmul.msk.bf16.vlgmr.msra.gmra.mxu3 %vm306_vm2, %v4085_v47 }
 0x11e   :  { %v1300_v36 = vpop.f32.mrf.mxu2  ;;  %v4510_v12 = vpop.f32.mrf.mxu0 }
 0x11f   :  { %v4515_v26 = vmax.f32 %v966_v44, %v1300_v36  ;;  %v1318_v27 = vpop.f32.mrf.mxu3  ;;  %v4517_v30 = vpop.f32.mrf.mxu1 }
 0x120   :  { %v4522_v0 = vmax.f32 %v967_v2, %v1318_v27  ;;  %v983_v25 = vmax.f32 %v4284_v63, %v4517_v30  ;;  %v969_v27 = vmax.f32 %v3942_v31, %v4426_v6 }
 0x126   :  { %v1302_v47 = vpop.f32.mrf.mxu2  ;;  %v4526_v5 = vpop.f32.mrf.mxu0 }
 0x127   :  { %v4531_v15 = vmax.f32 %v975_v9, %v1302_v47  ;;  %v1320_v39 = vpop.f32.mrf.mxu3  ;;  %v4533_v44 = vpop.f32.mrf.mxu1 }
 0x128   :  { %v4538_v20 = vmax.f32 %v976_v41, %v1320_v39  ;;  %v4774_v41 = vmax.f32 %v3980_v52, %v4370_v19 }
 0x129   :  { %2864 = vmatmul.msk.bf16.gmra.mxu0 %vm306_vm2, %v3384_v14 }
 0x12a   :  { %2866 = vmatmul.msk.bf16.gmra.mxu1 %vm306_vm2, %v3384_v14 }
 0x12b   :  { %2868 = vmatmul.msk.bf16.gmra.mxu2 %vm306_vm2, %v3384_v14 }
 0x12c   :  { %2870 = vmatmul.msk.bf16.gmra.mxu3 %vm306_vm2, %v3384_v14 }
 0x12e   :  { %v1305_v18 = vpop.f32.mrf.mxu2  ;;  %v946_v2 = vpop.f32.mrf.mxu0 }
 0x12f   :  { %v4553_v4 = vmax.f32 %v4773_v32, %v1305_v18  ;;  %v1323_v9 = vpop.f32.mrf.mxu3  ;;  %v964_v37 = vpop.f32.mrf.mxu1  ;;  %v4775_v2 = vmax.f32 %v3938_v29, %v4288_v3  ;;  %v978_v18 = vmax.f32 %v3978_v51, %v4454_v35  ;;  %v4776_v32 = vmax.f32 %v4066_v38, %v4437_v16 }
 0x130   :  { %v4558_v36 = vmax.f32 %v4774_v41, %v1323_v9  ;;  %v4777_v9 = vmax.f32 %v3974_v49, %v4330_v45  ;;  %v4778_v37 = vmax.f32 %v4077_v43, %v4452_v28  ;;  %v987_v35 = vmax.f32 %v4025_v7, %v4468_v11 }
 0x131   :  { %v4780_v45 = vmax.f32 %v4014_v1, %v4383_v34  ;;  %v4781_v28 = vmax.f32 %v4113_v61, %v4466_v10  ;;  %v4783_v1 = vmax.f32 %v4149_v24, %v4488_v59  ;;  %v973_v61 = vmax.f32 %v4111_v60, %v4496_v48 }
 0x132   :  { %v4785_v60 = vmax.f32 %v4143_v21, %v4472_v13 }
 0x136   :  { %v1307_v47 = vpop.f32.mrf.mxu2  ;;  %v1336_v39 = vpop.f32.mrf.mxu0 }
 0x137   :  { %v1325_v14 = vpop.f32.mrf.mxu3  ;;  %v4565_v62 = vmax.f32 %v4775_v2, %v1336_v39  ;;  %v1354_v50 = vpop.f32.mrf.mxu1 }
 0x138   :  { %v4567_v46 = vmax.f32 %v969_v27, %v1354_v50  ;;  %v4779_v27 = vmax.f32 %v4109_v58, %v4460_v56  ;;  %v4782_v58 = vmax.f32 %v4145_v22, %v4474_v17 }
 0x13e   :  { %v1372_v52 = vpop.f32.mrf.mxu2  ;;  %v1338_v19 = vpop.f32.mrf.mxu0 }
 0x13f   :  { %v4574_v31 = vmax.f32 %v4776_v32, %v1372_v52  ;;  %v1390_v6 = vpop.f32.mrf.mxu3  ;;  %v4579_v29 = vmax.f32 %v4777_v9, %v1338_v19  ;;  %v1356_v3 = vpop.f32.mrf.mxu1  ;;  %v4784_v32 = vmax.f32 %v4107_v57, %v4458_v53  ;;  %v982_v9 = vmax.f32 %v4147_v23, %v4510_v12 }
 0x140   :  { %v4584_v41 = vmax.f32 %v4778_v37, %v1390_v6  ;;  %v4586_v51 = vmax.f32 %v978_v18, %v1356_v3  ;;  %v991_v57 = vmax.f32 %v4197_v54, %v4526_v5  ;;  %v4786_v23 = vmax.f32 %v4186_v42, %v4492_v55 }
 0x146   :  { %v1374_v38 = vpop.f32.mrf.mxu2  ;;  %v1341_v16 = vpop.f32.mrf.mxu0 }
 0x147   :  { %v4593_v47 = vmax.f32 %v4779_v27, %v1374_v38  ;;  %v1392_v49 = vpop.f32.mrf.mxu3  ;;  %v4598_v39 = vmax.f32 %v4780_v45, %v1341_v16  ;;  %v1359_v43 = vpop.f32.mrf.mxu1 }
 0x148   :  { %v4603_v14 = vmax.f32 %v4781_v28, %v1392_v49  ;;  %v4605_v7 = vmax.f32 %v987_v35, %v1359_v43  ;;  %v4650_v28 = vpop.permute.xlu0 %1972 }
 0x14e   :  { %v1377_v11 = vpop.f32.mrf.mxu2  ;;  %v1343_v2 = vpop.f32.mrf.mxu0 }
 0x14f   :  { %v4610_v56 = vmax.f32 %v4782_v58, %v1377_v11  ;;  %v1395_v50 = vpop.f32.mrf.mxu3  ;;  %v1361_v18 = vpop.f32.mrf.mxu1 }
 0x150   :  { %v4615_v34 = vmax.f32 %v4783_v1, %v1395_v50  ;;  %v4657_v1 = vpop.permute.xlu0 %1977 }
 0x156   :  { %v1379_v10 = vpop.f32.mrf.mxu2  ;;  %v1408_v52 = vpop.f32.mrf.mxu0 }
 0x157   :  { %v1397_v19 = vpop.f32.mrf.mxu3  ;;  %v4622_v6 = vmax.f32 %v4784_v32, %v1408_v52  ;;  %v1426_v22 = vpop.f32.mrf.mxu1 }
 0x158   :  { %v4624_v17 = vmax.f32 %v973_v61, %v1426_v22 }
 0x15e   :  { %v4628_v24 = vpop.f32.mrf.mxu2  ;;  %v1410_v59 = vpop.f32.mrf.mxu0 }
 0x15f   :  { %v1787_v3 = vpop.f32.mrf.mxu3  ;;  %v4633_v48 = vmax.f32 %v4785_v60, %v1410_v59  ;;  %v1428_v37 = vpop.f32.mrf.mxu1 }
 0x160   :  { %v4635_v35 = vmax.f32 %v982_v9, %v1428_v37  ;;  %v1940_v54 = vmax.f32 %v4515_v26, %v1787_v3 }
 0x162   :  { %v1985_v42 = vadd.f32 %v4650_v28, %v1940_v54 }
 0x164   :  { %v2012_v61 = vmax.f32 %v1985_v42, 0.0 }
 0x166   :  { %v4639_v53 = vpop.f32.mrf.mxu2  ;;  %v1413_v38 = vpop.f32.mrf.mxu0 }
 0x167   :  { %v1789_v16 = vpop.f32.mrf.mxu3  ;;  %v4644_v12 = vmax.f32 %v4786_v23, %v1413_v38  ;;  %v1431_v27 = vpop.f32.mrf.mxu1 }
 0x168   :  { %v4646_v49 = vmax.f32 %v991_v57, %v1431_v27  ;;  %v1949_v18 = vmax.f32 %v4531_v15, %v1789_v16  ;;  %v4670_v38 = vpop.permute.xlu1 %1982 }
 0x16a   :  { %v1994_v22 = vadd.f32 %v4657_v1, %v1949_v18 }
 0x16c   :  { %v2021_v57 = vmax.f32 %v1994_v22, 0.0 }
 0x16e   :  { %v4648_v21 = vpop.f32.mrf.mxu2  ;;  %v1415_v13 = vpop.f32.mrf.mxu0 }
 0x16f   :  { %v1792_v45 = vpop.f32.mrf.mxu3  ;;  %v1433_v43 = vpop.f32.mrf.mxu1 }
 0x170   :  { %v1958_v37 = vmax.f32 %v4553_v4, %v1792_v45 }
 0x176   :  { %v1451_v5 = vpop.f32.mrf.mxu2  ;;  %v1805_v11 = vpop.f32.mrf.mxu0 }
 0x177   :  { %v1794_v2 = vpop.f32.mrf.mxu3  ;;  %v1941_v58 = vmax.f32 %v4522_v0, %v1805_v11  ;;  %v1823_v55 = vpop.f32.mrf.mxu1 }
 0x178   :  { %v1942_v52 = vmax.f32 %v4565_v62, %v1823_v55 }
 0x179   :  { %v1986_v50 = vadd.f32 %v4650_v28, %v1941_v58 }
 0x17a   :  { %v1987_v0 = vadd.f32 %v4650_v28, %v1942_v52 }
 0x17b   :  { %v2013_v10 = vmax.f32 %v1986_v50, 0.0 }
 0x17c   :  { %v2014_v16 = vmax.f32 %v1987_v0, 0.0 }
 0x17d   :  { %v2039_v19 = vpack.c.bf16 %v2013_v10, %v2012_v61 }
 0x17e   :  { %v1841_v26 = vpop.f32.mrf.mxu2  ;;  %v1807_v32 = vpop.f32.mrf.mxu0 }
 0x17f   :  { %2054 = vst [vmem:[%s4772_s6] sm:$0xff] %v2039_v19  ;;  %v1943_v9 = vmax.f32 %v4567_v46, %v1841_v26  ;;  %v1859_v15 = vpop.f32.mrf.mxu3  ;;  %v1950_v59 = vmax.f32 %v4538_v20, %v1807_v32  ;;  %v1825_v3 = vpop.f32.mrf.mxu1  ;;  %v2003_v20 = vadd.f32 %v4670_v38, %v1958_v37 }
 0x180   :  { %v1951_v13 = vmax.f32 %v4579_v29, %v1825_v3 }
 0x181   :  { %v1988_v60 = vadd.f32 %v4650_v28, %v1943_v9  ;;  %v1995_v62 = vadd.f32 %v4657_v1, %v1950_v59  ;;  %v2030_v55 = vmax.f32 %v2003_v20, 0.0  ;;  %v1944_v9 = vmax.f32 %v4574_v31, %v1859_v15 }
 0x182   :  { %v1996_v4 = vadd.f32 %v4657_v1, %v1951_v13 }
 0x183   :  { %v2015_v23 = vmax.f32 %v1988_v60, 0.0  ;;  %v2022_v27 = vmax.f32 %v1995_v62, 0.0 }
 0x184   :  { %v2023_v50 = vmax.f32 %v1996_v4, 0.0 }
 0x185   :  { %v2040_v43 = vpack.c.bf16 %v2015_v23, %v2014_v16  ;;  %v2044_v46 = vpack.c.bf16 %v2022_v27, %v2021_v57  ;;  %v1989_v57 = vadd.f32 %v4650_v28, %v1944_v9 }
 0x186   :  { %v1843_v54 = vpop.f32.mrf.mxu2  ;;  %v1810_v5 = vpop.f32.mrf.mxu0 }
 0x187   :  { %2055 = vst [vmem:[%s4772_s6 + $0x8] sm:$0xff] %v2040_v43  ;;  %v1952_v45 = vmax.f32 %v4586_v51, %v1843_v54  ;;  %v1861_v11 = vpop.f32.mrf.mxu3  ;;  %v1959_v2 = vmax.f32 %v4558_v36, %v1810_v5  ;;  %v1828_v58 = vpop.f32.mrf.mxu1  ;;  %v2016_v31 = vmax.f32 %v1989_v57, 0.0  ;;  %v4787_v54 = vmax.f32 %v4241_v33, %v4498_v8 }
 0x188   :  { %2060 = vst [vmem:[%s4772_s6 + $0x24] sm:$0xff] %v2044_v46  ;;  %v1960_v10 = vmax.f32 %v4598_v39, %v1828_v58  ;;  %v1953_v13 = vmax.f32 %v4593_v47, %v1861_v11 }
 0x189   :  { %v1997_v29 = vadd.f32 %v4657_v1, %v1952_v45  ;;  %v2004_v42 = vadd.f32 %v4670_v38, %v1959_v2  ;;  %v1461_v5 = vmax.f32 %v4787_v54, %v4628_v24 }
 0x18a   :  { %v2005_v36 = vadd.f32 %v4670_v38, %v1960_v10  ;;  %v1998_v20 = vadd.f32 %v4657_v1, %v1953_v13 }
 0x18b   :  { %v2024_v18 = vmax.f32 %v1997_v29, 0.0  ;;  %v2031_v61 = vmax.f32 %v2004_v42, 0.0 }
 0x18c   :  { %v2032_v59 = vmax.f32 %v2005_v36, 0.0  ;;  %v2025_v24 = vmax.f32 %v1998_v20, 0.0 }
 0x18d   :  { %v2045_v52 = vpack.c.bf16 %v2024_v18, %v2023_v50  ;;  %v2049_v51 = vpack.c.bf16 %v2031_v61, %v2030_v55 }
 0x18e   :  { %v1846_v19 = vpop.f32.mrf.mxu2  ;;  %v1812_v26 = vpop.f32.mrf.mxu0 }
 0x18f   :  { %2061 = vst [vmem:[%s4772_s6 + $0x2c] sm:$0xff] %v2045_v52  ;;  %v1961_v32 = vmax.f32 %v4605_v7, %v1846_v19  ;;  %v1864_v22 = vpop.f32.mrf.mxu3  ;;  %v1830_v0 = vpop.f32.mrf.mxu1  ;;  %v1470_v52 = vmax.f32 %v983_v25, %v4639_v53 }
 0x190   :  { %2065 = vst [vmem:[%s4772_s6 + $0x48] sm:$0x33] %v2049_v51  ;;  %v1962_v29 = vmax.f32 %v4610_v56, %v1864_v22 }
 0x191   :  { %v2006_v39 = vadd.f32 %v4670_v38, %v1961_v32 }
 0x192   :  { %v2007_v51 = vadd.f32 %v4670_v38, %v1962_v29 }
 0x193   :  { %v2033_v3 = vmax.f32 %v2006_v39, 0.0 }
 0x194   :  { %v2034_v53 = vmax.f32 %v2007_v51, 0.0 }
 0x195   :  { %v2050_v60 = vpack.c.bf16 %v2033_v3, %v2032_v59 }
 0x196   :  { %v1848_v62 = vpop.f32.mrf.mxu2  ;;  %v1877_v37 = vpop.f32.mrf.mxu0 }
 0x197   :  { %2066 = vst [vmem:[%s4772_s6 + $0x50] sm:$0x33] %v2050_v60  ;;  %v1866_v7 = vpop.f32.mrf.mxu3  ;;  %v1945_v16 = vmax.f32 %v4584_v41, %v1877_v37  ;;  %v1895_v23 = vpop.f32.mrf.mxu1  ;;  %v4788_v62 = vmax.f32 %v4326_v40, %v4533_v44 }
 0x198   :  { %v1946_v43 = vmax.f32 %v4622_v6, %v1895_v23 }
 0x199   :  { %v1990_v27 = vadd.f32 %v4650_v28, %v1945_v16  ;;  %v1479_v37 = vmax.f32 %v4788_v62, %v4648_v21 }
 0x19a   :  { %v1991_v41 = vadd.f32 %v4650_v28, %v1946_v43 }
 0x19b   :  { %v2017_v15 = vmax.f32 %v1990_v27, 0.0 }
 0x19c   :  { %v2018_v55 = vmax.f32 %v1991_v41, 0.0 }
 0x19d   :  { %v2041_v46 = vpack.c.bf16 %v2017_v15, %v2016_v31 }
 0x19e   :  { %v1913_v4 = vpop.f32.mrf.mxu2  ;;  %v1879_v45 = vpop.f32.mrf.mxu0 }
 0x19f   :  { %2056 = vst [vmem:[%s4772_s6 + $0x10] sm:$0xff] %v2041_v46  ;;  %v1947_v47 = vmax.f32 %v4624_v17, %v1913_v4  ;;  %v1931_v11 = vpop.f32.mrf.mxu3  ;;  %v1954_v6 = vmax.f32 %v4603_v14, %v1879_v45  ;;  %v1897_v2 = vpop.f32.mrf.mxu1 }
 0x1a0   :  { %v1948_v58 = vmax.f32 %v1461_v5, %v1931_v11  ;;  %v1955_v61 = vmax.f32 %v4633_v48, %v1897_v2 }
 0x1a1   :  { %v1992_v33 = vadd.f32 %v4650_v28, %v1947_v47  ;;  %v1999_v8 = vadd.f32 %v4657_v1, %v1954_v6 }
 0x1a2   :  { %v1993_v42 = vadd.f32 %v4650_v28, %v1948_v58  ;;  %v2000_v48 = vadd.f32 %v4657_v1, %v1955_v61 }
 0x1a3   :  { %v2019_v50 = vmax.f32 %v1992_v33, 0.0  ;;  %v2026_v18 = vmax.f32 %v1999_v8, 0.0 }
 0x1a4   :  { %v2020_v17 = vmax.f32 %v1993_v42, 0.0  ;;  %v2027_v0 = vmax.f32 %v2000_v48, 0.0 }
 0x1a5   :  { %v2042_v10 = vpack.c.bf16 %v2019_v50, %v2018_v55  ;;  %v2046_v14 = vpack.c.bf16 %v2026_v18, %v2025_v24 }
 0x1a6   :  { %v2043_v19 = vpack.c.bf16 %v2020_v17, %v2020_v17  ;;  %v1915_v56 = vpop.f32.mrf.mxu2  ;;  %v1882_v26 = vpop.f32.mrf.mxu0 }
 0x1a7   :  { %2057 = vst [vmem:[%s4772_s6 + $0x18] sm:$0xff] %v2042_v10  ;;  %v1956_v28 = vmax.f32 %v4635_v35, %v1915_v56  ;;  %v1933_v36 = vpop.f32.mrf.mxu3  ;;  %v1963_v32 = vmax.f32 %v4615_v34, %v1882_v26  ;;  %v1900_v22 = vpop.f32.mrf.mxu1 }
 0x1a8   :  { %2059 = vst.msk [vmem:[%s4772_s6 + $0x20] sm:$0xf] %vm2058_vm3, %v2043_v19  ;;  %v1957_v63 = vmax.f32 %v1470_v52, %v1933_v36  ;;  %v1964_v9 = vmax.f32 %v4644_v12, %v1900_v22 }
 0x1a9   :  { %2062 = vst [vmem:[%s4772_s6 + $0x34] sm:$0xff] %v2046_v14  ;;  %v2001_v30 = vadd.f32 %v4657_v1, %v1956_v28  ;;  %v2008_v25 = vadd.f32 %v4670_v38, %v1963_v32 }
 0x1aa   :  { %v2002_v35 = vadd.f32 %v4657_v1, %v1957_v63  ;;  %v2009_v1 = vadd.f32 %v4670_v38, %v1964_v9 }
 0x1ab   :  { %v2028_v34 = vmax.f32 %v2001_v30, 0.0  ;;  %v2035_v39 = vmax.f32 %v2008_v25, 0.0 }
 0x1ac   :  { %v2029_v59 = vmax.f32 %v2002_v35, 0.0  ;;  %v2036_v13 = vmax.f32 %v2009_v1, 0.0 }
 0x1ad   :  { %v2047_v3 = vpack.c.bf16 %v2028_v34, %v2027_v0  ;;  %v2051_v60 = vpack.c.bf16 %v2035_v39, %v2034_v53 }
 0x1ae   :  { %v2048_v57 = vpack.c.bf16 %v2029_v59, %v2029_v59  ;;  %v1918_v7 = vpop.f32.mrf.mxu2  ;;  %v1884_v16 = vpop.f32.mrf.mxu0 }
 0x1af   :  { %2063 = vst [vmem:[%s4772_s6 + $0x3c] sm:$0xff] %v2047_v3  ;;  %v1965_v23 = vmax.f32 %v4646_v49, %v1918_v7  ;;  %v1936_v12 = vpop.f32.mrf.mxu3  ;;  %v1902_v27 = vpop.f32.mrf.mxu1 }
 0x1b0   :  { %2064 = vst.msk [vmem:[%s4772_s6 + $0x44] sm:$0xf] %vm2058_vm3, %v2048_v57  ;;  %v1966_v40 = vmax.f32 %v1479_v37, %v1936_v12 }
 0x1b1   :  { %2067 = vst [vmem:[%s4772_s6 + $0x58] sm:$0x33] %v2051_v60  ;;  %v2010_v44 = vadd.f32 %v4670_v38, %v1965_v23 }
 0x1b2   :  { %v2011_v21 = vadd.f32 %v4670_v38, %v1966_v40 }
 0x1b3   :  { %v2037_v31 = vmax.f32 %v2010_v44, 0.0 }
 0x1b4   :  { %v2038_v15 = vmax.f32 %v2011_v21, 0.0 }
 0x1b5   :  { %v2052_v49 = vpack.c.bf16 %v2037_v31, %v2036_v13 }
 0x1b6   :  { %v2053_v43 = vpack.c.bf16 %v2038_v15, %v2038_v15  ;;  %v1920_v46 = vpop.f32.mrf.mxu2 }
 0x1b7   :  { %2068 = vst [vmem:[%s4772_s6 + $0x60] sm:$0x33] %v2052_v49  ;;  %v1938_v54 = vpop.f32.mrf.mxu3 }
 0x1b8   :  { %2070 = vst.msk [vmem:[%s4772_s6 + $0x68] sm:$0x3] %vm2069_vm4, %v2053_v43 }

// kernel: dqn_forward.4
= control target key start
LH: loop header
LB: loop body
LE: loop exit
PB: predicated region body
PF: predicated region fallthrough
CT: control target
= control target key end

     0   :  { %vm346_vm0 = vcmask 1041408   ;;  %vm336_vm1 = vcmask 949248   ;;  %vm1538_vm2 = vcmask 408576   ;;  %s2872_s1 = inlined_call_operand.vmem [shape: bf16[500,50], index: 1, kind: input, shape index: {}]   ;;  %s2873_s2 = inlined_call_operand.vmem [shape: bf16[500,50], index: 2, kind: input, shape index: {}]   ;;  %s2874_s0 = inlined_call_operand.vmem [shape: bf16[40,500], index: 0, kind: input, shape index: {}]   ;;  %s2875_s3 = inlined_call_operand.vmem [shape: bf16[500,50], index: 3, kind: input, shape index: {}]   ;;  %s2876_s4 = inlined_call_operand.vmem [shape: bf16[500,50], index: 4, kind: input, shape index: {}]   ;;  %s2877_s5 = inlined_call_operand.vmem [shape: f32[40,1], index: 5, kind: input, shape index: {}]   ;;  %s2878_s6 = inlined_call_operand.vmem [shape: f32[40,50], index: 6, kind: output, shape index: {}]  }
   0x1   :  { %v2103_v0 = vld [vmem:[%s2872_s1 + $0x38] sm:$0xff]  ;;  %v2102_v5 = vld [vmem:[%s2872_s1 + $0x30] sm:$0xff]  ;;  %v2101_v10 = vld [vmem:[%s2872_s1 + $0x28] sm:$0xff] }
   0x2   :  { %v2111_v1 = vld [vmem:[%s2872_s1 + $0x78] sm:$0xff]  ;;  %350 = vmatpush.bf16.msra.mxu0 %v2103_v0  ;;  %v2110_v6 = vld [vmem:[%s2872_s1 + $0x70] sm:$0xff]  ;;  %v2109_v11 = vld [vmem:[%s2872_s1 + $0x68] sm:$0xff] }
   0x3   :  { %v2119_v2 = vld [vmem:[%s2872_s1 + $0xb8] sm:$0xff]  ;;  %373 = vmatpush.bf16.msra.mxu1 %v2111_v1  ;;  %v2118_v7 = vld [vmem:[%s2872_s1 + $0xb0] sm:$0xff]  ;;  %v2117_v13 = vld [vmem:[%s2872_s1 + $0xa8] sm:$0xff] }
   0x4   :  { %v95_v3 = vld [vmem:[%s2872_s1 + $0xf8] sm:$0x3]  ;;  %396 = vmatpush.bf16.msra.mxu2 %v2119_v2  ;;  %v2126_v12 = vld [vmem:[%s2872_s1 + $0xf0] sm:$0xff]  ;;  %v2100_v14 = vld [vmem:[%s2872_s1 + $0x20] sm:$0xff] }
   0x5   :  { %v272_v4 = vunpack.c.l.b16 %v95_v3  ;;  %v2108_v15 = vld [vmem:[%s2872_s1 + $0x60] sm:$0xff]  ;;  %v2125_v16 = vld [vmem:[%s2872_s1 + $0xe8] sm:$0xff]  ;;  %v2099_v18 = vld [vmem:[%s2872_s1 + $0x18] sm:$0xff] }
   0x6   :  { %351 = vmatpush.bf16.msra.mxu0 %v2102_v5  ;;  %v2116_v17 = vld [vmem:[%s2872_s1 + $0xa0] sm:$0xff]  ;;  %v2107_v19 = vld [vmem:[%s2872_s1 + $0x58] sm:$0xff]  ;;  %v2098_v22 = vld [vmem:[%s2872_s1 + $0x10] sm:$0xff] }
   0x7   :  { %v304_v8 = vpack.c.b16 %v272_v4, %v272_v4  ;;  %374 = vmatpush.bf16.msra.mxu1 %v2110_v6  ;;  %v2124_v20 = vld [vmem:[%s2872_s1 + $0xe0] sm:$0xff]  ;;  %v2115_v21 = vld [vmem:[%s2872_s1 + $0x98] sm:$0xff]  ;;  %v2106_v23 = vld [vmem:[%s2872_s1 + $0x50] sm:$0xff] }
   0x8   :  { %397 = vmatpush.bf16.msra.mxu2 %v2118_v7  ;;  %v2123_v24 = vld [vmem:[%s2872_s1 + $0xd8] sm:$0xff]  ;;  %v2114_v25 = vld [vmem:[%s2872_s1 + $0x90] sm:$0xff]  ;;  %v2097_v26 = vld [vmem:[%s2872_s1 + $0x8] sm:$0xff] }
   0x9   :  { %v348_v9 = vsel %vm346_vm0, %v304_v8, 0  ;;  %v2105_v27 = vld [vmem:[%s2872_s1 + $0x48] sm:$0xff]  ;;  %v504_v28 = vld [vmem:[%s2873_s2 + $0xf8] sm:$0x3]  ;;  %v2122_v29 = vld [vmem:[%s2872_s1 + $0xd0] sm:$0xff] }
   0xa   :  { %419 = vmatpush.bf16.msra.mxu3 %v348_v9  ;;  %352 = vmatpush.bf16.msra.mxu0 %v2101_v10  ;;  %v2113_v30 = vld [vmem:[%s2872_s1 + $0x88] sm:$0xff]  ;;  %v2096_v32 = vld [vmem:[%s2872_s1] sm:$0xff]  ;;  %v630_v35 = vunpack.c.l.b16 %v504_v28  ;;  %v2090_v36 = vld [vmem:[%s2874_s0 + $0xc] sm:$0xf0] }
   0xb   :  { %375 = vmatpush.bf16.msra.mxu1 %v2109_v11  ;;  %v2121_v31 = vld [vmem:[%s2872_s1 + $0xc8] sm:$0xff]  ;;  %v2104_v33 = vld [vmem:[%s2872_s1 + $0x40] sm:$0xff]  ;;  %v1552_v38 = vld [vmem:[%s2874_s0 + $0x10] sm:$0xf0] }
   0xc   :  { %398 = vmatpush.bf16.msra.mxu2 %v2117_v13  ;;  %v1550_v34 = vld [vmem:[%s2874_s0] sm:$0xf]  ;;  %v2088_v37 = vld [vmem:[%s2874_s0 + $0x4] sm:$0xf]  ;;  %v1558_v40 = vld [vmem:[%s2874_s0 + $0x8] sm:$0xf]  ;;  %v662_v46 = vpack.c.b16 %v630_v35, %v630_v35 }
   0xd   :  { %v2112_v39 = vld [vmem:[%s2872_s1 + $0x80] sm:$0xff]  ;;  %v2091_v41 = vld [vmem:[%s2874_s0 + $0x14] sm:$0xf0]  ;;  %v2381_v44 = vor.u32 %v2090_v36, %v1550_v34  ;;  %v2383_v45 = vor.u32 %v2088_v37, %v1552_v38  ;;  %v2089_v50 = vld [vmem:[%s2874_s0 + $0xc] sm:$0xf] }
   0xe   :  { %420 = vmatpush.bf16.msra.mxu3 %v2126_v12  ;;  %353 = vmatpush.bf16.msra.mxu0 %v2100_v14  ;;  %v2150_v42 = vld [vmem:[%s2873_s2 + $0xb8] sm:$0xff]  ;;  %v2385_v47 = vor.u32 %v2091_v41, %v1558_v40  ;;  %v2120_v49 = vld [vmem:[%s2872_s1 + $0xc0] sm:$0xff]  ;;  %v2149_v52 = vld [vmem:[%s2873_s2 + $0xb0] sm:$0xff]  ;;  %v695_v53 = vsel %vm346_vm0, %v662_v46, 0 }
   0xf   :  { %376 = vmatpush.bf16.msra.mxu1 %v2108_v15  ;;  %v2134_v43 = vld [vmem:[%s2873_s2 + $0x38] sm:$0xff]  ;;  %v2133_v54 = vld [vmem:[%s2873_s2 + $0x30] sm:$0xff]  ;;  %v2148_v58 = vld [vmem:[%s2873_s2 + $0xa8] sm:$0xff] }
  0x10   :  { %399 = vmatpush.bf16.msra.mxu2 %v2116_v17  ;;  %v2142_v48 = vld [vmem:[%s2873_s2 + $0x78] sm:$0xff]  ;;  %v2141_v56 = vld [vmem:[%s2873_s2 + $0x70] sm:$0xff]  ;;  %v2132_v59 = vld [vmem:[%s2873_s2 + $0x28] sm:$0xff] }
  0x11   :  { %v1560_v51 = vld [vmem:[%s2874_s0 + $0x18] sm:$0xf0]  ;;  %v2157_v57 = vld [vmem:[%s2873_s2 + $0xf0] sm:$0xff]  ;;  %v2140_v60 = vld [vmem:[%s2873_s2 + $0x68] sm:$0xff] }
  0x12   :  { %421 = vmatpush.bf16.msra.mxu3 %v2125_v16  ;;  %354 = vmatpush.bf16.msra.mxu0 %v2099_v18  ;;  %v2409_v55 = vor.u32 %v2089_v50, %v1560_v51  ;;  %v2156_v61 = vld [vmem:[%s2873_s2 + $0xe8] sm:$0xff]  ;;  %v2147_v62 = vld [vmem:[%s2873_s2 + $0xa0] sm:$0xff]  ;;  %v2094_v0 = vld [vmem:[%s2874_s0 + $0x2c] sm:$0xf0] }
  0x13   :  { %377 = vmatpush.bf16.msra.mxu1 %v2107_v19  ;;  %v1566_v63 = vld [vmem:[%s2874_s0 + $0x20] sm:$0xf]  ;;  %v2092_v2 = vld [vmem:[%s2874_s0 + $0x24] sm:$0xf]  ;;  %v1568_v3 = vld [vmem:[%s2874_s0 + $0x30] sm:$0xf0] }
  0x14   :  { %400 = vmatpush.bf16.msra.mxu2 %v2115_v21  ;;  %v2131_v1 = vld [vmem:[%s2873_s2 + $0x20] sm:$0xff]  ;;  %v1574_v5 = vld [vmem:[%s2874_s0 + $0x28] sm:$0xf]  ;;  %v2095_v6 = vld [vmem:[%s2874_s0 + $0x34] sm:$0xf0]  ;;  %v2464_v9 = vor.u32 %v2094_v0, %v1566_v63  ;;  %v2466_v10 = vor.u32 %v2092_v2, %v1568_v3 }
  0x15   :  { %v2139_v4 = vld [vmem:[%s2873_s2 + $0x60] sm:$0xff]  ;;  %v2146_v8 = vld [vmem:[%s2873_s2 + $0x98] sm:$0xff]  ;;  %v2468_v11 = vor.u32 %v2095_v6, %v1574_v5  ;;  %v2093_v13 = vld [vmem:[%s2874_s0 + $0x2c] sm:$0xf] }
  0x16   :  { %422 = vmatpush.bf16.msra.mxu3 %v2124_v20  ;;  %355 = vmatpush.bf16.msra.mxu0 %v2098_v22  ;;  %v2155_v7 = vld [vmem:[%s2873_s2 + $0xe0] sm:$0xff]  ;;  %v2130_v12 = vld [vmem:[%s2873_s2 + $0x18] sm:$0xff]  ;;  %v2145_v17 = vld [vmem:[%s2873_s2 + $0x90] sm:$0xff] }
  0x17   :  { %378 = vmatpush.bf16.msra.mxu1 %v2106_v23  ;;  %v1576_v14 = vld [vmem:[%s2874_s0 + $0x38] sm:$0xf0]  ;;  %v2129_v19 = vld [vmem:[%s2873_s2 + $0x10] sm:$0xff]  ;;  %v2144_v22 = vld [vmem:[%s2873_s2 + $0x88] sm:$0xff] }
  0x18   :  { %401 = vmatpush.bf16.msra.mxu2 %v2114_v25  ;;  %v2138_v15 = vld [vmem:[%s2873_s2 + $0x58] sm:$0xff]  ;;  %v2491_v18 = vor.u32 %v2093_v13, %v1576_v14  ;;  %v2137_v20 = vld [vmem:[%s2873_s2 + $0x50] sm:$0xff]  ;;  %v31_v23 = vld [vmem:[%s2874_s0 + $0x40] sm:$0xff] }
  0x19   :  { %v2154_v16 = vld [vmem:[%s2873_s2 + $0xd8] sm:$0xff]  ;;  %v2153_v21 = vld [vmem:[%s2873_s2 + $0xd0] sm:$0xff]  ;;  %v2127_v35 = vld [vmem:[%s2873_s2] sm:$0xff] }
  0x1a   :  { %423 = vmatpush.bf16.msra.mxu3 %v2123_v24  ;;  %356 = vmatpush.bf16.msra.mxu0 %v2097_v26  ;;  %v2128_v24 = vld [vmem:[%s2873_s2 + $0x8] sm:$0xff]  ;;  %v856_v25 = vld [vmem:[%s2875_s3 + $0xf8] sm:$0x3]  ;;  %v2135_v36 = vld [vmem:[%s2873_s2 + $0x40] sm:$0xff] }
  0x1b   :  { %379 = vmatpush.bf16.msra.mxu1 %v2105_v27  ;;  %v32_v26 = vld [vmem:[%s2874_s0 + $0x48] sm:$0xff]  ;;  %v982_v28 = vunpack.c.l.b16 %v856_v25  ;;  %v2165_v38 = vld [vmem:[%s2875_s3 + $0x38] sm:$0xff]  ;;  %v2164_v50 = vld [vmem:[%s2875_s3 + $0x30] sm:$0xff] }
  0x1c   :  { %402 = vmatpush.bf16.msra.mxu2 %v2113_v30  ;;  %v2136_v27 = vld [vmem:[%s2873_s2 + $0x48] sm:$0xff]  ;;  %v2143_v30 = vld [vmem:[%s2873_s2 + $0x80] sm:$0xff]  ;;  %v124_v34 = vunpack.c.l.b16 %v32_v26  ;;  %v2173_v40 = vld [vmem:[%s2875_s3 + $0x78] sm:$0xff]  ;;  %v125_v46 = vunpack.c.h.b16 %v32_v26 }
  0x1d   :  { %v1014_v37 = vpack.c.b16 %v982_v28, %v982_v28  ;;  %v2172_v51 = vld [vmem:[%s2875_s3 + $0x70] sm:$0xff]  ;;  %v2177_v63 = vld [vmem:[%s2875_s3 + $0x98] sm:$0xff]  ;;  %v2167_v13 = vld [vmem:[%s2875_s3 + $0x48] sm:$0xff] }
  0x1e   :  { %424 = vmatpush.bf16.msra.mxu3 %v2122_v29  ;;  %357 = vmatpush.bf16.msra.mxu0 %v2096_v32  ;;  %v2152_v29 = vld [vmem:[%s2873_s2 + $0xc8] sm:$0xff]  ;;  %v123_v32 = vunpack.c.h.b16 %v31_v23  ;;  %v2161_v0 = vld [vmem:[%s2875_s3 + $0x18] sm:$0xff]  ;;  %v2176_v3 = vld [vmem:[%s2875_s3 + $0x90] sm:$0xff] }
  0x1f   :  { %380 = vmatpush.bf16.msra.mxu1 %v2104_v33  ;;  %v2181_v33 = vld [vmem:[%s2875_s3 + $0xb8] sm:$0xff]  ;;  %v2160_v5 = vld [vmem:[%s2875_s3 + $0x10] sm:$0xff]  ;;  %v2174_v14 = vld [vmem:[%s2875_s3 + $0x80] sm:$0xff] }
  0x20   :  { %403 = vmatpush.bf16.msra.mxu2 %v2112_v39  ;;  %v2151_v39 = vld [vmem:[%s2873_s2 + $0xc0] sm:$0xff]  ;;  %v2185_v2 = vld [vmem:[%s2875_s3 + $0xd8] sm:$0xff]  ;;  %v2168_v6 = vld [vmem:[%s2875_s3 + $0x50] sm:$0xff] }
  0x21   :  { %358 = vmatmul.bf16.vlgmr.msra.gmra.mxu0 %v2381_v44  ;;  %v2195_v25 = vld [vmem:[%s2876_s4 + $0x30] sm:$0xff]  ;;  %v2210_v28 = vld [vmem:[%s2876_s4 + $0xa8] sm:$0xff] }
  0x22   :  { %425 = vmatpush.bf16.msra.mxu3 %v2121_v31  ;;  %697 = vmatpush.bf16.msrb.mxu0 %v2134_v43  ;;  %v122_v31 = vunpack.c.l.b16 %v31_v23  ;;  %v2550_v43 = vpack.c.b16 %v124_v34, %v124_v34  ;;  %v2209_v34 = vld [vmem:[%s2876_s4 + $0xa0] sm:$0xff] }
  0x23   :  { %381 = vmatmul.bf16.vlgmr.msra.gmra.mxu1 %v2383_v45  ;;  %404 = vmatmul.bf16.vlgmr.msra.gmra.mxu2 %v2385_v47 }
  0x24   :  { %743 = vmatpush.bf16.msrb.mxu2 %v2150_v42  ;;  %720 = vmatpush.bf16.msrb.mxu1 %v2142_v48  ;;  %v2546_v41 = vpack.c.b16 %v122_v31, %v122_v31  ;;  %v2548_v42 = vpack.c.b16 %v123_v32, %v123_v32  ;;  %v1047_v48 = vsel %vm346_vm0, %v1014_v37, 0  ;;  %v2218_v31 = vld [vmem:[%s2876_s4 + $0xe8] sm:$0xff]  ;;  %v2201_v37 = vld [vmem:[%s2876_s4 + $0x60] sm:$0xff] }
  0x25   :  { %v2194_v32 = vld [vmem:[%s2876_s4 + $0x28] sm:$0xff] }
  0x26   :  { %426 = vmatpush.bf16.msra.mxu3 %v2120_v49  ;;  %698 = vmatpush.bf16.msrb.mxu0 %v2133_v54  ;;  %v2180_v49 = vld [vmem:[%s2875_s3 + $0xb0] sm:$0xff]  ;;  %v2179_v54 = vld [vmem:[%s2875_s3 + $0xa8] sm:$0xff] }
  0x28   :  { %744 = vmatpush.bf16.msrb.mxu2 %v2149_v52  ;;  %721 = vmatpush.bf16.msrb.mxu1 %v2141_v56  ;;  %v2565_v52 = vpack.c.b16 %v125_v46, %v125_v46  ;;  %v2163_v56 = vld [vmem:[%s2875_s3 + $0x28] sm:$0xff]  ;;  %v2200_v46 = vld [vmem:[%s2876_s4 + $0x58] sm:$0xff] }
  0x29   :  { %1704 = vmatmul.msk.bf16.vlgmr.msra.gmra.mxu3 %vm336_vm1, %v2409_v55 }
  0x2a   :  { %766 = vmatpush.bf16.msrb.mxu3 %v695_v53  ;;  %699 = vmatpush.bf16.msrb.mxu0 %v2132_v59  ;;  %v2188_v53 = vld [vmem:[%s2875_s3 + $0xf0] sm:$0xff]  ;;  %v2178_v59 = vld [vmem:[%s2875_s3 + $0xa0] sm:$0xff] }
  0x2c   :  { %745 = vmatpush.bf16.msrb.mxu2 %v2148_v58  ;;  %722 = vmatpush.bf16.msrb.mxu1 %v2140_v60  ;;  %v2187_v58 = vld [vmem:[%s2875_s3 + $0xe8] sm:$0xff]  ;;  %v2162_v60 = vld [vmem:[%s2875_s3 + $0x20] sm:$0xff] }
  0x2e   :  { %767 = vmatpush.bf16.msrb.mxu3 %v2157_v57  ;;  %700 = vmatpush.bf16.msrb.mxu0 %v2131_v1  ;;  %v2171_v57 = vld [vmem:[%s2875_s3 + $0x68] sm:$0xff]  ;;  %v2169_v1 = vld [vmem:[%s2875_s3 + $0x58] sm:$0xff] }
  0x30   :  { %746 = vmatpush.bf16.msrb.mxu2 %v2147_v62  ;;  %723 = vmatpush.bf16.msrb.mxu1 %v2139_v4  ;;  %v2186_v62 = vld [vmem:[%s2875_s3 + $0xe0] sm:$0xff]  ;;  %v2184_v4 = vld [vmem:[%s2875_s3 + $0xd0] sm:$0xff] }
  0x31   :  { %363 = vmatmul.bf16.gmra.mxu0 %v2464_v9 }
  0x32   :  { %768 = vmatpush.bf16.msrb.mxu3 %v2156_v61  ;;  %701 = vmatpush.bf16.msrb.mxu0 %v2130_v12  ;;  %v2170_v61 = vld [vmem:[%s2875_s3 + $0x60] sm:$0xff]  ;;  %v2159_v12 = vld [vmem:[%s2875_s3 + $0x8] sm:$0xff] }
  0x33   :  { %386 = vmatmul.bf16.gmra.mxu1 %v2466_v10  ;;  %409 = vmatmul.bf16.gmra.mxu2 %v2468_v11 }
  0x34   :  { %747 = vmatpush.bf16.msrb.mxu2 %v2146_v8  ;;  %724 = vmatpush.bf16.msrb.mxu1 %v2138_v15  ;;  %v2183_v8 = vld [vmem:[%s2875_s3 + $0xc8] sm:$0xff]  ;;  %v2158_v15 = vld [vmem:[%s2875_s3] sm:$0xff] }
  0x36   :  { %769 = vmatpush.bf16.msrb.mxu3 %v2155_v7  ;;  %702 = vmatpush.bf16.msrb.mxu0 %v2129_v19  ;;  %v2175_v7 = vld [vmem:[%s2875_s3 + $0x88] sm:$0xff]  ;;  %v2212_v19 = vld [vmem:[%s2876_s4 + $0xb8] sm:$0xff] }
  0x38   :  { %748 = vmatpush.bf16.msrb.mxu2 %v2145_v17  ;;  %725 = vmatpush.bf16.msrb.mxu1 %v2137_v20  ;;  %v2166_v17 = vld [vmem:[%s2875_s3 + $0x40] sm:$0xff]  ;;  %v1208_v20 = vld [vmem:[%s2876_s4 + $0xf8] sm:$0x3] }
  0x39   :  { %1705 = vmatmul.msk.bf16.gmra.mxu3 %vm336_vm1, %v2491_v18  ;;  %v1334_v23 = vunpack.c.l.b16 %v1208_v20  ;;  %v1499_v20 = vld [vmem:[%s2877_s5 + $0x8] sm:$0xff] }
  0x3a   :  { %770 = vmatpush.bf16.msrb.mxu3 %v2154_v16  ;;  %703 = vmatpush.bf16.msrb.mxu0 %v2128_v24  ;;  %v2182_v16 = vld [vmem:[%s2875_s3 + $0xc0] sm:$0xff]  ;;  %v2211_v24 = vld [vmem:[%s2876_s4 + $0xb0] sm:$0xff] }
  0x3b   :  { %v1366_v26 = vpack.c.b16 %v1334_v23, %v1334_v23 }
  0x3c   :  { %749 = vmatpush.bf16.msrb.mxu2 %v2144_v22  ;;  %726 = vmatpush.bf16.msrb.mxu1 %v2136_v27  ;;  %v2204_v22 = vld [vmem:[%s2876_s4 + $0x78] sm:$0xff]  ;;  %v2203_v27 = vld [vmem:[%s2876_s4 + $0x70] sm:$0xff] }
  0x3e   :  { %771 = vmatpush.bf16.msrb.mxu3 %v2153_v21  ;;  %704 = vmatpush.bf16.msrb.mxu0 %v2127_v35  ;;  %v2196_v21 = vld [vmem:[%s2876_s4 + $0x38] sm:$0xff]  ;;  %v2217_v35 = vld [vmem:[%s2876_s4 + $0xe0] sm:$0xff] }
  0x40   :  { %750 = vmatpush.bf16.msrb.mxu2 %v2143_v30  ;;  %727 = vmatpush.bf16.msrb.mxu1 %v2135_v36  ;;  %v2219_v30 = vld [vmem:[%s2876_s4 + $0xf0] sm:$0xff]  ;;  %v2193_v36 = vld [vmem:[%s2876_s4 + $0x20] sm:$0xff] }
  0x41   :  { %368 = vmatmul.bf16.gmra.mxu0 %v2546_v41 }
  0x42   :  { %772 = vmatpush.bf16.msrb.mxu3 %v2152_v29  ;;  %1049 = vmatpush.bf16.msra.mxu0 %v2165_v38  ;;  %v1399_v29 = vsel %vm346_vm0, %v1366_v26, 0  ;;  %v2208_v38 = vld [vmem:[%s2876_s4 + $0x98] sm:$0xff] }
  0x43   :  { %391 = vmatmul.bf16.gmra.mxu1 %v2548_v42  ;;  %414 = vmatmul.bf16.gmra.mxu2 %v2550_v43 }
  0x44   :  { %1095 = vmatpush.bf16.msra.mxu2 %v2181_v33  ;;  %1072 = vmatpush.bf16.msra.mxu1 %v2173_v40  ;;  %v2202_v33 = vld [vmem:[%s2876_s4 + $0x68] sm:$0xff]  ;;  %v2192_v40 = vld [vmem:[%s2876_s4 + $0x18] sm:$0xff] }
  0x46   :  { %773 = vmatpush.bf16.msrb.mxu3 %v2151_v39  ;;  %1050 = vmatpush.bf16.msra.mxu0 %v2164_v50  ;;  %v2216_v39 = vld [vmem:[%s2876_s4 + $0xd8] sm:$0xff]  ;;  %v2191_v50 = vld [vmem:[%s2876_s4 + $0x10] sm:$0xff] }
  0x48   :  { %1096 = vmatpush.bf16.msra.mxu2 %v2180_v49  ;;  %1073 = vmatpush.bf16.msra.mxu1 %v2172_v51  ;;  %v2215_v49 = vld [vmem:[%s2876_s4 + $0xd0] sm:$0xff] }
  0x49   :  { %1706 = vmatmul.msk.bf16.gmra.mxu3 %vm336_vm1, %v2565_v52  ;;  %v2199_v51 = vld [vmem:[%s2876_s4 + $0x50] sm:$0xff] }
  0x4a   :  { %1118 = vmatpush.bf16.msra.mxu3 %v1047_v48  ;;  %1051 = vmatpush.bf16.msra.mxu0 %v2163_v56  ;;  %v2207_v48 = vld [vmem:[%s2876_s4 + $0x90] sm:$0xff]  ;;  %v2198_v56 = vld [vmem:[%s2876_s4 + $0x48] sm:$0xff] }
  0x4c   :  { %1097 = vmatpush.bf16.msra.mxu2 %v2179_v54  ;;  %1074 = vmatpush.bf16.msra.mxu1 %v2171_v57  ;;  %v2190_v54 = vld [vmem:[%s2876_s4 + $0x8] sm:$0xff] }
  0x4d   :  { %v2214_v57 = vld [vmem:[%s2876_s4 + $0xc8] sm:$0xff] }
  0x4e   :  { %1119 = vmatpush.bf16.msra.mxu3 %v2188_v53  ;;  %1052 = vmatpush.bf16.msra.mxu0 %v2162_v60  ;;  %v2206_v53 = vld [vmem:[%s2876_s4 + $0x88] sm:$0xff]  ;;  %v2197_v60 = vld [vmem:[%s2876_s4 + $0x40] sm:$0xff] }
  0x50   :  { %1098 = vmatpush.bf16.msra.mxu2 %v2178_v59  ;;  %1075 = vmatpush.bf16.msra.mxu1 %v2170_v61  ;;  %v2189_v59 = vld [vmem:[%s2876_s4] sm:$0xff] }
  0x51   :  { %705 = vmatmul.bf16.vlgmr.msrb.gmra.mxu0 %v2381_v44  ;;  %v2213_v61 = vld [vmem:[%s2876_s4 + $0xc0] sm:$0xff] }
  0x52   :  { %1120 = vmatpush.bf16.msra.mxu3 %v2187_v58  ;;  %1053 = vmatpush.bf16.msra.mxu0 %v2161_v0  ;;  %v2205_v58 = vld [vmem:[%s2876_s4 + $0x80] sm:$0xff] }
  0x53   :  { %728 = vmatmul.bf16.vlgmr.msrb.gmra.mxu1 %v2383_v45  ;;  %751 = vmatmul.bf16.vlgmr.msrb.gmra.mxu2 %v2385_v47 }
  0x54   :  { %1099 = vmatpush.bf16.msra.mxu2 %v2177_v63  ;;  %1076 = vmatpush.bf16.msra.mxu1 %v2169_v1 }
  0x56   :  { %1121 = vmatpush.bf16.msra.mxu3 %v2186_v62  ;;  %1054 = vmatpush.bf16.msra.mxu0 %v2160_v5 }
  0x58   :  { %1100 = vmatpush.bf16.msra.mxu2 %v2176_v3  ;;  %1077 = vmatpush.bf16.msra.mxu1 %v2168_v6 }
  0x59   :  { %1831 = vmatmul.msk.bf16.vlgmr.msrb.gmra.mxu3 %vm336_vm1, %v2409_v55 }
  0x5a   :  { %1122 = vmatpush.bf16.msra.mxu3 %v2185_v2  ;;  %1055 = vmatpush.bf16.msra.mxu0 %v2159_v12  ;;  %v1498_v12 = vld [vmem:[%s2877_s5] sm:$0xff] }
  0x5c   :  { %1101 = vmatpush.bf16.msra.mxu2 %v2175_v7  ;;  %1078 = vmatpush.bf16.msra.mxu1 %v2167_v13 }
  0x5e   :  { %1123 = vmatpush.bf16.msra.mxu3 %v2184_v4  ;;  %1056 = vmatpush.bf16.msra.mxu0 %v2158_v15 }
  0x60   :  { %1102 = vmatpush.bf16.msra.mxu2 %v2174_v14  ;;  %1079 = vmatpush.bf16.msra.mxu1 %v2166_v17 }
  0x61   :  { %710 = vmatmul.bf16.gmra.mxu0 %v2464_v9 }
  0x62   :  { %1124 = vmatpush.bf16.msra.mxu3 %v2183_v8  ;;  %1401 = vmatpush.bf16.msrb.mxu0 %v2196_v21  ;;  %v2224_v8 = vmov 0  }
  0x63   :  { %733 = vmatmul.bf16.gmra.mxu1 %v2466_v10  ;;  %756 = vmatmul.bf16.gmra.mxu2 %v2468_v11 }
  0x64   :  { %1447 = vmatpush.bf16.msrb.mxu2 %v2212_v19  ;;  %1424 = vmatpush.bf16.msrb.mxu1 %v2204_v22 }
  0x65   :  { %2221 = vset.pattern.permute.xlu0 %v2224_v8  ;;  %2222 = vset.pattern.permute.xlu1 %v2224_v8 }
  0x66   :  { %1125 = vmatpush.bf16.msra.mxu3 %v2182_v16  ;;  %1402 = vmatpush.bf16.msrb.mxu0 %v2195_v25 }
  0x67   :  { %1505 = vperm.xlu0 %2221, %v1498_v12   ;;  %2223 = vset.pattern.permute.xlu2 %v2224_v8 }
  0x68   :  { %1448 = vmatpush.bf16.msrb.mxu2 %v2211_v24  ;;  %1425 = vmatpush.bf16.msrb.mxu1 %v2203_v27 }
  0x69   :  { %1832 = vmatmul.msk.bf16.gmra.mxu3 %vm336_vm1, %v2491_v18 }
  0x6a   :  { %1470 = vmatpush.bf16.msrb.mxu3 %v1399_v29  ;;  %1403 = vmatpush.bf16.msrb.mxu0 %v2194_v32 }
  0x6c   :  { %1449 = vmatpush.bf16.msrb.mxu2 %v2210_v28  ;;  %1426 = vmatpush.bf16.msrb.mxu1 %v2202_v33  ;;  %v1501_v33 = vld [vmem:[%s2877_s5 + $0x18] sm:$0xff] }
  0x6e   :  { %1471 = vmatpush.bf16.msrb.mxu3 %v2219_v30  ;;  %1404 = vmatpush.bf16.msrb.mxu0 %v2193_v36 }
  0x6f   :  { %1510 = vperm.xlu0 %2221, %v1499_v20  }
  0x70   :  { %1450 = vmatpush.bf16.msrb.mxu2 %v2209_v34  ;;  %1427 = vmatpush.bf16.msrb.mxu1 %v2201_v37 }
  0x71   :  { %715 = vmatmul.bf16.gmra.mxu0 %v2546_v41 }
  0x72   :  { %1472 = vmatpush.bf16.msrb.mxu3 %v2218_v31  ;;  %1405 = vmatpush.bf16.msrb.mxu0 %v2192_v40 }
  0x73   :  { %738 = vmatmul.bf16.gmra.mxu1 %v2548_v42  ;;  %761 = vmatmul.bf16.gmra.mxu2 %v2550_v43 }
  0x74   :  { %1451 = vmatpush.bf16.msrb.mxu2 %v2208_v38  ;;  %1428 = vmatpush.bf16.msrb.mxu1 %v2200_v46 }
  0x76   :  { %1473 = vmatpush.bf16.msrb.mxu3 %v2217_v35  ;;  %1406 = vmatpush.bf16.msrb.mxu0 %v2191_v50 }
  0x78   :  { %1452 = vmatpush.bf16.msrb.mxu2 %v2207_v48  ;;  %1429 = vmatpush.bf16.msrb.mxu1 %v2199_v51 }
  0x79   :  { %1833 = vmatmul.msk.bf16.gmra.mxu3 %vm336_vm1, %v2565_v52 }
  0x7a   :  { %1474 = vmatpush.bf16.msrb.mxu3 %v2216_v39  ;;  %1407 = vmatpush.bf16.msrb.mxu0 %v2190_v54 }
  0x7c   :  { %1453 = vmatpush.bf16.msrb.mxu2 %v2206_v53  ;;  %1430 = vmatpush.bf16.msrb.mxu1 %v2198_v56 }
  0x7e   :  { %1475 = vmatpush.bf16.msrb.mxu3 %v2215_v49  ;;  %1408 = vmatpush.bf16.msrb.mxu0 %v2189_v59 }
  0x80   :  { %1454 = vmatpush.bf16.msrb.mxu2 %v2205_v58  ;;  %1431 = vmatpush.bf16.msrb.mxu1 %v2197_v60  ;;  %v1502_v60 = vld [vmem:[%s2877_s5 + $0x20] sm:$0xff] }
  0x81   :  { %1057 = vmatmul.bf16.vlgmr.msra.gmra.mxu0 %v2381_v44  ;;  %1525 = vperm.xlu2 %2223, %v1502_v60  }
  0x82   :  { %1476 = vmatpush.bf16.msrb.mxu3 %v2214_v57 }
  0x83   :  { %1080 = vmatmul.bf16.vlgmr.msra.gmra.mxu1 %v2383_v45  ;;  %1103 = vmatmul.bf16.vlgmr.msra.gmra.mxu2 %v2385_v47 }
  0x86   :  { %1477 = vmatpush.bf16.msrb.mxu3 %v2213_v61 }
  0x89   :  { %1958 = vmatmul.msk.bf16.vlgmr.msra.gmra.mxu3 %vm336_vm1, %v2409_v55 }
  0x91   :  { %1062 = vmatmul.bf16.gmra.mxu0 %v2464_v9 }
  0x93   :  { %1085 = vmatmul.bf16.gmra.mxu1 %v2466_v10  ;;  %1108 = vmatmul.bf16.gmra.mxu2 %v2468_v11 }
  0x99   :  { %1959 = vmatmul.msk.bf16.gmra.mxu3 %vm336_vm1, %v2491_v18 }
  0x9e   :  { %v359_v62 = vpop.f32.mrf.mxu0 }
  0xa0   :  { %v382_v63 = vpop.f32.mrf.mxu1 }
  0xa1   :  { %v383_v0 = vadd.f32 %v382_v63, %v359_v62  ;;  %1067 = vmatmul.bf16.gmra.mxu0 %v2546_v41 }
  0xa3   :  { %1090 = vmatmul.bf16.gmra.mxu1 %v2548_v42  ;;  %1113 = vmatmul.bf16.gmra.mxu2 %v2550_v43 }
  0xa6   :  { %v405_v1 = vpop.f32.mrf.mxu2  ;;  %v361_v3 = vpop.f32.mrf.mxu0 }
  0xa7   :  { %v406_v2 = vadd.f32 %v405_v1, %v383_v0 }
  0xa8   :  { %v384_v4 = vpop.f32.mrf.mxu1 }
  0xa9   :  { %1960 = vmatmul.msk.bf16.gmra.mxu3 %vm336_vm1, %v2565_v52  ;;  %v385_v5 = vadd.f32 %v384_v4, %v361_v3 }
  0xac   :  { %v428_v6 = vpop.f32.mrf.mxu3 }
  0xad   :  { %v2771_v7 = vadd.f32 %v428_v6, %v406_v2 }
  0xae   :  { %v407_v13 = vpop.f32.mrf.mxu2  ;;  %v364_v15 = vpop.f32.mrf.mxu0 }
  0xaf   :  { %v408_v14 = vadd.f32 %v407_v13, %v385_v5 }
  0xb0   :  { %v387_v16 = vpop.f32.mrf.mxu1 }
  0xb1   :  { %v388_v17 = vadd.f32 %v387_v16, %v364_v15  ;;  %1409 = vmatmul.bf16.vlgmr.msrb.gmra.mxu0 %v2381_v44 }
  0xb3   :  { %1432 = vmatmul.bf16.vlgmr.msrb.gmra.mxu1 %v2383_v45  ;;  %1455 = vmatmul.bf16.vlgmr.msrb.gmra.mxu2 %v2385_v47  ;;  %v1500_v45 = vld [vmem:[%s2877_s5 + $0x10] sm:$0xff] }
  0xb4   :  { %v430_v19 = vpop.f32.mrf.mxu3  ;;  %1515 = vperm.xlu1 %2222, %v1500_v45  }
  0xb5   :  { %v2781_v21 = vadd.f32 %v430_v19, %v408_v14 }
  0xb6   :  { %v410_v22 = vpop.f32.mrf.mxu2  ;;  %v366_v24 = vpop.f32.mrf.mxu0 }
  0xb7   :  { %v411_v23 = vadd.f32 %v410_v22, %v388_v17 }
  0xb8   :  { %v389_v25 = vpop.f32.mrf.mxu1 }
  0xb9   :  { %2085 = vmatmul.msk.bf16.vlgmr.msrb.gmra.mxu3 %vm336_vm1, %v2409_v55  ;;  %v390_v26 = vadd.f32 %v389_v25, %v366_v24 }
  0xbc   :  { %v433_v44 = vpop.f32.mrf.mxu3  ;;  %1520 = vperm.xlu1 %2222, %v1501_v33  }
  0xbd   :  { %v2786_v27 = vadd.f32 %v433_v44, %v411_v23 }
  0xbe   :  { %v412_v28 = vpop.f32.mrf.mxu2  ;;  %v369_v47 = vpop.f32.mrf.mxu0 }
  0xbf   :  { %v413_v29 = vadd.f32 %v412_v28, %v390_v26 }
  0xc0   :  { %v392_v30 = vpop.f32.mrf.mxu1 }
  0xc1   :  { %v393_v31 = vadd.f32 %v392_v30, %v369_v47  ;;  %1414 = vmatmul.bf16.gmra.mxu0 %v2464_v9 }
  0xc3   :  { %1437 = vmatmul.bf16.gmra.mxu1 %v2466_v10  ;;  %1460 = vmatmul.bf16.gmra.mxu2 %v2468_v11 }
  0xc4   :  { %v435_v32 = vpop.f32.mrf.mxu3 }
  0xc5   :  { %v2793_v55 = vadd.f32 %v435_v32, %v413_v29 }
  0xc6   :  { %v415_v34 = vpop.f32.mrf.mxu2  ;;  %v371_v36 = vpop.f32.mrf.mxu0 }
  0xc7   :  { %v416_v35 = vadd.f32 %v415_v34, %v393_v31 }
  0xc8   :  { %v394_v37 = vpop.f32.mrf.mxu1 }
  0xc9   :  { %2086 = vmatmul.msk.bf16.gmra.mxu3 %vm336_vm1, %v2491_v18 }
  0xcc   :  { %v438_v38 = vpop.f32.mrf.mxu3 }
  0xcd   :  { %v2801_v9 = vadd.f32 %v438_v38, %v416_v35 }
  0xce   :  { %v417_v10 = vpop.f32.mrf.mxu2  ;;  %v706_v39 = vpop.f32.mrf.mxu0 }
  0xd0   :  { %v729_v40 = vpop.f32.mrf.mxu1 }
  0xd1   :  { %v730_v46 = vadd.f32 %v729_v40, %v706_v39  ;;  %1419 = vmatmul.bf16.gmra.mxu0 %v2546_v41 }
  0xd3   :  { %1442 = vmatmul.bf16.gmra.mxu1 %v2548_v42  ;;  %1465 = vmatmul.bf16.gmra.mxu2 %v2550_v43 }
  0xd4   :  { %v440_v11 = vpop.f32.mrf.mxu3 }
  0xd6   :  { %v752_v48 = vpop.f32.mrf.mxu2  ;;  %v708_v18 = vpop.f32.mrf.mxu0 }
  0xd7   :  { %v753_v49 = vadd.f32 %v752_v48, %v730_v46 }
  0xd8   :  { %v731_v50 = vpop.f32.mrf.mxu1 }
  0xd9   :  { %2087 = vmatmul.msk.bf16.gmra.mxu3 %vm336_vm1, %v2565_v52  ;;  %v732_v51 = vadd.f32 %v731_v50, %v708_v18 }
  0xdc   :  { %v775_v53 = vpop.f32.mrf.mxu3 }
  0xdd   :  { %v2808_v54 = vadd.f32 %v775_v53, %v753_v49 }
  0xde   :  { %v754_v57 = vpop.f32.mrf.mxu2  ;;  %v711_v58 = vpop.f32.mrf.mxu0 }
  0xdf   :  { %v789_v56 = vmax.f32 %v2771_v7, %v2808_v54  ;;  %v755_v41 = vadd.f32 %v754_v57, %v732_v51 }
  0xe0   :  { %v734_v42 = vpop.f32.mrf.mxu1 }
  0xe1   :  { %v735_v59 = vadd.f32 %v734_v42, %v711_v58 }
  0xe4   :  { %v777_v43 = vpop.f32.mrf.mxu3 }
  0xe5   :  { %v2815_v52 = vadd.f32 %v777_v43, %v755_v41 }
  0xe6   :  { %v757_v62 = vpop.f32.mrf.mxu2  ;;  %v713_v0 = vpop.f32.mrf.mxu0 }
  0xe7   :  { %v790_v61 = vmax.f32 %v2781_v21, %v2815_v52  ;;  %v758_v63 = vadd.f32 %v757_v62, %v735_v59 }
  0xe8   :  { %v736_v1 = vpop.f32.mrf.mxu1 }
  0xe9   :  { %v737_v2 = vadd.f32 %v736_v1, %v713_v0 }
  0xec   :  { %v780_v3 = vpop.f32.mrf.mxu3 }
  0xed   :  { %v2819_v4 = vadd.f32 %v780_v3, %v758_v63  ;;  %v1506_v3 = vpop.permute.xlu0 %1505 }
  0xee   :  { %v759_v6 = vpop.f32.mrf.mxu2  ;;  %v716_v12 = vpop.f32.mrf.mxu0 }
  0xef   :  { %v791_v5 = vmax.f32 %v2786_v27, %v2819_v4  ;;  %v760_v8 = vadd.f32 %v759_v6, %v737_v2 }
  0xf0   :  { %v739_v13 = vpop.f32.mrf.mxu1 }
  0xf1   :  { %v740_v14 = vadd.f32 %v739_v13, %v716_v12 }
  0xf4   :  { %v782_v15 = vpop.f32.mrf.mxu3 }
  0xf5   :  { %v2823_v16 = vadd.f32 %v782_v15, %v760_v8 }
  0xf6   :  { %v762_v19 = vpop.f32.mrf.mxu2  ;;  %v718_v22 = vpop.f32.mrf.mxu0 }
  0xf7   :  { %v792_v17 = vmax.f32 %v2793_v55, %v2823_v16  ;;  %v763_v20 = vadd.f32 %v762_v19, %v740_v14 }
  0xf8   :  { %v741_v23 = vpop.f32.mrf.mxu1 }
  0xfc   :  { %v785_v24 = vpop.f32.mrf.mxu3 }
  0xfd   :  { %v2827_v25 = vadd.f32 %v785_v24, %v763_v20 }
  0xfe   :  { %v764_v44 = vpop.f32.mrf.mxu2  ;;  %v1058_v45 = vpop.f32.mrf.mxu0 }
  0xff   :  { %v793_v26 = vmax.f32 %v2801_v9, %v2827_v25 }
 0x100   :  { %v1081_v28 = vpop.f32.mrf.mxu1 }
 0x101   :  { %v1082_v57 = vadd.f32 %v1081_v28, %v1058_v45 }
 0x104   :  { %v787_v29 = vpop.f32.mrf.mxu3 }
 0x106   :  { %v1104_v47 = vpop.f32.mrf.mxu2  ;;  %v1060_v30 = vpop.f32.mrf.mxu0 }
 0x107   :  { %v1105_v59 = vadd.f32 %v1104_v47, %v1082_v57 }
 0x108   :  { %v1083_v31 = vpop.f32.mrf.mxu1 }
 0x109   :  { %v1084_v6 = vadd.f32 %v1083_v31, %v1060_v30  ;;  %v1511_v30 = vpop.permute.xlu0 %1510 }
 0x10c   :  { %v1127_v32 = vpop.f32.mrf.mxu3 }
 0x10d   :  { %v1128_v62 = vadd.f32 %v1127_v32, %v1105_v59 }
 0x10e   :  { %v1106_v33 = vpop.f32.mrf.mxu2  ;;  %v1063_v34 = vpop.f32.mrf.mxu0 }
 0x10f   :  { %v1141_v8 = vmax.f32 %v789_v56, %v1128_v62  ;;  %v1107_v13 = vadd.f32 %v1106_v33, %v1084_v6 }
 0x110   :  { %v1086_v35 = vpop.f32.mrf.mxu1 }
 0x111   :  { %v1087_v19 = vadd.f32 %v1086_v35, %v1063_v34 }
 0x114   :  { %v1129_v36 = vpop.f32.mrf.mxu3 }
 0x115   :  { %v1130_v20 = vadd.f32 %v1129_v36, %v1107_v13 }
 0x116   :  { %v1109_v37 = vpop.f32.mrf.mxu2  ;;  %v1065_v38 = vpop.f32.mrf.mxu0 }
 0x117   :  { %v1142_v47 = vmax.f32 %v790_v61, %v1130_v20  ;;  %v1110_v7 = vadd.f32 %v1109_v37, %v1087_v19 }
 0x118   :  { %v1088_v10 = vpop.f32.mrf.mxu1 }
 0x119   :  { %v1089_v52 = vadd.f32 %v1088_v10, %v1065_v38 }
 0x11c   :  { %v1132_v39 = vpop.f32.mrf.mxu3 }
 0x11d   :  { %v1133_v33 = vadd.f32 %v1132_v39, %v1110_v7 }
 0x11e   :  { %v1111_v40 = vpop.f32.mrf.mxu2  ;;  %v1068_v46 = vpop.f32.mrf.mxu0 }
 0x11f   :  { %v1143_v61 = vmax.f32 %v791_v5, %v1133_v33  ;;  %v1112_v57 = vadd.f32 %v1111_v40, %v1089_v52 }
 0x120   :  { %v1091_v11 = vpop.f32.mrf.mxu1 }
 0x124   :  { %v1134_v48 = vpop.f32.mrf.mxu3 }
 0x126   :  { %v2831_v49 = vpop.f32.mrf.mxu2  ;;  %v1070_v18 = vpop.f32.mrf.mxu0 }
 0x127   :  { %v1516_v21 = vpop.permute.xlu1 %1515 }
 0x128   :  { %v1093_v50 = vpop.f32.mrf.mxu1 }
 0x12c   :  { %v2833_v51 = vpop.f32.mrf.mxu3 }
 0x12e   :  { %v1116_v53 = vpop.f32.mrf.mxu2  ;;  %v1410_v41 = vpop.f32.mrf.mxu0 }
 0x130   :  { %v1433_v58 = vpop.f32.mrf.mxu1 }
 0x131   :  { %v1434_v43 = vadd.f32 %v1433_v58, %v1410_v41  ;;  %v1092_v58 = vadd.f32 %v1091_v11, %v1068_v46  ;;  %v1521_v46 = vpop.permute.xlu1 %1520 }
 0x133   :  { %v1115_v4 = vadd.f32 %v2831_v49, %v1092_v58 }
 0x134   :  { %v1139_v42 = vpop.f32.mrf.mxu3 }
 0x135   :  { %v1135_v42 = vadd.f32 %v1134_v48, %v1112_v57 }
 0x136   :  { %v1456_v60 = vpop.f32.mrf.mxu2  ;;  %v1412_v0 = vpop.f32.mrf.mxu0 }
 0x137   :  { %v1457_v63 = vadd.f32 %v1456_v60, %v1434_v43  ;;  %v1144_v27 = vmax.f32 %v792_v17, %v1135_v42 }
 0x138   :  { %v1435_v1 = vpop.f32.mrf.mxu1 }
 0x139   :  { %v1436_v22 = vadd.f32 %v1435_v1, %v1412_v0  ;;  %v1138_v0 = vadd.f32 %v2833_v51, %v1115_v4 }
 0x13b   :  { %v1145_v17 = vmax.f32 %v793_v26, %v1138_v0 }
 0x13c   :  { %v1479_v2 = vpop.f32.mrf.mxu3 }
 0x13d   :  { %v1480_v12 = vadd.f32 %v1479_v2, %v1457_v63 }
 0x13e   :  { %v1458_v15 = vpop.f32.mrf.mxu2  ;;  %v1415_v24 = vpop.f32.mrf.mxu0 }
 0x13f   :  { %v1493_v14 = vmax.f32 %v1141_v8, %v1480_v12  ;;  %v1459_v28 = vadd.f32 %v1458_v15, %v1436_v22  ;;  %v1526_v8 = vpop.permute.xlu2 %1525 }
 0x140   :  { %v1438_v44 = vpop.f32.mrf.mxu1 }
 0x141   :  { %v1528_v23 = vadd.f32 %v1506_v3, %v1493_v14  ;;  %v1439_v54 = vadd.f32 %v1438_v44, %v1415_v24 }
 0x143   :  { %v1533_v45 = vmax.f32 %v1528_v23, 0.0 }
 0x144   :  { %v1481_v29 = vpop.f32.mrf.mxu3 }
 0x145   :  { %1539 = vst.msk [vmem:[%s2878_s6] sm:$0xff] %vm1538_vm2, %v1533_v45  ;;  %v1482_v56 = vadd.f32 %v1481_v29, %v1459_v28 }
 0x146   :  { %v1461_v32 = vpop.f32.mrf.mxu2  ;;  %v1417_v36 = vpop.f32.mrf.mxu0 }
 0x147   :  { %v1494_v31 = vmax.f32 %v1142_v47, %v1482_v56  ;;  %v1462_v35 = vadd.f32 %v1461_v32, %v1439_v54 }
 0x148   :  { %v1440_v18 = vpop.f32.mrf.mxu1 }
 0x149   :  { %v1529_v34 = vadd.f32 %v1511_v30, %v1494_v31  ;;  %v1441_v59 = vadd.f32 %v1440_v18, %v1417_v36 }
 0x14b   :  { %v1534_v50 = vmax.f32 %v1529_v34, 0.0 }
 0x14c   :  { %v1484_v53 = vpop.f32.mrf.mxu3 }
 0x14d   :  { %1540 = vst.msk [vmem:[%s2878_s6 + $0x8] sm:$0xff] %vm1538_vm2, %v1534_v50  ;;  %v1485_v37 = vadd.f32 %v1484_v53, %v1462_v35 }
 0x14e   :  { %v1463_v41 = vpop.f32.mrf.mxu2  ;;  %v1420_v60 = vpop.f32.mrf.mxu0 }
 0x14f   :  { %v1495_v39 = vmax.f32 %v1143_v61, %v1485_v37  ;;  %v1464_v10 = vadd.f32 %v1463_v41, %v1441_v59 }
 0x150   :  { %v1443_v62 = vpop.f32.mrf.mxu1 }
 0x151   :  { %v1530_v43 = vadd.f32 %v1516_v21, %v1495_v39  ;;  %v1444_v5 = vadd.f32 %v1443_v62, %v1420_v60 }
 0x153   :  { %v1535_v38 = vmax.f32 %v1530_v43, 0.0 }
 0x154   :  { %v1486_v63 = vpop.f32.mrf.mxu3 }
 0x155   :  { %1541 = vst.msk [vmem:[%s2878_s6 + $0x10] sm:$0xff] %vm1538_vm2, %v1535_v38  ;;  %v1487_v40 = vadd.f32 %v1486_v63, %v1464_v10 }
 0x156   :  { %v1466_v48 = vpop.f32.mrf.mxu2  ;;  %v1422_v3 = vpop.f32.mrf.mxu0 }
 0x157   :  { %v1496_v11 = vmax.f32 %v1144_v27, %v1487_v40  ;;  %v1467_v2 = vadd.f32 %v1466_v48, %v1444_v5 }
 0x158   :  { %v1445_v6 = vpop.f32.mrf.mxu1 }
 0x159   :  { %v1531_v1 = vadd.f32 %v1521_v46, %v1496_v11 }
 0x15b   :  { %v1536_v55 = vmax.f32 %v1531_v1, 0.0 }
 0x15c   :  { %v1489_v16 = vpop.f32.mrf.mxu3 }
 0x15d   :  { %1542 = vst.msk [vmem:[%s2878_s6 + $0x18] sm:$0xff] %vm1538_vm2, %v1536_v55  ;;  %v1490_v49 = vadd.f32 %v1489_v16, %v1467_v2 }
 0x15e   :  { %v1468_v13 = vpop.f32.mrf.mxu2 }
 0x15f   :  { %v1497_v12 = vmax.f32 %v1145_v17, %v1490_v49 }
 0x161   :  { %v1532_v51 = vadd.f32 %v1526_v8, %v1497_v12 }
 0x163   :  { %v1537_v14 = vmax.f32 %v1532_v51, 0.0 }
 0x164   :  { %v1491_v15 = vpop.f32.mrf.mxu3 }
 0x165   :  { %1543 = vst.msk [vmem:[%s2878_s6 + $0x20] sm:$0xff] %vm1538_vm2, %v1537_v14 }

// kernel: dqn_forward.5
= control target key start
LH: loop header
LB: loop body
LE: loop exit
PB: predicated region body
PF: predicated region fallthrough
CT: control target
= control target key end

     0   :  { %vm311_vm0 = vcmask 850944   ;;  %s1789_s0 = inlined_call_operand.vmem [shape: f32[2,1000], index: 0, kind: input, shape index: {}]   ;;  %s1790_s1 = inlined_call_operand.vmem [shape: f32[2,4], index: 1, kind: input, shape index: {}]   ;;  %s1791_s2 = inlined_call_operand.vmem [shape: f32[1000,200], index: 2, kind: input, shape index: {}]   ;;  %s1792_s3 = inlined_call_operand.vmem [shape: f32[1,200], index: 3, kind: input, shape index: {}]   ;;  %s1793_s4 = inlined_call_operand.vmem [shape: f32[200,50], index: 4, kind: input, shape index: {}]   ;;  %s1794_s5 = inlined_call_operand.vmem [shape: f32[4,50], index: 5, kind: input, shape index: {}]   ;;  %s1795_s6 = inlined_call_operand.vmem [shape: f32[1,50], index: 6, kind: input, shape index: {}]   ;;  %s1796_s7 = inlined_call_operand.vmem [shape: f32[50,3], index: 7, kind: input, shape index: {}]   ;;  %s1797_s8 = inlined_call_operand.vmem [shape: f32[1,3], index: 8, kind: input, shape index: {}]   ;;  %s1798_s9 = inlined_call_operand.hbm [shape: f32[2,3], index: 9, kind: output, shape index: {}]  }
   0x1   :  { %v129_v0 = vld [vmem:[%s1791_s2 + $0x2f0] sm:$0xff]  ;;  %v127_v3 = vld [vmem:[%s1791_s2 + $0x2e0] sm:$0xff] }
   0x2   :  { %v161_v1 = vld [vmem:[%s1791_s2 + $0x3f0] sm:$0xff]  ;;  %354 = vmatpush.msra.mxu2 %v129_v0  ;;  %v159_v4 = vld [vmem:[%s1791_s2 + $0x3e0] sm:$0xff] }
   0x3   :  { %v65_v2 = vld [vmem:[%s1791_s2 + $0xf0] sm:$0xff]  ;;  %374 = vmatpush.msra.mxu3 %v161_v1  ;;  %v63_v5 = vld [vmem:[%s1791_s2 + $0xe0] sm:$0xff] }
   0x4   :  { %314 = vmatpush.msra.mxu0 %v65_v2  ;;  %v97_v6 = vld [vmem:[%s1791_s2 + $0x1f0] sm:$0xff]  ;;  %355 = vmatpush.msra.mxu2 %v127_v3  ;;  %v95_v10 = vld [vmem:[%s1791_s2 + $0x1e0] sm:$0xff] }
   0x5   :  { %v125_v7 = vld [vmem:[%s1791_s2 + $0x2d0] sm:$0xff]  ;;  %375 = vmatpush.msra.mxu3 %v159_v4  ;;  %334 = vmatpush.msra.mxu1 %v97_v6  ;;  %v123_v11 = vld [vmem:[%s1791_s2 + $0x2c0] sm:$0xff] }
   0x6   :  { %v157_v8 = vld [vmem:[%s1791_s2 + $0x3d0] sm:$0xff]  ;;  %315 = vmatpush.msra.mxu0 %v63_v5  ;;  %v155_v12 = vld [vmem:[%s1791_s2 + $0x3c0] sm:$0xff]  ;;  %356 = vmatpush.msra.mxu2 %v125_v7 }
   0x7   :  { %v61_v9 = vld [vmem:[%s1791_s2 + $0xd0] sm:$0xff]  ;;  %376 = vmatpush.msra.mxu3 %v157_v8  ;;  %v59_v13 = vld [vmem:[%s1791_s2 + $0xc0] sm:$0xff]  ;;  %335 = vmatpush.msra.mxu1 %v95_v10 }
   0x8   :  { %v93_v14 = vld [vmem:[%s1791_s2 + $0x1d0] sm:$0xff]  ;;  %316 = vmatpush.msra.mxu0 %v61_v9  ;;  %357 = vmatpush.msra.mxu2 %v123_v11  ;;  %v91_v18 = vld [vmem:[%s1791_s2 + $0x1c0] sm:$0xff] }
   0x9   :  { %v121_v15 = vld [vmem:[%s1791_s2 + $0x2b0] sm:$0xff]  ;;  %377 = vmatpush.msra.mxu3 %v155_v12  ;;  %336 = vmatpush.msra.mxu1 %v93_v14  ;;  %v119_v19 = vld [vmem:[%s1791_s2 + $0x2a0] sm:$0xff] }
   0xa   :  { %v153_v16 = vld [vmem:[%s1791_s2 + $0x3b0] sm:$0xff]  ;;  %317 = vmatpush.msra.mxu0 %v59_v13  ;;  %v151_v20 = vld [vmem:[%s1791_s2 + $0x3a0] sm:$0xff]  ;;  %358 = vmatpush.msra.mxu2 %v121_v15 }
   0xb   :  { %v57_v17 = vld [vmem:[%s1791_s2 + $0xb0] sm:$0xff]  ;;  %378 = vmatpush.msra.mxu3 %v153_v16  ;;  %v55_v21 = vld [vmem:[%s1791_s2 + $0xa0] sm:$0xff]  ;;  %337 = vmatpush.msra.mxu1 %v91_v18 }
   0xc   :  { %v89_v22 = vld [vmem:[%s1791_s2 + $0x1b0] sm:$0xff]  ;;  %318 = vmatpush.msra.mxu0 %v57_v17  ;;  %359 = vmatpush.msra.mxu2 %v119_v19  ;;  %v87_v26 = vld [vmem:[%s1791_s2 + $0x1a0] sm:$0xff] }
   0xd   :  { %v117_v23 = vld [vmem:[%s1791_s2 + $0x290] sm:$0xff]  ;;  %379 = vmatpush.msra.mxu3 %v151_v20  ;;  %338 = vmatpush.msra.mxu1 %v89_v22  ;;  %v115_v27 = vld [vmem:[%s1791_s2 + $0x280] sm:$0xff] }
   0xe   :  { %v149_v24 = vld [vmem:[%s1791_s2 + $0x390] sm:$0xff]  ;;  %319 = vmatpush.msra.mxu0 %v55_v21  ;;  %v147_v28 = vld [vmem:[%s1791_s2 + $0x380] sm:$0xff]  ;;  %360 = vmatpush.msra.mxu2 %v117_v23 }
   0xf   :  { %v53_v25 = vld [vmem:[%s1791_s2 + $0x90] sm:$0xff]  ;;  %380 = vmatpush.msra.mxu3 %v149_v24  ;;  %v51_v29 = vld [vmem:[%s1791_s2 + $0x80] sm:$0xff]  ;;  %339 = vmatpush.msra.mxu1 %v87_v26  ;;  %v34_v26 = vld [vmem:[%s1789_s0 + $0x8] sm:$0xff] }
  0x10   :  { %v85_v30 = vld [vmem:[%s1791_s2 + $0x190] sm:$0xff]  ;;  %320 = vmatpush.msra.mxu0 %v53_v25  ;;  %361 = vmatpush.msra.mxu2 %v115_v27  ;;  %v83_v34 = vld [vmem:[%s1791_s2 + $0x180] sm:$0xff]  ;;  %295 = vst [vmem:[#allocation1 + $0x20] ss:$4 sm:$0xff] %v34_v26 }
  0x11   :  { %v113_v31 = vld [vmem:[%s1791_s2 + $0x270] sm:$0xff]  ;;  %381 = vmatpush.msra.mxu3 %v147_v28  ;;  %340 = vmatpush.msra.mxu1 %v85_v30  ;;  %v111_v35 = vld [vmem:[%s1791_s2 + $0x260] sm:$0xff] }
  0x12   :  { %v145_v32 = vld [vmem:[%s1791_s2 + $0x370] sm:$0xff]  ;;  %321 = vmatpush.msra.mxu0 %v51_v29  ;;  %v143_v36 = vld [vmem:[%s1791_s2 + $0x360] sm:$0xff]  ;;  %362 = vmatpush.msra.mxu2 %v113_v31 }
  0x13   :  { %v49_v33 = vld [vmem:[%s1791_s2 + $0x70] sm:$0xff]  ;;  %382 = vmatpush.msra.mxu3 %v145_v32  ;;  %v47_v37 = vld [vmem:[%s1791_s2 + $0x60] sm:$0xff]  ;;  %341 = vmatpush.msra.mxu1 %v83_v34 }
  0x14   :  { %v81_v38 = vld [vmem:[%s1791_s2 + $0x170] sm:$0xff]  ;;  %322 = vmatpush.msra.mxu0 %v49_v33  ;;  %363 = vmatpush.msra.mxu2 %v111_v35  ;;  %v79_v42 = vld [vmem:[%s1791_s2 + $0x160] sm:$0xff] }
  0x15   :  { %v109_v39 = vld [vmem:[%s1791_s2 + $0x250] sm:$0xff]  ;;  %383 = vmatpush.msra.mxu3 %v143_v36  ;;  %342 = vmatpush.msra.mxu1 %v81_v38  ;;  %v107_v43 = vld [vmem:[%s1791_s2 + $0x240] sm:$0xff] }
  0x16   :  { %v141_v40 = vld [vmem:[%s1791_s2 + $0x350] sm:$0xff]  ;;  %323 = vmatpush.msra.mxu0 %v47_v37  ;;  %v139_v44 = vld [vmem:[%s1791_s2 + $0x340] sm:$0xff]  ;;  %364 = vmatpush.msra.mxu2 %v109_v39 }
  0x17   :  { %v45_v41 = vld [vmem:[%s1791_s2 + $0x50] sm:$0xff]  ;;  %384 = vmatpush.msra.mxu3 %v141_v40  ;;  %v43_v45 = vld [vmem:[%s1791_s2 + $0x40] sm:$0xff]  ;;  %343 = vmatpush.msra.mxu1 %v79_v42 }
  0x18   :  { %v77_v46 = vld [vmem:[%s1791_s2 + $0x150] sm:$0xff]  ;;  %324 = vmatpush.msra.mxu0 %v45_v41  ;;  %365 = vmatpush.msra.mxu2 %v107_v43  ;;  %v75_v50 = vld [vmem:[%s1791_s2 + $0x140] sm:$0xff] }
  0x19   :  { %v105_v47 = vld [vmem:[%s1791_s2 + $0x230] sm:$0xff]  ;;  %385 = vmatpush.msra.mxu3 %v139_v44  ;;  %344 = vmatpush.msra.mxu1 %v77_v46  ;;  %v103_v51 = vld [vmem:[%s1791_s2 + $0x220] sm:$0xff] }
  0x1a   :  { %v137_v48 = vld [vmem:[%s1791_s2 + $0x330] sm:$0xff]  ;;  %325 = vmatpush.msra.mxu0 %v43_v45  ;;  %v135_v52 = vld [vmem:[%s1791_s2 + $0x320] sm:$0xff]  ;;  %366 = vmatpush.msra.mxu2 %v105_v47 }
  0x1b   :  { %v41_v49 = vld [vmem:[%s1791_s2 + $0x30] sm:$0xff]  ;;  %386 = vmatpush.msra.mxu3 %v137_v48  ;;  %v39_v53 = vld [vmem:[%s1791_s2 + $0x20] sm:$0xff]  ;;  %345 = vmatpush.msra.mxu1 %v75_v50 }
  0x1c   :  { %v73_v54 = vld [vmem:[%s1791_s2 + $0x130] sm:$0xff]  ;;  %326 = vmatpush.msra.mxu0 %v41_v49  ;;  %367 = vmatpush.msra.mxu2 %v103_v51  ;;  %v71_v58 = vld [vmem:[%s1791_s2 + $0x120] sm:$0xff] }
  0x1d   :  { %v101_v55 = vld [vmem:[%s1791_s2 + $0x210] sm:$0xff]  ;;  %387 = vmatpush.msra.mxu3 %v135_v52  ;;  %346 = vmatpush.msra.mxu1 %v73_v54  ;;  %v99_v59 = vld [vmem:[%s1791_s2 + $0x200] sm:$0xff] }
  0x1e   :  { %v133_v56 = vld [vmem:[%s1791_s2 + $0x310] sm:$0xff]  ;;  %327 = vmatpush.msra.mxu0 %v39_v53  ;;  %v131_v60 = vld [vmem:[%s1791_s2 + $0x300] sm:$0xff]  ;;  %368 = vmatpush.msra.mxu2 %v101_v55  ;;  %v66_v55 = vld [vmem:[%s1791_s2 + $0xf8] sm:$0xff] }
  0x1f   :  { %v37_v57 = vld [vmem:[%s1791_s2 + $0x10] sm:$0xff]  ;;  %388 = vmatpush.msra.mxu3 %v133_v56  ;;  %v283_v62 = vld [vmem:[%s1791_s2 + $0x7c0] sm:$0xff]  ;;  %347 = vmatpush.msra.mxu1 %v71_v58 }
  0x20   :  { %v257_v61 = vld [vmem:[%s1791_s2 + $0x6f0] sm:$0xff]  ;;  %328 = vmatpush.msra.mxu0 %v37_v57  ;;  %v35_v63 = vld [vmem:[%s1791_s2] sm:$0xff]  ;;  %369 = vmatpush.msra.mxu2 %v99_v59  ;;  %v64_v59 = vld [vmem:[%s1791_s2 + $0xe8] sm:$0xff] }
  0x21   :  { %v69_v0 = vld [vmem:[%s1791_s2 + $0x110] sm:$0xff]  ;;  %389 = vmatpush.msra.mxu3 %v131_v60  ;;  %v255_v2 = vld [vmem:[%s1791_s2 + $0x6e0] sm:$0xff] }
  0x22   :  { %v193_v1 = vld [vmem:[%s1791_s2 + $0x4f0] sm:$0xff]  ;;  %434 = vmatpush.msrb.mxu2 %v257_v61  ;;  %v67_v4 = vld [vmem:[%s1791_s2 + $0x100] sm:$0xff]  ;;  %329 = vmatpush.msra.mxu0 %v35_v63  ;;  %v62_v63 = vld [vmem:[%s1791_s2 + $0xd8] sm:$0xff] }
  0x23   :  { %457 = vmatpush.msrb.mxu3 %v283_v62  ;;  %v281_v3 = vld [vmem:[%s1791_s2 + $0x7b0] sm:$0xff]  ;;  %348 = vmatpush.msra.mxu1 %v69_v0  ;;  %v191_v5 = vld [vmem:[%s1791_s2 + $0x4e0] sm:$0xff] }
  0x24   :  { %v225_v6 = vld [vmem:[%s1791_s2 + $0x5f0] sm:$0xff]  ;;  %394 = vmatpush.msrb.mxu0 %v193_v1  ;;  %435 = vmatpush.msrb.mxu2 %v255_v2  ;;  %v279_v8 = vld [vmem:[%s1791_s2 + $0x7a0] sm:$0xff] }
  0x25   :  { %v253_v7 = vld [vmem:[%s1791_s2 + $0x6d0] sm:$0xff]  ;;  %458 = vmatpush.msrb.mxu3 %v281_v3  ;;  %349 = vmatpush.msra.mxu1 %v67_v4  ;;  %v223_v10 = vld [vmem:[%s1791_s2 + $0x5e0] sm:$0xff]  ;;  %v60_v4 = vld [vmem:[%s1791_s2 + $0xc8] sm:$0xff] }
  0x26   :  { %v189_v9 = vld [vmem:[%s1791_s2 + $0x4d0] sm:$0xff]  ;;  %395 = vmatpush.msrb.mxu0 %v191_v5  ;;  %v251_v11 = vld [vmem:[%s1791_s2 + $0x6c0] sm:$0xff]  ;;  %436 = vmatpush.msrb.mxu2 %v253_v7 }
  0x27   :  { %414 = vmatpush.msrb.mxu1 %v225_v6  ;;  %v277_v12 = vld [vmem:[%s1791_s2 + $0x790] sm:$0xff]  ;;  %v33_v13 = vld [vmem:[%s1789_s0] sm:$0xff]  ;;  %459 = vmatpush.msrb.mxu3 %v279_v8  ;;  %v1291_v8 = vld.sshfl [vmem:[#allocation1 + $0x38] sm:$0xff pattern:$0x73625140] }
  0x28   :  { %v187_v14 = vld [vmem:[%s1791_s2 + $0x4c0] sm:$0xff]  ;;  %v221_v15 = vld [vmem:[%s1791_s2 + $0x5d0] sm:$0xff]  ;;  %293 = vst [vmem:[#allocation1] ss:$4 sm:$0xff] %v33_v13  ;;  %396 = vmatpush.msrb.mxu0 %v189_v9  ;;  %437 = vmatpush.msrb.mxu2 %v251_v11  ;;  %v58_v9 = vld [vmem:[%s1791_s2 + $0xb8] sm:$0xff] }
  0x29   :  { %415 = vmatpush.msrb.mxu1 %v223_v10  ;;  %v249_v16 = vld [vmem:[%s1791_s2 + $0x6b0] sm:$0xff]  ;;  %v275_v17 = vld [vmem:[%s1791_s2 + $0x780] sm:$0xff]  ;;  %460 = vmatpush.msrb.mxu3 %v277_v12  ;;  %v98_v10 = vld [vmem:[%s1791_s2 + $0x1f8] sm:$0xff] }
  0x2a   :  { %v185_v18 = vld [vmem:[%s1791_s2 + $0x4b0] sm:$0xff]  ;;  %v219_v19 = vld [vmem:[%s1791_s2 + $0x5c0] sm:$0xff]  ;;  %397 = vmatpush.msrb.mxu0 %v187_v14  ;;  %438 = vmatpush.msrb.mxu2 %v249_v16  ;;  %v162_v12 = vld [vmem:[%s1791_s2 + $0x3f8] sm:$0xff] }
  0x2b   :  { %416 = vmatpush.msrb.mxu1 %v221_v15  ;;  %v247_v20 = vld [vmem:[%s1791_s2 + $0x6a0] sm:$0xff]  ;;  %v273_v21 = vld [vmem:[%s1791_s2 + $0x770] sm:$0xff]  ;;  %461 = vmatpush.msrb.mxu3 %v275_v17  ;;  %v1309_v13 = vld.sshfl [vmem:[#allocation1 + $0x28] sm:$0xff pattern:$0x73625140] }
  0x2c   :  { %v183_v22 = vld [vmem:[%s1791_s2 + $0x4a0] sm:$0xff]  ;;  %v217_v23 = vld [vmem:[%s1791_s2 + $0x5b0] sm:$0xff]  ;;  %398 = vmatpush.msrb.mxu0 %v185_v18  ;;  %439 = vmatpush.msrb.mxu2 %v247_v20  ;;  %v56_v14 = vld [vmem:[%s1791_s2 + $0xa8] sm:$0xff] }
  0x2d   :  { %417 = vmatpush.msrb.mxu1 %v219_v19  ;;  %v245_v24 = vld [vmem:[%s1791_s2 + $0x690] sm:$0xff]  ;;  %v271_v25 = vld [vmem:[%s1791_s2 + $0x760] sm:$0xff]  ;;  %462 = vmatpush.msrb.mxu3 %v273_v21  ;;  %v96_v15 = vld [vmem:[%s1791_s2 + $0x1e8] sm:$0xff] }
  0x2e   :  { %v181_v27 = vld [vmem:[%s1791_s2 + $0x490] sm:$0xff]  ;;  %v215_v28 = vld [vmem:[%s1791_s2 + $0x5a0] sm:$0xff]  ;;  %399 = vmatpush.msrb.mxu0 %v183_v22  ;;  %440 = vmatpush.msrb.mxu2 %v245_v24  ;;  %v130_v16 = vld [vmem:[%s1791_s2 + $0x2f8] sm:$0xff] }
  0x2f   :  { %418 = vmatpush.msrb.mxu1 %v217_v23  ;;  %v243_v29 = vld [vmem:[%s1791_s2 + $0x680] sm:$0xff]  ;;  %v269_v30 = vld [vmem:[%s1791_s2 + $0x750] sm:$0xff]  ;;  %463 = vmatpush.msrb.mxu3 %v271_v25  ;;  %v1235_v53 = vld.sshfl [vmem:[#allocation1 + $0x18] sm:$0xff pattern:$0x73625140] }
  0x30   :  { %v179_v31 = vld [vmem:[%s1791_s2 + $0x480] sm:$0xff]  ;;  %v213_v32 = vld [vmem:[%s1791_s2 + $0x590] sm:$0xff]  ;;  %400 = vmatpush.msrb.mxu0 %v181_v27  ;;  %441 = vmatpush.msrb.mxu2 %v243_v29  ;;  %v1250_v58 = vld.sshfl [vmem:[#allocation1 + $0x8] sm:$0xff pattern:$0x73625140] }
  0x31   :  { %419 = vmatpush.msrb.mxu1 %v215_v28  ;;  %v241_v33 = vld [vmem:[%s1791_s2 + $0x670] sm:$0xff]  ;;  %v267_v34 = vld [vmem:[%s1791_s2 + $0x740] sm:$0xff]  ;;  %464 = vmatpush.msrb.mxu3 %v269_v30  ;;  %v54_v17 = vld [vmem:[%s1791_s2 + $0x98] sm:$0xff] }
  0x32   :  { %v177_v35 = vld [vmem:[%s1791_s2 + $0x470] sm:$0xff]  ;;  %v211_v36 = vld [vmem:[%s1791_s2 + $0x580] sm:$0xff]  ;;  %401 = vmatpush.msrb.mxu0 %v179_v31  ;;  %442 = vmatpush.msrb.mxu2 %v241_v33  ;;  %v160_v18 = vld [vmem:[%s1791_s2 + $0x3e8] sm:$0xff] }
  0x33   :  { %420 = vmatpush.msrb.mxu1 %v213_v32  ;;  %v239_v37 = vld [vmem:[%s1791_s2 + $0x660] sm:$0xff]  ;;  %v265_v38 = vld [vmem:[%s1791_s2 + $0x730] sm:$0xff]  ;;  %465 = vmatpush.msrb.mxu3 %v267_v34  ;;  %v94_v19 = vld [vmem:[%s1791_s2 + $0x1d8] sm:$0xff] }
  0x34   :  { %v175_v39 = vld [vmem:[%s1791_s2 + $0x460] sm:$0xff]  ;;  %v209_v40 = vld [vmem:[%s1791_s2 + $0x570] sm:$0xff]  ;;  %402 = vmatpush.msrb.mxu0 %v177_v35  ;;  %443 = vmatpush.msrb.mxu2 %v239_v37  ;;  %v128_v20 = vld [vmem:[%s1791_s2 + $0x2e8] sm:$0xff] }
  0x35   :  { %421 = vmatpush.msrb.mxu1 %v211_v36  ;;  %v237_v41 = vld [vmem:[%s1791_s2 + $0x650] sm:$0xff]  ;;  %v263_v42 = vld [vmem:[%s1791_s2 + $0x720] sm:$0xff]  ;;  %466 = vmatpush.msrb.mxu3 %v265_v38 }
  0x36   :  { %v173_v43 = vld [vmem:[%s1791_s2 + $0x450] sm:$0xff]  ;;  %v207_v44 = vld [vmem:[%s1791_s2 + $0x560] sm:$0xff]  ;;  %403 = vmatpush.msrb.mxu0 %v175_v39  ;;  %444 = vmatpush.msrb.mxu2 %v237_v41 }
  0x37   :  { %422 = vmatpush.msrb.mxu1 %v209_v40  ;;  %v235_v45 = vld [vmem:[%s1791_s2 + $0x640] sm:$0xff]  ;;  %v261_v46 = vld [vmem:[%s1791_s2 + $0x710] sm:$0xff]  ;;  %467 = vmatpush.msrb.mxu3 %v263_v42 }
  0x38   :  { %v1218_v47 = vld.sshfl [vmem:[#allocation1 + $0x10] sm:$0xff pattern:$0x73625140]  ;;  %v171_v48 = vld [vmem:[%s1791_s2 + $0x440] sm:$0xff]  ;;  %404 = vmatpush.msrb.mxu0 %v173_v43  ;;  %445 = vmatpush.msrb.mxu2 %v235_v45 }
  0x39   :  { %423 = vmatpush.msrb.mxu1 %v207_v44  ;;  %v205_v49 = vld [vmem:[%s1791_s2 + $0x550] sm:$0xff]  ;;  %468 = vmatpush.msrb.mxu3 %v261_v46  ;;  %v259_v51 = vld [vmem:[%s1791_s2 + $0x700] sm:$0xff] }
  0x3a   :  { %v233_v50 = vld [vmem:[%s1791_s2 + $0x630] sm:$0xff]  ;;  %v1232_v52 = vld.sshfl [vmem:[#allocation1] sm:$0xff pattern:$0x73625140]  ;;  %370 = vmatmul.f32.vlgmr.msra.gmra.mxu2 %v1218_v47  ;;  %405 = vmatpush.msrb.mxu0 %v171_v48 }
  0x3b   :  { %v169_v54 = vld [vmem:[%s1791_s2 + $0x430] sm:$0xff]  ;;  %424 = vmatpush.msrb.mxu1 %v205_v49  ;;  %446 = vmatpush.msrb.mxu2 %v233_v50  ;;  %v203_v56 = vld [vmem:[%s1791_s2 + $0x540] sm:$0xff] }
  0x3c   :  { %469 = vmatpush.msrb.mxu3 %v259_v51  ;;  %330 = vmatmul.f32.vlgmr.msra.gmra.mxu0 %v1232_v52  ;;  %v231_v57 = vld [vmem:[%s1791_s2 + $0x620] sm:$0xff]  ;;  %v201_v61 = vld [vmem:[%s1791_s2 + $0x530] sm:$0xff] }
  0x3d   :  { %390 = vmatmul.f32.vlgmr.msra.gmra.mxu3 %v1235_v53  ;;  %406 = vmatpush.msrb.mxu0 %v169_v54  ;;  %v167_v60 = vld [vmem:[%s1791_s2 + $0x420] sm:$0xff]  ;;  %v229_v62 = vld [vmem:[%s1791_s2 + $0x610] sm:$0xff] }
  0x3e   :  { %474 = vmatpush.msra.mxu3 %v66_v55  ;;  %425 = vmatpush.msrb.mxu1 %v203_v56  ;;  %v165_v0 = vld [vmem:[%s1791_s2 + $0x410] sm:$0xff]  ;;  %v199_v1 = vld [vmem:[%s1791_s2 + $0x520] sm:$0xff] }
  0x3f   :  { %447 = vmatpush.msrb.mxu2 %v231_v57  ;;  %350 = vmatmul.f32.vlgmr.msra.gmra.mxu1 %v1250_v58  ;;  %v227_v2 = vld [vmem:[%s1791_s2 + $0x600] sm:$0xff]  ;;  %v1278_v3 = vld.sshfl [vmem:[#allocation1 + $0x30] sm:$0xff pattern:$0x73625140] }
  0x40   :  { %475 = vmatpush.msra.mxu3 %v64_v59  ;;  %407 = vmatpush.msrb.mxu0 %v167_v60  ;;  %v163_v5 = vld [vmem:[%s1791_s2 + $0x400] sm:$0xff]  ;;  %v197_v6 = vld [vmem:[%s1791_s2 + $0x510] sm:$0xff] }
  0x41   :  { %426 = vmatpush.msrb.mxu1 %v201_v61  ;;  %448 = vmatpush.msrb.mxu2 %v229_v62  ;;  %v1289_v7 = vld.sshfl [vmem:[#allocation1 + $0x20] sm:$0xff pattern:$0x73625140] }
  0x42   :  { %476 = vmatpush.msra.mxu3 %v62_v63  ;;  %408 = vmatpush.msrb.mxu0 %v165_v0  ;;  %v195_v11 = vld [vmem:[%s1791_s2 + $0x500] sm:$0xff] }
  0x43   :  { %427 = vmatpush.msrb.mxu1 %v199_v1  ;;  %449 = vmatpush.msrb.mxu2 %v227_v2 }
  0x44   :  { %450 = vmatmul.f32.vlgmr.msrb.gmra.mxu2 %v1278_v3  ;;  %477 = vmatpush.msra.mxu3 %v60_v4 }
  0x45   :  { %409 = vmatpush.msrb.mxu0 %v163_v5  ;;  %428 = vmatpush.msrb.mxu1 %v197_v6 }
  0x46   :  { %410 = vmatmul.f32.vlgmr.msrb.gmra.mxu0 %v1289_v7  ;;  %798 = vmatmul.msk.f32.vlgmr.msrb.gmra.mxu3 %vm311_vm0, %v1291_v8 }
  0x47   :  { %478 = vmatpush.msra.mxu3 %v58_v9  ;;  %494 = vmatpush.msra.mxu0 %v98_v10 }
  0x48   :  { %429 = vmatpush.msrb.mxu1 %v195_v11  ;;  %534 = vmatpush.msra.mxu2 %v162_v12 }
  0x49   :  { %430 = vmatmul.f32.vlgmr.msrb.gmra.mxu1 %v1309_v13  ;;  %479 = vmatpush.msra.mxu3 %v56_v14 }
  0x4a   :  { %14 = vsyncpa [#allocation3], 0  ;;  %495 = vmatpush.msra.mxu0 %v96_v15  ;;  %514 = vmatpush.msra.mxu1 %v130_v16  ;;  %v52_v21 = vld [vmem:[%s1791_s2 + $0x88] sm:$0xff]  ;;  %v158_v22 = vld [vmem:[%s1791_s2 + $0x3d8] sm:$0xff]  ;;  %vm667_vm1 = vcmask 1043456   ;;  %vm663_vm2 = vcmask 31744  }
  0x4b   :  { %480 = vmatpush.msra.mxu3 %v54_v17  ;;  %v92_v23 = vld [vmem:[%s1791_s2 + $0x1c8] sm:$0xff]  ;;  %v126_v24 = vld [vmem:[%s1791_s2 + $0x2d8] sm:$0xff]  ;;  %535 = vmatpush.msra.mxu2 %v160_v18  ;;  %vm691_vm3 = vcmask 588800   ;;  %vm756_vm4 = vcmask 1041408   ;;  %vm752_vm5 = vcmask 408576   ;;  %s834_s13 = smov [#allocation2]  }
  0x4c   :  { %496 = vmatpush.msra.mxu0 %v94_v19  ;;  %515 = vmatpush.msra.mxu1 %v128_v20  ;;  %v50_v25 = vld [vmem:[%s1791_s2 + $0x78] sm:$0xff]  ;;  %v156_v26 = vld [vmem:[%s1791_s2 + $0x3c8] sm:$0xff]  ;;  %s789_s16 = sshll.u32 %s1798_s9, 4  ;;  %vm780_vm6 = vcmask 17408   ;;  %s790_s16 = int_to_ptr.hbm [resolvable:$true] %s789_s16 }
  0x4d   :  { %481 = vmatpush.msra.mxu3 %v52_v21  ;;  %v90_v27 = vld [vmem:[%s1791_s2 + $0x1b8] sm:$0xff]  ;;  %v124_v28 = vld [vmem:[%s1791_s2 + $0x2c8] sm:$0xff]  ;;  %536 = vmatpush.msra.mxu2 %v158_v22 }
  0x4e   :  { %497 = vmatpush.msra.mxu0 %v92_v23  ;;  %516 = vmatpush.msra.mxu1 %v126_v24  ;;  %v48_v29 = vld [vmem:[%s1791_s2 + $0x68] sm:$0xff]  ;;  %v154_v30 = vld [vmem:[%s1791_s2 + $0x3b8] sm:$0xff] }
  0x4f   :  { %482 = vmatpush.msra.mxu3 %v50_v25  ;;  %v88_v31 = vld [vmem:[%s1791_s2 + $0x1a8] sm:$0xff]  ;;  %v122_v32 = vld [vmem:[%s1791_s2 + $0x2b8] sm:$0xff]  ;;  %537 = vmatpush.msra.mxu2 %v156_v26 }
  0x50   :  { %498 = vmatpush.msra.mxu0 %v90_v27  ;;  %517 = vmatpush.msra.mxu1 %v124_v28  ;;  %v46_v33 = vld [vmem:[%s1791_s2 + $0x58] sm:$0xff]  ;;  %v152_v34 = vld [vmem:[%s1791_s2 + $0x3a8] sm:$0xff] }
  0x51   :  { %483 = vmatpush.msra.mxu3 %v48_v29  ;;  %v86_v35 = vld [vmem:[%s1791_s2 + $0x198] sm:$0xff]  ;;  %v120_v36 = vld [vmem:[%s1791_s2 + $0x2a8] sm:$0xff]  ;;  %538 = vmatpush.msra.mxu2 %v154_v30 }
  0x52   :  { %499 = vmatpush.msra.mxu0 %v88_v31  ;;  %518 = vmatpush.msra.mxu1 %v122_v32  ;;  %v44_v37 = vld [vmem:[%s1791_s2 + $0x48] sm:$0xff]  ;;  %v150_v38 = vld [vmem:[%s1791_s2 + $0x398] sm:$0xff] }
  0x53   :  { %484 = vmatpush.msra.mxu3 %v46_v33  ;;  %v84_v39 = vld [vmem:[%s1791_s2 + $0x188] sm:$0xff]  ;;  %v118_v40 = vld [vmem:[%s1791_s2 + $0x298] sm:$0xff]  ;;  %539 = vmatpush.msra.mxu2 %v152_v34 }
  0x54   :  { %500 = vmatpush.msra.mxu0 %v86_v35  ;;  %519 = vmatpush.msra.mxu1 %v120_v36  ;;  %v42_v41 = vld [vmem:[%s1791_s2 + $0x38] sm:$0xff]  ;;  %v148_v42 = vld [vmem:[%s1791_s2 + $0x388] sm:$0xff] }
  0x55   :  { %485 = vmatpush.msra.mxu3 %v44_v37  ;;  %v82_v43 = vld [vmem:[%s1791_s2 + $0x178] sm:$0xff]  ;;  %v116_v44 = vld [vmem:[%s1791_s2 + $0x288] sm:$0xff]  ;;  %540 = vmatpush.msra.mxu2 %v150_v38 }
  0x56   :  { %501 = vmatpush.msra.mxu0 %v84_v39  ;;  %520 = vmatpush.msra.mxu1 %v118_v40  ;;  %v40_v45 = vld [vmem:[%s1791_s2 + $0x28] sm:$0xff]  ;;  %v146_v46 = vld [vmem:[%s1791_s2 + $0x378] sm:$0xff] }
  0x57   :  { %486 = vmatpush.msra.mxu3 %v42_v41  ;;  %v80_v48 = vld [vmem:[%s1791_s2 + $0x168] sm:$0xff]  ;;  %v114_v49 = vld [vmem:[%s1791_s2 + $0x278] sm:$0xff]  ;;  %541 = vmatpush.msra.mxu2 %v148_v42 }
  0x58   :  { %502 = vmatpush.msra.mxu0 %v82_v43  ;;  %521 = vmatpush.msra.mxu1 %v116_v44  ;;  %v38_v50 = vld [vmem:[%s1791_s2 + $0x18] sm:$0xff]  ;;  %v144_v51 = vld [vmem:[%s1791_s2 + $0x368] sm:$0xff] }
  0x59   :  { %487 = vmatpush.msra.mxu3 %v40_v45  ;;  %v78_v54 = vld [vmem:[%s1791_s2 + $0x158] sm:$0xff]  ;;  %v112_v55 = vld [vmem:[%s1791_s2 + $0x268] sm:$0xff]  ;;  %542 = vmatpush.msra.mxu2 %v146_v46 }
  0x5a   :  { %503 = vmatpush.msra.mxu0 %v80_v48  ;;  %522 = vmatpush.msra.mxu1 %v114_v49  ;;  %v36_v56 = vld [vmem:[%s1791_s2 + $0x8] sm:$0xff]  ;;  %v142_v57 = vld [vmem:[%s1791_s2 + $0x358] sm:$0xff] }
  0x5b   :  { %488 = vmatpush.msra.mxu3 %v38_v50  ;;  %v76_v59 = vld [vmem:[%s1791_s2 + $0x148] sm:$0xff]  ;;  %v110_v60 = vld [vmem:[%s1791_s2 + $0x258] sm:$0xff]  ;;  %543 = vmatpush.msra.mxu2 %v144_v51 }
  0x5c   :  { %504 = vmatpush.msra.mxu0 %v78_v54  ;;  %523 = vmatpush.msra.mxu1 %v112_v55  ;;  %v194_v61 = vld [vmem:[%s1791_s2 + $0x4f8] sm:$0xff]  ;;  %v140_v62 = vld [vmem:[%s1791_s2 + $0x348] sm:$0xff] }
  0x5d   :  { %489 = vmatpush.msra.mxu3 %v36_v56  ;;  %v74_v63 = vld [vmem:[%s1791_s2 + $0x138] sm:$0xff]  ;;  %v108_v0 = vld [vmem:[%s1791_s2 + $0x248] sm:$0xff]  ;;  %544 = vmatpush.msra.mxu2 %v142_v57 }
  0x5e   :  { %505 = vmatpush.msra.mxu0 %v76_v59  ;;  %524 = vmatpush.msra.mxu1 %v110_v60  ;;  %v192_v1 = vld [vmem:[%s1791_s2 + $0x4e8] sm:$0xff]  ;;  %v138_v2 = vld [vmem:[%s1791_s2 + $0x338] sm:$0xff] }
  0x5f   :  { %554 = vmatpush.msrb.mxu3 %v194_v61  ;;  %v72_v4 = vld [vmem:[%s1791_s2 + $0x128] sm:$0xff]  ;;  %v106_v5 = vld [vmem:[%s1791_s2 + $0x238] sm:$0xff]  ;;  %545 = vmatpush.msra.mxu2 %v140_v62 }
  0x60   :  { %506 = vmatpush.msra.mxu0 %v74_v63  ;;  %525 = vmatpush.msra.mxu1 %v108_v0  ;;  %v190_v6 = vld [vmem:[%s1791_s2 + $0x4d8] sm:$0xff]  ;;  %v136_v9 = vld [vmem:[%s1791_s2 + $0x328] sm:$0xff] }
  0x61   :  { %555 = vmatpush.msrb.mxu3 %v192_v1  ;;  %v70_v10 = vld [vmem:[%s1791_s2 + $0x118] sm:$0xff]  ;;  %v104_v11 = vld [vmem:[%s1791_s2 + $0x228] sm:$0xff]  ;;  %546 = vmatpush.msra.mxu2 %v138_v2 }
  0x62   :  { %507 = vmatpush.msra.mxu0 %v72_v4  ;;  %526 = vmatpush.msra.mxu1 %v106_v5  ;;  %v188_v12 = vld [vmem:[%s1791_s2 + $0x4c8] sm:$0xff]  ;;  %v134_v14 = vld [vmem:[%s1791_s2 + $0x318] sm:$0xff] }
  0x63   :  { %556 = vmatpush.msrb.mxu3 %v190_v6  ;;  %v68_v15 = vld [vmem:[%s1791_s2 + $0x108] sm:$0xff]  ;;  %v102_v16 = vld [vmem:[%s1791_s2 + $0x218] sm:$0xff]  ;;  %547 = vmatpush.msra.mxu2 %v136_v9 }
  0x64   :  { %508 = vmatpush.msra.mxu0 %v70_v10  ;;  %527 = vmatpush.msra.mxu1 %v104_v11  ;;  %v186_v17 = vld [vmem:[%s1791_s2 + $0x4b8] sm:$0xff]  ;;  %v100_v19 = vld [vmem:[%s1791_s2 + $0x208] sm:$0xff] }
  0x65   :  { %v226_v18 = vld [vmem:[%s1791_s2 + $0x5f8] sm:$0xff]  ;;  %557 = vmatpush.msrb.mxu3 %v188_v12  ;;  %548 = vmatpush.msra.mxu2 %v134_v14  ;;  %v132_v20 = vld [vmem:[%s1791_s2 + $0x308] sm:$0xff] }
  0x66   :  { %509 = vmatpush.msra.mxu0 %v68_v15  ;;  %528 = vmatpush.msra.mxu1 %v102_v16  ;;  %v184_v21 = vld [vmem:[%s1791_s2 + $0x4a8] sm:$0xff]  ;;  %v258_v23 = vld [vmem:[%s1791_s2 + $0x6f8] sm:$0xff]  ;;  %v650_v15 = vld [vmem:[%s1793_s4 + $0x70] sm:$0xff] }
  0x67   :  { %v224_v22 = vld [vmem:[%s1791_s2 + $0x5e8] sm:$0xff]  ;;  %558 = vmatpush.msrb.mxu3 %v186_v17  ;;  %549 = vmatpush.msra.mxu2 %v132_v20  ;;  %v182_v25 = vld [vmem:[%s1791_s2 + $0x498] sm:$0xff] }
  0x68   :  { %574 = vmatpush.msrb.mxu0 %v226_v18  ;;  %v284_v24 = vld [vmem:[%s1791_s2 + $0x7c8] sm:$0xff]  ;;  %529 = vmatpush.msra.mxu1 %v100_v19  ;;  %v222_v26 = vld [vmem:[%s1791_s2 + $0x5d8] sm:$0xff]  ;;  %v648_v18 = vld [vmem:[%s1793_s4 + $0x60] sm:$0xff] }
  0x69   :  { %559 = vmatpush.msrb.mxu3 %v184_v21  ;;  %v256_v27 = vld [vmem:[%s1791_s2 + $0x6e8] sm:$0xff]  ;;  %v282_v28 = vld [vmem:[%s1791_s2 + $0x7b8] sm:$0xff]  ;;  %617 = vmatpush.msrb.mxu2 %v284_v24  ;;  %v642_v21 = vld [vmem:[%s1793_s4 + $0x30] sm:$0xff] }
  0x6a   :  { %575 = vmatpush.msrb.mxu0 %v224_v22  ;;  %594 = vmatpush.msrb.mxu1 %v258_v23  ;;  %v180_v29 = vld [vmem:[%s1791_s2 + $0x488] sm:$0xff]  ;;  %v254_v31 = vld [vmem:[%s1791_s2 + $0x6d8] sm:$0xff]  ;;  %v640_v23 = vld [vmem:[%s1793_s4 + $0x20] sm:$0xff] }
  0x6b   :  { %v220_v30 = vld [vmem:[%s1791_s2 + $0x5c8] sm:$0xff]  ;;  %560 = vmatpush.msrb.mxu3 %v182_v25  ;;  %618 = vmatpush.msrb.mxu2 %v282_v28  ;;  %v178_v33 = vld [vmem:[%s1791_s2 + $0x478] sm:$0xff]  ;;  %v638_v25 = vld [vmem:[%s1793_s4 + $0x10] sm:$0xff] }
  0x6c   :  { %576 = vmatpush.msrb.mxu0 %v222_v26  ;;  %v280_v32 = vld [vmem:[%s1791_s2 + $0x7a8] sm:$0xff]  ;;  %595 = vmatpush.msrb.mxu1 %v256_v27  ;;  %v218_v34 = vld [vmem:[%s1791_s2 + $0x5b8] sm:$0xff]  ;;  %v662_v27 = vld [vmem:[%s1794_s5] sm:$0xf] }
  0x6d   :  { %561 = vmatpush.msrb.mxu3 %v180_v29  ;;  %v252_v35 = vld [vmem:[%s1791_s2 + $0x6c8] sm:$0xff]  ;;  %v278_v36 = vld [vmem:[%s1791_s2 + $0x798] sm:$0xff]  ;;  %619 = vmatpush.msrb.mxu2 %v280_v32  ;;  %v636_v28 = vld [vmem:[%s1793_s4] sm:$0xff] }
  0x6e   :  { %577 = vmatpush.msrb.mxu0 %v220_v30  ;;  %596 = vmatpush.msrb.mxu1 %v254_v31  ;;  %v176_v37 = vld [vmem:[%s1791_s2 + $0x468] sm:$0xff]  ;;  %v250_v39 = vld [vmem:[%s1791_s2 + $0x6b8] sm:$0xff]  ;;  %v661_v29 = vld [vmem:[%s1790_s1] sm:$0x3] }
  0x6f   :  { %v216_v38 = vld [vmem:[%s1791_s2 + $0x5a8] sm:$0xff]  ;;  %562 = vmatpush.msrb.mxu3 %v178_v33  ;;  %620 = vmatpush.msrb.mxu2 %v278_v36  ;;  %v174_v41 = vld [vmem:[%s1791_s2 + $0x458] sm:$0xff]  ;;  %v285_v30 = vld [vmem:[%s1792_s3] sm:$0x3] }
  0x70   :  { %578 = vmatpush.msrb.mxu0 %v218_v34  ;;  %v276_v40 = vld [vmem:[%s1791_s2 + $0x788] sm:$0xff]  ;;  %597 = vmatpush.msrb.mxu1 %v252_v35  ;;  %v214_v42 = vld [vmem:[%s1791_s2 + $0x598] sm:$0xff]  ;;  %v287_v31 = vperm.slane %v285_v30, 0 }
  0x71   :  { %563 = vmatpush.msrb.mxu3 %v176_v37  ;;  %v248_v43 = vld [vmem:[%s1791_s2 + $0x6a8] sm:$0xff]  ;;  %v274_v44 = vld [vmem:[%s1791_s2 + $0x778] sm:$0xff]  ;;  %621 = vmatpush.msrb.mxu2 %v276_v40 }
  0x72   :  { %579 = vmatpush.msrb.mxu0 %v216_v38  ;;  %598 = vmatpush.msrb.mxu1 %v250_v39  ;;  %v172_v45 = vld [vmem:[%s1791_s2 + $0x448] sm:$0xff]  ;;  %v246_v48 = vld [vmem:[%s1791_s2 + $0x698] sm:$0xff] }
  0x73   :  { %v212_v46 = vld [vmem:[%s1791_s2 + $0x588] sm:$0xff]  ;;  %564 = vmatpush.msrb.mxu3 %v174_v41  ;;  %622 = vmatpush.msrb.mxu2 %v274_v44  ;;  %v170_v49 = vld [vmem:[%s1791_s2 + $0x438] sm:$0xff] }
  0x74   :  { %580 = vmatpush.msrb.mxu0 %v214_v42  ;;  %599 = vmatpush.msrb.mxu1 %v248_v43  ;;  %v210_v50 = vld [vmem:[%s1791_s2 + $0x578] sm:$0xff]  ;;  %v244_v51 = vld [vmem:[%s1791_s2 + $0x688] sm:$0xff] }
  0x75   :  { %565 = vmatpush.msrb.mxu3 %v172_v45  ;;  %v272_v54 = vld [vmem:[%s1791_s2 + $0x768] sm:$0xff]  ;;  %v242_v57 = vld [vmem:[%s1791_s2 + $0x678] sm:$0xff]  ;;  %550 = vmatmul.f32.vlgmr.msra.gmra.mxu2 %v1235_v53 }
  0x76   :  { %581 = vmatpush.msrb.mxu0 %v212_v46  ;;  %600 = vmatpush.msrb.mxu1 %v246_v48  ;;  %v168_v55 = vld [vmem:[%s1791_s2 + $0x428] sm:$0xff]  ;;  %v270_v59 = vld [vmem:[%s1791_s2 + $0x758] sm:$0xff] }
  0x77   :  { %490 = vmatmul.f32.vlgmr.msra.gmra.mxu3 %v1232_v52  ;;  %v208_v56 = vld [vmem:[%s1791_s2 + $0x568] sm:$0xff]  ;;  %623 = vmatpush.msrb.mxu2 %v272_v54  ;;  %v166_v52 = vld [vmem:[%s1791_s2 + $0x418] sm:$0xff]  ;;  %v658_v54 = vld [vmem:[%s1793_s4 + $0xb0] sm:$0xff] }
  0x78   :  { %566 = vmatpush.msrb.mxu3 %v170_v49  ;;  %582 = vmatpush.msrb.mxu0 %v210_v50  ;;  %v206_v60 = vld [vmem:[%s1791_s2 + $0x558] sm:$0xff]  ;;  %v240_v61 = vld [vmem:[%s1791_s2 + $0x668] sm:$0xff]  ;;  %v660_v50 = vld [vmem:[%s1793_s4 + $0xc0] sm:$0xff] }
  0x79   :  { %601 = vmatpush.msrb.mxu1 %v244_v51  ;;  %v268_v62 = vld [vmem:[%s1791_s2 + $0x748] sm:$0xff]  ;;  %624 = vmatpush.msrb.mxu2 %v270_v59  ;;  %v238_v1 = vld [vmem:[%s1791_s2 + $0x658] sm:$0xff]  ;;  %v654_v59 = vld [vmem:[%s1793_s4 + $0x90] sm:$0xff] }
  0x7a   :  { %567 = vmatpush.msrb.mxu3 %v168_v55  ;;  %583 = vmatpush.msrb.mxu0 %v208_v56  ;;  %v164_v63 = vld [vmem:[%s1791_s2 + $0x408] sm:$0xff]  ;;  %v266_v2 = vld [vmem:[%s1791_s2 + $0x738] sm:$0xff]  ;;  %v656_v56 = vld [vmem:[%s1793_s4 + $0xa0] sm:$0xff] }
  0x7b   :  { %602 = vmatpush.msrb.mxu1 %v242_v57  ;;  %v204_v0 = vld [vmem:[%s1791_s2 + $0x548] sm:$0xff]  ;;  %625 = vmatpush.msrb.mxu2 %v268_v62  ;;  %v202_v4 = vld [vmem:[%s1791_s2 + $0x538] sm:$0xff] }
  0x7c   :  { %568 = vmatpush.msrb.mxu3 %v166_v52  ;;  %584 = vmatpush.msrb.mxu0 %v206_v60  ;;  %v236_v5 = vld [vmem:[%s1791_s2 + $0x648] sm:$0xff]  ;;  %v234_v9 = vld [vmem:[%s1791_s2 + $0x638] sm:$0xff]  ;;  %v652_v60 = vld [vmem:[%s1793_s4 + $0x80] sm:$0xff] }
  0x7d   :  { %603 = vmatpush.msrb.mxu1 %v240_v61  ;;  %v264_v6 = vld [vmem:[%s1791_s2 + $0x728] sm:$0xff]  ;;  %626 = vmatpush.msrb.mxu2 %v266_v2  ;;  %v262_v10 = vld [vmem:[%s1791_s2 + $0x718] sm:$0xff]  ;;  %v288_v61 = vperm.slane %v285_v30, 1 }
  0x7e   :  { %569 = vmatpush.msrb.mxu3 %v164_v63  ;;  %585 = vmatpush.msrb.mxu0 %v204_v0  ;;  %v200_v53 = vld [vmem:[%s1791_s2 + $0x528] sm:$0xff]  ;;  %v651_v11 = vld [vmem:[%s1793_s4 + $0x78] sm:$0xff] }
  0x7f   :  { %604 = vmatpush.msrb.mxu1 %v238_v1  ;;  %510 = vmatmul.f32.vlgmr.msra.gmra.mxu0 %v1250_v58  ;;  %v198_v58 = vld [vmem:[%s1791_s2 + $0x518] sm:$0xff]  ;;  %v260_v12 = vld [vmem:[%s1791_s2 + $0x708] sm:$0xff] }
  0x80   :  { %570 = vmatmul.f32.vlgmr.msrb.gmra.mxu3 %v1289_v7  ;;  %586 = vmatpush.msrb.mxu0 %v202_v4  ;;  %v232_v7 = vld [vmem:[%s1791_s2 + $0x628] sm:$0xff]  ;;  %v643_v20 = vld [vmem:[%s1793_s4 + $0x38] sm:$0xff] }
  0x81   :  { %605 = vmatpush.msrb.mxu1 %v236_v5  ;;  %627 = vmatpush.msrb.mxu2 %v264_v6  ;;  %v196_v14 = vld [vmem:[%s1791_s2 + $0x508] sm:$0xff]  ;;  %v639_v24 = vld [vmem:[%s1793_s4 + $0x18] sm:$0xff] }
  0x82   :  { %530 = vmatmul.f32.vlgmr.msra.gmra.mxu1 %v1218_v47  ;;  %587 = vmatpush.msrb.mxu0 %v200_v53  ;;  %v230_v47 = vld [vmem:[%s1791_s2 + $0x618] sm:$0xff]  ;;  %v228_v16 = vld [vmem:[%s1791_s2 + $0x608] sm:$0xff] }
  0x83   :  { %606 = vmatpush.msrb.mxu1 %v234_v9  ;;  %628 = vmatpush.msrb.mxu2 %v262_v10  ;;  %v649_v17 = vld [vmem:[%s1793_s4 + $0x68] sm:$0xff]  ;;  %v659_v51 = vld [vmem:[%s1793_s4 + $0xb8] sm:$0xff] }
  0x84   :  { %588 = vmatpush.msrb.mxu0 %v198_v58  ;;  %695 = vmatpush.msra.mxu3 %v651_v11  ;;  %v645_v19 = vld [vmem:[%s1793_s4 + $0x48] sm:$0xff]  ;;  %v655_v57 = vld [vmem:[%s1793_s4 + $0x98] sm:$0xff] }
  0x85   :  { %607 = vmatpush.msrb.mxu1 %v232_v7  ;;  %629 = vmatpush.msrb.mxu2 %v260_v12  ;;  %v641_v22 = vld [vmem:[%s1793_s4 + $0x28] sm:$0xff] }
  0x86   :  { %799 = vmatmul.msk.f32.vlgmr.msrb.gmra.mxu2 %vm311_vm0, %v1291_v8  ;;  %589 = vmatpush.msrb.mxu0 %v196_v14  ;;  %v647_v8 = vld [vmem:[%s1793_s4 + $0x58] sm:$0xff]  ;;  %v637_v26 = vld [vmem:[%s1793_s4 + $0x8] sm:$0xff] }
  0x87   :  { %608 = vmatpush.msrb.mxu1 %v230_v47  ;;  %590 = vmatmul.f32.vlgmr.msrb.gmra.mxu0 %v1309_v13  ;;  %v646_v13 = vld [vmem:[%s1793_s4 + $0x50] sm:$0xff]  ;;  %v657_v55 = vld [vmem:[%s1793_s4 + $0xa8] sm:$0xff] }
  0x88   :  { %696 = vmatpush.msra.mxu3 %v650_v15  ;;  %800 = vmatpush.msk.msra.mxu2 %vm667_vm1, %v662_v27  ;;  %v653_v52 = vld [vmem:[%s1793_s4 + $0x88] sm:$0xff]  ;;  %v747_v15 = vld [vmem:[%s1796_s7 + $0x30] sm:$0x3]  ;;  %v807_v27 = vld [vmem:[%s1797_s8] ss:$0 sm:$0xff] }
  0x89   :  { %609 = vmatpush.msrb.mxu1 %v228_v16  ;;  %722 = vmatpush.msra.mxu0 %v660_v50  ;;  %v746_v16 = vld [vmem:[%s1796_s7 + $0x28] sm:$0xff] }
  0x8a   :  { %610 = vmatmul.f32.vlgmr.msrb.gmra.mxu1 %v1278_v3  ;;  %697 = vmatpush.msra.mxu3 %v649_v17  ;;  %v644_v3 = vld [vmem:[%s1793_s4 + $0x40] sm:$0xff] }
  0x8b   :  { %723 = vmatpush.msra.mxu0 %v659_v51  ;;  %803 = vmatpush.msk.msra.mxu1 %vm756_vm4, %v747_v15  ;;  %v745_v17 = vld [vmem:[%s1796_s7 + $0x20] sm:$0xff] }
  0x8c   :  { %698 = vmatpush.msra.mxu3 %v648_v18  ;;  %v744_v18 = vld [vmem:[%s1796_s7 + $0x18] sm:$0xff] }
  0x8d   :  { %724 = vmatpush.msra.mxu0 %v658_v54  ;;  %770 = vmatpush.msra.mxu1 %v746_v16 }
  0x8e   :  { %699 = vmatpush.msra.mxu3 %v647_v8  ;;  %801 = vmatmul.msk.f32.vlgmr.msra.gmra.mxu2 %vm663_vm2, %v661_v29  ;;  %v743_v8 = vld [vmem:[%s1796_s7 + $0x10] sm:$0xff] }
  0x8f   :  { %725 = vmatpush.msra.mxu0 %v657_v55  ;;  %771 = vmatpush.msra.mxu1 %v745_v17 }
  0x90   :  { %700 = vmatpush.msra.mxu3 %v646_v13  ;;  %v742_v13 = vld [vmem:[%s1796_s7 + $0x8] sm:$0xff] }
  0x91   :  { %726 = vmatpush.msra.mxu0 %v656_v56  ;;  %772 = vmatpush.msra.mxu1 %v744_v18 }
  0x92   :  { %701 = vmatpush.msra.mxu3 %v645_v19  ;;  %v741_v19 = vld [vmem:[%s1796_s7] sm:$0xff]  ;;  %s787_s7 = sshll.u32 %s834_s13, 4  ;;  %s788_s7 = int_to_ptr.vmem [resolvable:$true] %s787_s7 }
  0x93   :  { %727 = vmatpush.msra.mxu0 %v655_v57  ;;  %773 = vmatpush.msra.mxu1 %v743_v8 }
  0x94   :  { %702 = vmatpush.msra.mxu3 %v644_v3 }
  0x95   :  { %728 = vmatpush.msra.mxu0 %v654_v59  ;;  %774 = vmatpush.msra.mxu1 %v742_v13 }
  0x96   :  { %703 = vmatpush.msra.mxu3 %v643_v20 }
  0x97   :  { %729 = vmatpush.msra.mxu0 %v653_v52  ;;  %775 = vmatpush.msra.mxu1 %v741_v19 }
  0x98   :  { %704 = vmatpush.msra.mxu3 %v642_v21 }
  0x99   :  { %730 = vmatpush.msra.mxu0 %v652_v60 }
  0x9a   :  { %705 = vmatpush.msra.mxu3 %v641_v22  ;;  %v806_v22 = vld [vmem:[%s1795_s6] ss:$0 sm:$0xff] }
  0x9c   :  { %706 = vmatpush.msra.mxu3 %v640_v23 }
  0x9e   :  { %707 = vmatpush.msra.mxu3 %v639_v24 }
  0xa0   :  { %708 = vmatpush.msra.mxu3 %v638_v25 }
  0xa2   :  { %709 = vmatpush.msra.mxu3 %v637_v26 }
  0xa4   :  { %710 = vmatpush.msra.mxu3 %v636_v28 }
  0xb9   :  { %v331_v32 = vpop.f32.mrf.mxu0 }
  0xba   :  { %v332_v33 = vadd.f32 %v331_v32, %v287_v31 }
  0xbc   :  { %v351_v34 = vpop.f32.mrf.mxu1 }
  0xbd   :  { %v352_v35 = vadd.f32 %v351_v34, %v332_v33  ;;  %v371_v36 = vpop.f32.mrf.mxu2 }
  0xbf   :  { %v372_v37 = vadd.f32 %v371_v36, %v352_v35 }
  0xc0   :  { %v391_v38 = vpop.f32.mrf.mxu3 }
  0xc1   :  { %v392_v39 = vadd.f32 %v391_v38, %v372_v37 }
  0xc3   :  { %v411_v40 = vpop.f32.mrf.mxu0 }
  0xc4   :  { %v412_v41 = vadd.f32 %v411_v40, %v392_v39 }
  0xc6   :  { %v431_v42 = vpop.f32.mrf.mxu1 }
  0xc7   :  { %v432_v43 = vadd.f32 %v431_v42, %v412_v41  ;;  %v451_v44 = vpop.f32.mrf.mxu2 }
  0xc9   :  { %v452_v45 = vadd.f32 %v451_v44, %v432_v43  ;;  %v471_v46 = vpop.f32.mrf.mxu3 }
  0xcb   :  { %v472_v48 = vadd.f32 %v471_v46, %v452_v45 }
  0xcd   :  { %v634_v49 = vmax.f32 %v472_v48, 0.0 }
  0xcf   :  { %711 = vmatmul.f32.vlgmr.msra.gmra.mxu3 %v634_v49 }
  0xf8   :  { %v551_v5 = vpop.f32.mrf.mxu2 }
  0xfa   :  { %v491_v62 = vpop.f32.mrf.mxu3 }
  0xfb   :  { %v492_v63 = vadd.f32 %v491_v62, %v288_v61 }
  0xfc   :  { %v511_v0 = vpop.f32.mrf.mxu0 }
  0xfd   :  { %v512_v1 = vadd.f32 %v511_v0, %v492_v63 }
  0xff   :  { %v531_v2 = vpop.f32.mrf.mxu1 }
 0x100   :  { %v532_v4 = vadd.f32 %v531_v2, %v512_v1 }
 0x102   :  { %v552_v6 = vadd.f32 %v551_v5, %v532_v4 }
 0x103   :  { %v571_v53 = vpop.f32.mrf.mxu3 }
 0x104   :  { %v572_v9 = vadd.f32 %v571_v53, %v552_v6  ;;  %v591_v10 = vpop.f32.mrf.mxu0 }
 0x106   :  { %v592_v58 = vadd.f32 %v591_v10, %v572_v9 }
 0x107   :  { %v611_v11 = vpop.f32.mrf.mxu1 }
 0x108   :  { %v612_v7 = vadd.f32 %v611_v11, %v592_v58 }
 0x109   :  { %v631_v12 = vpop.f32.mrf.mxu2 }
 0x10a   :  { %v632_v14 = vadd.f32 %v631_v12, %v612_v7 }
 0x10c   :  { %v635_v47 = vmax.f32 %v632_v14, 0.0 }
 0x10e   :  { %802 = vmatmul.msk.f32.vlgmr.msra.gmra.mxu0 %vm691_vm3, %v635_v47 }
 0x111   :  { %v688_v3 = vpop.f32.mrf.mxu2 }
 0x152   :  { %v712_v20 = vpop.f32.mrf.mxu3 }
 0x153   :  { %v713_v21 = vadd.f32 %v712_v20, %v688_v3 }
 0x18b   :  { %v732_v23 = vpop.f32.mrf.mxu0 }
 0x18c   :  { %v733_v24 = vadd.f32 %v732_v23, %v713_v21 }
 0x18e   :  { %v739_v25 = vadd.f32 %v806_v22, %v733_v24 }
 0x190   :  { %v740_v26 = vmax.f32 %v739_v25, 0.0 }
 0x192   :  { %804 = vmatmul.msk.f32.vlgmr.msra.gmra.mxu1 %vm752_vm5, %v740_v26 }
 0x20f   :  { %v777_v28 = vpop.f32.mrf.mxu1 }
 0x210   :  { %v778_v29 = vadd.f32 %v807_v27, %v777_v28 }
 0x212   :  { %781 = vst.msk [vmem:[#allocation2] sm:$0x3] %vm780_vm6, %v778_v29 }
 0x213   :  { %792 = dma.vmem_to_hbm [thread:$0]  %s788_s7, 32, %s790_s16, [#allocation3]  }
 0x214   :  { %832 = dma.done.wait [#allocation3], 32  }
 0x215   :  { %833 = vsyncadd [#allocation3], 4294967264 }
 0x216   :  { %797 = vsyncpa [#allocation3], 1 }

</bundles_post_ra>
